<compile_context>
chip_gen: v7x
topology: tpu7x:2x2x1
jax: 0.10.0
libtpu: 0.0.40
codegen_flags: <defaults>
</compile_context>

<pallas_src>
import functools

import jax
import jax.numpy as jnp
import numpy as np
from jax import lax
from jax.experimental import pallas as pl
from jax.experimental.pallas import tpu as pltpu


def _paco_tile_kernel(feat_k_ref, sup_ref, lab_col_ref, lab_row_ref,
                      wloss_ref, *, alpha, beta, gamma, temperature,
                      base_temperature, use_bf16_matmul, use_bf16_exp):
    B, _ = feat_k_ref.shape
    TM, C = sup_ref.shape

    # Query tile = slice of the resident key buffer (no separate input).
    row0 = pl.multiple_of(pl.program_id(0) * TM, TM)
    feat_q = feat_k_ref[pl.ds(row0, TM), :]               # (TM, D)
    feat_k = feat_k_ref[...]                              # (B, D)

    # Fold 1/temperature into the small (TM, D) query tile instead of the
    # (TM, B) Gram result.
    feat_q = feat_q * jnp.float32(1.0 / temperature)

    if use_bf16_matmul:
        feat_q = feat_q.astype(jnp.bfloat16)
        feat_k = feat_k.astype(jnp.bfloat16)

    # (TM, B) Gram tile on the MXU; contract last dims of both operands
    # directly (no explicit .T / layout transpose).
    adc = lax.dot_general(feat_q, feat_k,
                          dimension_numbers=(((1,), (1,)), ((), ())),
                          preferred_element_type=jnp.float32)

    sup = sup_ref[...]                                    # (TM, C) f32
    lab_col = lab_col_ref[...]                            # (TM, 1) int32
    lab_row = lab_row_ref[...]                            # (1, B)  int32

    # Row-wise max over the virtual concat([sup_logits, adc], axis=1).
    row_max = jnp.maximum(jnp.max(sup, axis=1, keepdims=True),
                          jnp.max(adc, axis=1, keepdims=True))
    l_sup = sup - row_max                                 # (TM, C)
    l_con = adc - row_max                                 # (TM, B)

    # Masks from 1-D iotas + broadcasting (no full-tile int32 temporaries).
    col_gid = lax.broadcasted_iota(jnp.int32, (1, B), 1)  # (1, B)
    row_gid = lax.broadcasted_iota(jnp.int32, (TM, 1), 0) + row0  # (TM, 1)
    not_diag = row_gid != col_gid                         # (TM, B) bool
    pos_con = jnp.logical_and(lab_col == lab_row, not_diag)  # contrast positives

    cls_id = lax.broadcasted_iota(jnp.int32, (1, C), 1)   # (1, C)
    one_hot = cls_id == lab_col                           # (TM, C) bool; label==C -> all False

    # Softmax denominator over the virtual concat (diag masked, gamma folded).
    if use_bf16_exp:
        # bf16 EUP path for v6e/v7x; f32 accumulation.  Do NOT enable on v5e.
        exp_sup = jnp.exp(l_sup.astype(jnp.bfloat16)).astype(jnp.float32)
        exp_con = jnp.exp(l_con.astype(jnp.bfloat16)).astype(jnp.float32)
    else:
        exp_sup = jnp.exp(l_sup)
        exp_con = jnp.exp(l_con)
    exp_sup_sum = jnp.sum(exp_sup, axis=1, keepdims=True)
    exp_con_sum = jnp.sum(jnp.where(not_diag, exp_con, 0.0),
                          axis=1, keepdims=True)
    log_denom = jnp.log(exp_sup_sum + gamma * exp_con_sum + 1e-12)  # (TM, 1)

    # count_sup == one_hot.sum(1) == 1 iff 0 <= label < C: a (TM,1) compare
    # instead of a (TM,C) lane reduction.
    count_sup = jnp.logical_and(lab_col >= 0, lab_col < C).astype(jnp.float32)
    count_con = jnp.sum(pos_con.astype(jnp.float32), axis=1, keepdims=True)

    # sum(mask * (l - log_denom)) = sum(mask * l) - log_denom * sum(mask):
    # no (TM,B)/(TM,C) log-prob temporaries are materialized.
    num_sup = jnp.sum(jnp.where(one_hot, l_sup, 0.0), axis=1, keepdims=True)
    num_con = jnp.sum(jnp.where(pos_con, l_con, 0.0), axis=1, keepdims=True)

    den = beta * count_sup + alpha * count_con
    num = beta * num_sup + alpha * num_con - log_denom * den
    mean_log_prob_pos = num / (den + 1e-12)

    loss_per = -(temperature / base_temperature) * mean_log_prob_pos
    wloss_ref[...] = count_sup * loss_per                 # (TM, 1)


def _pick_tile(batch, max_tm=128):
    """Largest row tile (multiple of 8, <=max_tm) dividing the batch.

    Prefers an even tile count so the 'parallel' grid axis shards evenly
    across v7x's two TensorCores.
    """
    best = None
    for tm in (128, 64, 32, 16, 8):
        if tm <= max_tm and tm <= batch and batch % tm == 0:
            if best is None:
                best = tm
            if (batch // tm) % 2 == 0:
                return tm
    return best if best is not None else batch  # not a multiple of 8: one tile.


def paco_loss(features, labels, sup_logits, *, alpha, beta=1.0, gamma=1.0,
              supt=1.0, temperature=1.0, base_temperature=None,
              num_classes=1000, use_bf16_matmul=False, use_bf16_exp=False,
              tile_rows=None):
    # NOTE: `supt` and `K` are unused in the reference forward pass.
    del supt
    if base_temperature is None:
        base_temperature = temperature

    B, D = features.shape
    C = sup_logits.shape[1]
    assert C == num_classes
    TM = _pick_tile(B) if tile_rows is None else tile_rows
    assert B % TM == 0

    lab_col = labels.reshape(B, 1).astype(jnp.int32)
    # Labels passed a second time pre-transposed -> no in-kernel XLU transpose.
    lab_row = labels.reshape(1, B).astype(jnp.int32)

    kernel = functools.partial(
        _paco_tile_kernel,
        alpha=float(alpha), beta=float(beta), gamma=float(gamma),
        temperature=float(temperature),
        base_temperature=float(base_temperature),
        use_bf16_matmul=bool(use_bf16_matmul),
        use_bf16_exp=bool(use_bf16_exp))

    # VMEM budget: resident key matrix (+1 spare buffer for the fallback),
    # double-buffered sup_logits rows, label/output blocks, and headroom for
    # the (TM, B) Gram/exp working set; clamped to a range safe on all gens.
    est = (2 * B * D * 4 + 2 * TM * C * 4 + 2 * 8 * B * 4
           + 4 * TM * 128 * 4 + 6 * TM * B * 4 + (8 << 20))
    vmem_limit = int(min(64 << 20, max(32 << 20, est)))

    def build(single_buffer_resident):
        def resident(shape):
            # Constant index_map -> single VMEM buffer (no double-buffering).
            if single_buffer_resident:
                return pl.BlockSpec(shape, lambda i: (0, 0),
                                    pipeline_mode=pl.Buffered(1))
            return pl.BlockSpec(shape, lambda i: (0, 0))

        return pl.pallas_call(
            kernel,
            out_shape=jax.ShapeDtypeStruct((B, 1), jnp.float32),
            grid_spec=pltpu.PrefetchScalarGridSpec(
                num_scalar_prefetch=0,
                grid=(B // TM,),
                in_specs=[
                    resident((B, D)),                         # key matrix (resident)
                    pl.BlockSpec((TM, C), lambda i: (i, 0)),  # sup_logits rows
                    pl.BlockSpec((TM, 1), lambda i: (i, 0)),  # labels, column tile
                    resident((1, B)),                         # labels, row (resident)
                ],
                out_specs=pl.BlockSpec((TM, 1), lambda i: (i, 0)),
            ),
            compiler_params=pltpu.CompilerParams(
                dimension_semantics=("parallel",),
                vmem_limit_bytes=vmem_limit),
        )

    try:
        wloss = build(True)(features, sup_logits, lab_col, lab_row)
    except Exception:
        # Fallback if Buffered(1) is not supported by this jax version.
        wloss = build(False)(features, sup_logits, lab_col, lab_row)

    # weight == one_hot.sum(1): 1.0 iff 0 <= label < C.  Computed on B scalars
    # in the wrapper instead of a (TM, C) reduction + second output DMA.
    weight = jnp.logical_and(labels >= 0,
                             labels < num_classes).astype(jnp.float32)
    return jnp.sum(wloss) / (jnp.sum(weight) + 1e-12)


def paco_loss_ref(features, labels, sup_logits, *, alpha, beta=1.0, gamma=1.0,
                  temperature=1.0, base_temperature=None, num_classes=1000):
    """Pure-JAX reference mirroring the PyTorch forward line by line."""
    if base_temperature is None:
        base_temperature = temperature
    B = features.shape[0]
    labels = labels.reshape(-1, 1)
    mask = (labels == labels.T).astype(jnp.float32)
    adc = jnp.matmul(features, features.T,
                     precision=jax.lax.Precision.HIGHEST) / temperature
    adc = jnp.concatenate((sup_logits, adc), axis=1)
    logits_max = jnp.max(adc, axis=1, keepdims=True)
    logits = adc - logits_max
    logits_mask = jnp.ones((B, B), jnp.float32) - jnp.eye(B, dtype=jnp.float32)
    mask = mask * logits_mask
    one_hot = jax.nn.one_hot(labels.reshape(-1), num_classes + 1,
                             dtype=jnp.float32)[:, :-1]
    mask = jnp.concatenate((one_hot * beta, mask * alpha), axis=1)
    logits_mask = jnp.concatenate(
        (jnp.ones((B, num_classes), jnp.float32), gamma * logits_mask), axis=1)
    exp_logits = jnp.exp(logits) * logits_mask
    log_prob = logits - jnp.log(jnp.sum(exp_logits, axis=1, keepdims=True) + 1e-12)
    mean_log_prob_pos = jnp.sum(mask * log_prob, axis=1) / (jnp.sum(mask, axis=1) + 1e-12)
    loss = -(temperature / base_temperature) * mean_log_prob_pos
    loss = jnp.sum(jnp.sum(one_hot, axis=1) * loss) / (jnp.sum(one_hot) + 1e-12)
    return loss


if __name__ == "__main__":
    # Lane-dense small problem: B multiple of 128, C = 128 classes, labels may
    # equal C (the "ignore" slot of the one-hot).  TM=128 -> grid of 2 tiles.
    B, D, C = 256, 64, 128
    alpha, beta, gamma = 0.05, 1.0, 1.0
    temperature = 0.07

    key = jax.random.PRNGKey(0)
    kf, kl, ks = jax.random.split(key, 3)
    features = jax.random.normal(kf, (B, D), dtype=jnp.float32)
    features = features / jnp.linalg.norm(features, axis=1, keepdims=True)
    labels = jax.random.randint(kl, (B,), 0, C + 1, dtype=jnp.int32)
    sup_logits = jax.random.normal(ks, (B, C), dtype=jnp.float32)

    loss = paco_loss(features, labels, sup_logits, alpha=alpha, beta=beta,
                     gamma=gamma, temperature=temperature, num_classes=C)
    loss = jax.block_until_ready(loss)

    loss_ref = paco_loss_ref(features, labels, sup_logits, alpha=alpha,
                             beta=beta, gamma=gamma, temperature=temperature,
                             num_classes=C)
    np.testing.assert_allclose(np.asarray(loss), np.asarray(loss_ref),
                               rtol=1e-4, atol=1e-4)
    print("KERNEL_OK")
</pallas_src>

<mosaic_0001>
module attributes {stable_mosaic.version = 11 : i64} {
  func.func @_paco_tile_kernel(%arg0: i32, %arg1: memref<256x64xf32, #tpu.memory_space<vmem>>, %arg2: memref<128x128xf32, #tpu.memory_space<vmem>>, %arg3: memref<128x1xi32, #tpu.memory_space<vmem>>, %arg4: memref<1x256xi32, #tpu.memory_space<vmem>>, %arg5: memref<128x1xf32, #tpu.memory_space<vmem>>) attributes {dimension_semantics = [#tpu.dimension_semantics<parallel>], iteration_bounds = array<i64: 2>, scalar_prefetch = 0 : i64, scratch_operands = 0 : i64, tpu.core_type = #tpu.core_type<tc>, window_params = [{pipeline_mode = #tpu.pipeline_mode<synchronous>, transform_indices = @transform_0, window_bounds = array<i64: 256, 64>}, {transform_indices = @transform_1, window_bounds = array<i64: 128, 128>}, {transform_indices = @transform_2, window_bounds = array<i64: 128, 1>}, {pipeline_mode = #tpu.pipeline_mode<synchronous>, transform_indices = @transform_3, window_bounds = array<i64: 1, 256>}, {transform_indices = @transform_4, window_bounds = array<i64: 128, 1>}]} {
    %c128_i32 = arith.constant 128 : i32
    %0 = arith.muli %arg0, %c128_i32 : i32
    %1 = tpu.assume_multiple %0, 128 : i32
    %2 = arith.index_cast %1 : i32 to index
    %c0 = arith.constant 0 : index
    %3 = vector.load %arg1[%2, %c0] : memref<256x64xf32, #tpu.memory_space<vmem>>, vector<128x64xf32>
    %c0_0 = arith.constant 0 : index
    %c0_1 = arith.constant 0 : index
    %4 = vector.load %arg1[%c0_0, %c0_1] : memref<256x64xf32, #tpu.memory_space<vmem>>, vector<256x64xf32>
    %cst = arith.constant 14.2857141 : f32
    %5 = vector.broadcast %cst : f32 to vector<128x64xf32>
    %6 = arith.mulf %3, %5 : vector<128x64xf32>
    %cst_2 = arith.constant dense<0.000000e+00> : vector<128x256xf32>
    %7 = tpu.matmul %6, %4, %cst_2 {dimension_numbers = #tpu.dot_dimension_numbers<[1], [1], [0], [0], [0, 0, 1, 0], [], []>} : vector<128x64xf32>, vector<256x64xf32>, vector<128x256xf32> -> vector<128x256xf32>
    %c0_3 = arith.constant 0 : index
    %c0_4 = arith.constant 0 : index
    %8 = vector.load %arg2[%c0_3, %c0_4] : memref<128x128xf32, #tpu.memory_space<vmem>>, vector<128x128xf32>
    %c0_5 = arith.constant 0 : index
    %c0_6 = arith.constant 0 : index
    %9 = vector.load %arg3[%c0_5, %c0_6] : memref<128x1xi32, #tpu.memory_space<vmem>>, vector<128x1xi32>
    %c0_7 = arith.constant 0 : index
    %c0_8 = arith.constant 0 : index
    %10 = vector.load %arg4[%c0_7, %c0_8] : memref<1x256xi32, #tpu.memory_space<vmem>>, vector<1x256xi32>
    %cst_9 = arith.constant dense<0xFF800000> : vector<128xf32>
    %11 = vector.multi_reduction <maximumf>, %8, %cst_9 [1] : vector<128x128xf32> to vector<128xf32>
    %12 = vector.shape_cast %11 : vector<128xf32> to vector<128x1xf32>
    %cst_10 = arith.constant dense<0xFF800000> : vector<128xf32>
    %13 = vector.multi_reduction <maximumf>, %7, %cst_10 [1] : vector<128x256xf32> to vector<128xf32>
    %14 = vector.shape_cast %13 : vector<128xf32> to vector<128x1xf32>
    %15 = arith.maximumf %12, %14 : vector<128x1xf32>
    %16 = vector.broadcast %15 : vector<128x1xf32> to vector<128x128xf32>
    %17 = arith.subf %8, %16 : vector<128x128xf32>
    %18 = vector.broadcast %15 : vector<128x1xf32> to vector<128x256xf32>
    %19 = arith.subf %7, %18 : vector<128x256xf32>
    %20 = tpu.iota {dimensions = array<i32: 1>} : vector<1x256xi32>
    %21 = tpu.iota {dimensions = array<i32: 0>} : vector<128x1xi32>
    %22 = vector.broadcast %1 : i32 to vector<128x1xi32>
    %23 = arith.addi %21, %22 : vector<128x1xi32>
    %24 = vector.broadcast %23 : vector<128x1xi32> to vector<128x256xi32>
    %25 = vector.broadcast %20 : vector<1x256xi32> to vector<128x256xi32>
    %26 = arith.cmpi ne, %24, %25 : vector<128x256xi32>
    %27 = vector.broadcast %9 : vector<128x1xi32> to vector<128x256xi32>
    %28 = vector.broadcast %10 : vector<1x256xi32> to vector<128x256xi32>
    %29 = arith.cmpi eq, %27, %28 : vector<128x256xi32>
    %30 = arith.andi %29, %26 : vector<128x256xi1>
    %31 = tpu.iota {dimensions = array<i32: 1>} : vector<1x128xi32>
    %32 = vector.broadcast %31 : vector<1x128xi32> to vector<128x128xi32>
    %33 = vector.broadcast %9 : vector<128x1xi32> to vector<128x128xi32>
    %34 = arith.cmpi eq, %32, %33 : vector<128x128xi32>
    %35 = math.exp %17 : vector<128x128xf32>
    %36 = math.exp %19 : vector<128x256xf32>
    %cst_11 = arith.constant dense<0.000000e+00> : vector<128xf32>
    %37 = vector.multi_reduction <add>, %35, %cst_11 [1] : vector<128x128xf32> to vector<128xf32>
    %38 = vector.shape_cast %37 : vector<128xf32> to vector<128x1xf32>
    %cst_12 = arith.constant 0.000000e+00 : f32
    %39 = vector.broadcast %cst_12 : f32 to vector<128x256xf32>
    %40 = arith.select %26, %36, %39 : vector<128x256xi1>, vector<128x256xf32>
    %cst_13 = arith.constant dense<0.000000e+00> : vector<128xf32>
    %41 = vector.multi_reduction <add>, %40, %cst_13 [1] : vector<128x256xf32> to vector<128xf32>
    %42 = vector.shape_cast %41 : vector<128xf32> to vector<128x1xf32>
    %cst_14 = arith.constant 1.000000e+00 : f32
    %43 = vector.broadcast %cst_14 : f32 to vector<128x1xf32>
    %44 = arith.mulf %43, %42 : vector<128x1xf32>
    %45 = arith.addf %38, %44 : vector<128x1xf32>
    %cst_15 = arith.constant 9.99999996E-13 : f32
    %46 = vector.broadcast %cst_15 : f32 to vector<128x1xf32>
    %47 = arith.addf %45, %46 : vector<128x1xf32>
    %48 = math.log %47 : vector<128x1xf32>
    %c0_i32 = arith.constant 0 : i32
    %49 = vector.broadcast %c0_i32 : i32 to vector<128x1xi32>
    %50 = arith.cmpi sge, %9, %49 : vector<128x1xi32>
    %c128_i32_16 = arith.constant 128 : i32
    %51 = vector.broadcast %c128_i32_16 : i32 to vector<128x1xi32>
    %52 = arith.cmpi slt, %9, %51 : vector<128x1xi32>
    %53 = arith.andi %50, %52 : vector<128x1xi1>
    %54 = arith.extui %53 : vector<128x1xi1> to vector<128x1xi32>
    %55 = arith.sitofp %54 : vector<128x1xi32> to vector<128x1xf32>
    %56 = arith.extui %30 : vector<128x256xi1> to vector<128x256xi32>
    %57 = arith.sitofp %56 : vector<128x256xi32> to vector<128x256xf32>
    %cst_17 = arith.constant dense<0.000000e+00> : vector<128xf32>
    %58 = vector.multi_reduction <add>, %57, %cst_17 [1] : vector<128x256xf32> to vector<128xf32>
    %59 = vector.shape_cast %58 : vector<128xf32> to vector<128x1xf32>
    %cst_18 = arith.constant 0.000000e+00 : f32
    %60 = vector.broadcast %cst_18 : f32 to vector<128x128xf32>
    %61 = arith.select %34, %17, %60 : vector<128x128xi1>, vector<128x128xf32>
    %cst_19 = arith.constant dense<0.000000e+00> : vector<128xf32>
    %62 = vector.multi_reduction <add>, %61, %cst_19 [1] : vector<128x128xf32> to vector<128xf32>
    %63 = vector.shape_cast %62 : vector<128xf32> to vector<128x1xf32>
    %cst_20 = arith.constant 0.000000e+00 : f32
    %64 = vector.broadcast %cst_20 : f32 to vector<128x256xf32>
    %65 = arith.select %30, %19, %64 : vector<128x256xi1>, vector<128x256xf32>
    %cst_21 = arith.constant dense<0.000000e+00> : vector<128xf32>
    %66 = vector.multi_reduction <add>, %65, %cst_21 [1] : vector<128x256xf32> to vector<128xf32>
    %67 = vector.shape_cast %66 : vector<128xf32> to vector<128x1xf32>
    %cst_22 = arith.constant 1.000000e+00 : f32
    %68 = vector.broadcast %cst_22 : f32 to vector<128x1xf32>
    %69 = arith.mulf %68, %55 : vector<128x1xf32>
    %cst_23 = arith.constant 5.000000e-02 : f32
    %70 = vector.broadcast %cst_23 : f32 to vector<128x1xf32>
    %71 = arith.mulf %70, %59 : vector<128x1xf32>
    %72 = arith.addf %69, %71 : vector<128x1xf32>
    %cst_24 = arith.constant 1.000000e+00 : f32
    %73 = vector.broadcast %cst_24 : f32 to vector<128x1xf32>
    %74 = arith.mulf %73, %63 : vector<128x1xf32>
    %cst_25 = arith.constant 5.000000e-02 : f32
    %75 = vector.broadcast %cst_25 : f32 to vector<128x1xf32>
    %76 = arith.mulf %75, %67 : vector<128x1xf32>
    %77 = arith.addf %74, %76 : vector<128x1xf32>
    %78 = arith.mulf %48, %72 : vector<128x1xf32>
    %79 = arith.subf %77, %78 : vector<128x1xf32>
    %cst_26 = arith.constant 9.99999996E-13 : f32
    %80 = vector.broadcast %cst_26 : f32 to vector<128x1xf32>
    %81 = arith.addf %72, %80 : vector<128x1xf32>
    %82 = arith.divf %79, %81 : vector<128x1xf32>
    %cst_27 = arith.constant -1.000000e+00 : f32
    %83 = vector.broadcast %cst_27 : f32 to vector<128x1xf32>
    %84 = arith.mulf %83, %82 : vector<128x1xf32>
    %85 = arith.mulf %55, %84 : vector<128x1xf32>
    %c0_28 = arith.constant 0 : index
    %c0_29 = arith.constant 0 : index
    %86 = vector.load %arg5[%c0_28, %c0_29] : memref<128x1xf32, #tpu.memory_space<vmem>>, vector<128x1xf32>
    tpu.vector_store %arg5[%c0_28, %c0_29], %85 {strides = array<i32>} : memref<128x1xf32, #tpu.memory_space<vmem>>, vector<128x1xf32>,
    return
  }
  func.func @transform_0(%arg0: i32) -> (i32, i32) {
    %c0_i32 = arith.constant 0 : i32
    %c0_i32_0 = arith.constant 0 : i32
    %c0_i32_1 = arith.constant 0 : i32
    return %c0_i32, %c0_i32_0 : i32, i32
  }
  func.func @transform_1(%arg0: i32) -> (i32, i32) {
    %c0_i32 = arith.constant 0 : i32
    %c0_i32_0 = arith.constant 0 : i32
    return %arg0, %c0_i32 : i32, i32
  }
  func.func @transform_2(%arg0: i32) -> (i32, i32) {
    %c0_i32 = arith.constant 0 : i32
    %c0_i32_0 = arith.constant 0 : i32
    return %arg0, %c0_i32 : i32, i32
  }
  func.func @transform_3(%arg0: i32) -> (i32, i32) {
    %c0_i32 = arith.constant 0 : i32
    %c0_i32_0 = arith.constant 0 : i32
    %c0_i32_1 = arith.constant 0 : i32
    return %c0_i32, %c0_i32_0 : i32, i32
  }
  func.func @transform_4(%arg0: i32) -> (i32, i32) {
    %c0_i32 = arith.constant 0 : i32
    %c0_i32_0 = arith.constant 0 : i32
    return %arg0, %c0_i32 : i32, i32
  }
}

module attributes {stable_mosaic.version = 11 : i64} {
  func.func @_paco_tile_kernel(%arg0: i32, %arg1: memref<256x64xf32, #tpu.memory_space<vmem>>, %arg2: memref<128x128xf32, #tpu.memory_space<vmem>>, %arg3: memref<128x1xi32, #tpu.memory_space<vmem>>, %arg4: memref<1x256xi32, #tpu.memory_space<vmem>>, %arg5: memref<128x1xf32, #tpu.memory_space<vmem>>) attributes {dimension_semantics = [#tpu.dimension_semantics<parallel>], iteration_bounds = array<i64: 2>, scalar_prefetch = 0 : i64, scratch_operands = 0 : i64, tpu.core_type = #tpu.core_type<tc>, window_params = [{pipeline_mode = #tpu.pipeline_mode<synchronous>, transform_indices = @transform_0, window_bounds = array<i64: 256, 64>}, {transform_indices = @transform_1, window_bounds = array<i64: 128, 128>}, {transform_indices = @transform_2, window_bounds = array<i64: 128, 1>}, {pipeline_mode = #tpu.pipeline_mode<synchronous>, transform_indices = @transform_3, window_bounds = array<i64: 1, 256>}, {transform_indices = @transform_4, window_bounds = array<i64: 128, 1>}]} {
    %c128_i32 = arith.constant 128 : i32
    %0 = arith.muli %arg0, %c128_i32 : i32
    %1 = tpu.assume_multiple %0, 128 : i32
    %2 = arith.index_cast %1 : i32 to index
    %c0 = arith.constant 0 : index
    %3 = vector.load %arg1[%2, %c0] : memref<256x64xf32, #tpu.memory_space<vmem>>, vector<128x64xf32>
    %c0_0 = arith.constant 0 : index
    %c0_1 = arith.constant 0 : index
    %4 = vector.load %arg1[%c0_0, %c0_1] : memref<256x64xf32, #tpu.memory_space<vmem>>, vector<256x64xf32>
    %cst = arith.constant 14.2857141 : f32
    %5 = vector.broadcast %cst : f32 to vector<128x64xf32>
    %6 = arith.mulf %3, %5 : vector<128x64xf32>
    %cst_2 = arith.constant dense<0.000000e+00> : vector<128x256xf32>
    %7 = tpu.matmul %6, %4, %cst_2 {dimension_numbers = #tpu.dot_dimension_numbers<[1], [1], [0], [0], [0, 0, 1, 0], [], []>} : vector<128x64xf32>, vector<256x64xf32>, vector<128x256xf32> -> vector<128x256xf32>
    %c0_3 = arith.constant 0 : index
    %c0_4 = arith.constant 0 : index
    %8 = vector.load %arg2[%c0_3, %c0_4] : memref<128x128xf32, #tpu.memory_space<vmem>>, vector<128x128xf32>
    %c0_5 = arith.constant 0 : index
    %c0_6 = arith.constant 0 : index
    %9 = vector.load %arg3[%c0_5, %c0_6] : memref<128x1xi32, #tpu.memory_space<vmem>>, vector<128x1xi32>
    %c0_7 = arith.constant 0 : index
    %c0_8 = arith.constant 0 : index
    %10 = vector.load %arg4[%c0_7, %c0_8] : memref<1x256xi32, #tpu.memory_space<vmem>>, vector<1x256xi32>
    %cst_9 = arith.constant dense<0xFF800000> : vector<128xf32>
    %11 = vector.multi_reduction <maximumf>, %8, %cst_9 [1] : vector<128x128xf32> to vector<128xf32>
    %12 = vector.shape_cast %11 : vector<128xf32> to vector<128x1xf32>
    %cst_10 = arith.constant dense<0xFF800000> : vector<128xf32>
    %13 = vector.multi_reduction <maximumf>, %7, %cst_10 [1] : vector<128x256xf32> to vector<128xf32>
    %14 = vector.shape_cast %13 : vector<128xf32> to vector<128x1xf32>
    %15 = arith.maximumf %12, %14 : vector<128x1xf32>
    %16 = vector.broadcast %15 : vector<128x1xf32> to vector<128x128xf32>
    %17 = arith.subf %8, %16 : vector<128x128xf32>
    %18 = vector.broadcast %15 : vector<128x1xf32> to vector<128x256xf32>
    %19 = arith.subf %7, %18 : vector<128x256xf32>
    %20 = tpu.iota {dimensions = array<i32: 1>} : vector<1x256xi32>
    %21 = tpu.iota {dimensions = array<i32: 0>} : vector<128x1xi32>
    %22 = vector.broadcast %1 : i32 to vector<128x1xi32>
    %23 = arith.addi %21, %22 : vector<128x1xi32>
    %24 = vector.broadcast %23 : vector<128x1xi32> to vector<128x256xi32>
    %25 = vector.broadcast %20 : vector<1x256xi32> to vector<128x256xi32>
    %26 = arith.cmpi ne, %24, %25 : vector<128x256xi32>
    %27 = vector.broadcast %9 : vector<128x1xi32> to vector<128x256xi32>
    %28 = vector.broadcast %10 : vector<1x256xi32> to vector<128x256xi32>
    %29 = arith.cmpi eq, %27, %28 : vector<128x256xi32>
    %30 = arith.andi %29, %26 : vector<128x256xi1>
    %31 = tpu.iota {dimensions = array<i32: 1>} : vector<1x128xi32>
    %32 = vector.broadcast %31 : vector<1x128xi32> to vector<128x128xi32>
    %33 = vector.broadcast %9 : vector<128x1xi32> to vector<128x128xi32>
    %34 = arith.cmpi eq, %32, %33 : vector<128x128xi32>
    %35 = math.exp %17 : vector<128x128xf32>
    %36 = math.exp %19 : vector<128x256xf32>
    %cst_11 = arith.constant dense<0.000000e+00> : vector<128xf32>
    %37 = vector.multi_reduction <add>, %35, %cst_11 [1] : vector<128x128xf32> to vector<128xf32>
    %38 = vector.shape_cast %37 : vector<128xf32> to vector<128x1xf32>
    %cst_12 = arith.constant 0.000000e+00 : f32
    %39 = vector.broadcast %cst_12 : f32 to vector<128x256xf32>
    %40 = arith.select %26, %36, %39 : vector<128x256xi1>, vector<128x256xf32>
    %cst_13 = arith.constant dense<0.000000e+00> : vector<128xf32>
    %41 = vector.multi_reduction <add>, %40, %cst_13 [1] : vector<128x256xf32> to vector<128xf32>
    %42 = vector.shape_cast %41 : vector<128xf32> to vector<128x1xf32>
    %cst_14 = arith.constant 1.000000e+00 : f32
    %43 = vector.broadcast %cst_14 : f32 to vector<128x1xf32>
    %44 = arith.mulf %43, %42 : vector<128x1xf32>
    %45 = arith.addf %38, %44 : vector<128x1xf32>
    %cst_15 = arith.constant 9.99999996E-13 : f32
    %46 = vector.broadcast %cst_15 : f32 to vector<128x1xf32>
    %47 = arith.addf %45, %46 : vector<128x1xf32>
    %48 = math.log %47 : vector<128x1xf32>
    %c0_i32 = arith.constant 0 : i32
    %49 = vector.broadcast %c0_i32 : i32 to vector<128x1xi32>
    %50 = arith.cmpi sge, %9, %49 : vector<128x1xi32>
    %c128_i32_16 = arith.constant 128 : i32
    %51 = vector.broadcast %c128_i32_16 : i32 to vector<128x1xi32>
    %52 = arith.cmpi slt, %9, %51 : vector<128x1xi32>
    %53 = arith.andi %50, %52 : vector<128x1xi1>
    %54 = arith.extui %53 : vector<128x1xi1> to vector<128x1xi32>
    %55 = arith.sitofp %54 : vector<128x1xi32> to vector<128x1xf32>
    %56 = arith.extui %30 : vector<128x256xi1> to vector<128x256xi32>
    %57 = arith.sitofp %56 : vector<128x256xi32> to vector<128x256xf32>
    %cst_17 = arith.constant dense<0.000000e+00> : vector<128xf32>
    %58 = vector.multi_reduction <add>, %57, %cst_17 [1] : vector<128x256xf32> to vector<128xf32>
    %59 = vector.shape_cast %58 : vector<128xf32> to vector<128x1xf32>
    %cst_18 = arith.constant 0.000000e+00 : f32
    %60 = vector.broadcast %cst_18 : f32 to vector<128x128xf32>
    %61 = arith.select %34, %17, %60 : vector<128x128xi1>, vector<128x128xf32>
    %cst_19 = arith.constant dense<0.000000e+00> : vector<128xf32>
    %62 = vector.multi_reduction <add>, %61, %cst_19 [1] : vector<128x128xf32> to vector<128xf32>
    %63 = vector.shape_cast %62 : vector<128xf32> to vector<128x1xf32>
    %cst_20 = arith.constant 0.000000e+00 : f32
    %64 = vector.broadcast %cst_20 : f32 to vector<128x256xf32>
    %65 = arith.select %30, %19, %64 : vector<128x256xi1>, vector<128x256xf32>
    %cst_21 = arith.constant dense<0.000000e+00> : vector<128xf32>
    %66 = vector.multi_reduction <add>, %65, %cst_21 [1] : vector<128x256xf32> to vector<128xf32>
    %67 = vector.shape_cast %66 : vector<128xf32> to vector<128x1xf32>
    %cst_22 = arith.constant 1.000000e+00 : f32
    %68 = vector.broadcast %cst_22 : f32 to vector<128x1xf32>
    %69 = arith.mulf %68, %55 : vector<128x1xf32>
    %cst_23 = arith.constant 5.000000e-02 : f32
    %70 = vector.broadcast %cst_23 : f32 to vector<128x1xf32>
    %71 = arith.mulf %70, %59 : vector<128x1xf32>
    %72 = arith.addf %69, %71 : vector<128x1xf32>
    %cst_24 = arith.constant 1.000000e+00 : f32
    %73 = vector.broadcast %cst_24 : f32 to vector<128x1xf32>
    %74 = arith.mulf %73, %63 : vector<128x1xf32>
    %cst_25 = arith.constant 5.000000e-02 : f32
    %75 = vector.broadcast %cst_25 : f32 to vector<128x1xf32>
    %76 = arith.mulf %75, %67 : vector<128x1xf32>
    %77 = arith.addf %74, %76 : vector<128x1xf32>
    %78 = arith.mulf %48, %72 : vector<128x1xf32>
    %79 = arith.subf %77, %78 : vector<128x1xf32>
    %cst_26 = arith.constant 9.99999996E-13 : f32
    %80 = vector.broadcast %cst_26 : f32 to vector<128x1xf32>
    %81 = arith.addf %72, %80 : vector<128x1xf32>
    %82 = arith.divf %79, %81 : vector<128x1xf32>
    %cst_27 = arith.constant -1.000000e+00 : f32
    %83 = vector.broadcast %cst_27 : f32 to vector<128x1xf32>
    %84 = arith.mulf %83, %82 : vector<128x1xf32>
    %85 = arith.mulf %55, %84 : vector<128x1xf32>
    %c0_28 = arith.constant 0 : index
    %c0_29 = arith.constant 0 : index
    %86 = vector.load %arg5[%c0_28, %c0_29] : memref<128x1xf32, #tpu.memory_space<vmem>>, vector<128x1xf32>
    tpu.vector_store %arg5[%c0_28, %c0_29], %85 {strides = array<i32>} : memref<128x1xf32, #tpu.memory_space<vmem>>, vector<128x1xf32>,
    return
  }
  func.func @transform_0(%arg0: i32) -> (i32, i32) {
    %c0_i32 = arith.constant 0 : i32
    %c0_i32_0 = arith.constant 0 : i32
    %c0_i32_1 = arith.constant 0 : i32
    return %c0_i32, %c0_i32_0 : i32, i32
  }
  func.func @transform_1(%arg0: i32) -> (i32, i32) {
    %c0_i32 = arith.constant 0 : i32
    %c0_i32_0 = arith.constant 0 : i32
    return %arg0, %c0_i32 : i32, i32
  }
  func.func @transform_2(%arg0: i32) -> (i32, i32) {
    %c0_i32 = arith.constant 0 : i32
    %c0_i32_0 = arith.constant 0 : i32
    return %arg0, %c0_i32 : i32, i32
  }
  func.func @transform_3(%arg0: i32) -> (i32, i32) {
    %c0_i32 = arith.constant 0 : i32
    %c0_i32_0 = arith.constant 0 : i32
    %c0_i32_1 = arith.constant 0 : i32
    return %c0_i32, %c0_i32_0 : i32, i32
  }
  func.func @transform_4(%arg0: i32) -> (i32, i32) {
    %c0_i32 = arith.constant 0 : i32
    %c0_i32_0 = arith.constant 0 : i32
    return %arg0, %c0_i32 : i32, i32
  }
}

</mosaic_0001>

<bundles_post_ra>
// kernel: tpu_custom_call.1
= control target key start
LH: loop header
LB: loop body
LE: loop exit
PB: predicated region body
PF: predicated region fallthrough
CT: control target
= control target key end

     0   :  { %s2294_s15 = smov 0   ;;  %s4071_s0 = inlined_call_operand.vmem [shape: f32[256,64], index: 0, kind: input, shape index: {}]   ;;  %s4072_s1 = inlined_call_operand.vmem [shape: f32[256,128], index: 1, kind: input, shape index: {}]   ;;  %s4073_s2 = inlined_call_operand.vmem [shape: s32[256,1], index: 2, kind: input, shape index: {}]   ;;  %s4074_s3 = inlined_call_operand.vmem [shape: s32[1,256], index: 3, kind: input, shape index: {}]   ;;  %s4075_s4 = inlined_call_operand.vmem [shape: f32[256,1], index: 4, kind: output, shape index: {}]  }
   0x1 LB: > { %s1832_s16 = sadd.s32 4294967295, %s2265_s15   ;;  %p1836_p0 = scmp.ge.s32.totalorder %s2265_s15, 1  ;;  %s2265_s15 = sphi %s2294_s15, %s14_s15  }
   0x2   : > { %p174_p1 = scmp.lt.s32.totalorder %s2265_s15, 3 }
   0x4   : > { %p175_p2 = pnand %p1836_p0, %p174_p1 }
   0x6   : > { %178 = sbr.rel (%p175_p2) target bundleno = 730 (0x2da), region = 36 }
   0xd   : > { %v257_v0 = vld [vmem:[%s4071_s0 + $0x80] sm:$0xff]  ;;  %v258_v1 = vld [vmem:[%s4071_s0 + $0x88] sm:$0xff]  ;;  %vm289_vm0 = vcmask 523264   ;;  %s1837_s23 = sshll.u32 %s1832_s16, 4  ;;  %v259_v6 = vld [vmem:[%s4071_s0 + $0x90] sm:$0xff]  ;;  %v2267_v9 = vmov 0  }
   0xe   : > { %v241_v2 = vld [vmem:[%s4071_s0] sm:$0xff]  ;;  %v2006_v3 = vpack.c.bf16 %v258_v1, %v257_v0  ;;  %vm2315_vm1 = vmpackc.low %vm289_vm0, %vm289_vm0  ;;  %v242_v5 = vld [vmem:[%s4071_s0 + $0x8] sm:$0xff]  ;;  %p206_p3 = scmp.lt.s32.totalorder %s1837_s23, 31  ;;  %2081 = vset.pattern.permute.xlu1 %v2267_v9  ;;  %2080 = vset.pattern.permute.xlu0 %v2267_v9  ;;  %s2364_s18 = sshll.u32 %s1832_s16, 7 }
   0xf   : > { %v2009_v7 = vpack.c.bf16 %v242_v5, %v241_v2  ;;  %v260_v8 = vld [vmem:[%s4071_s0 + $0x98] sm:$0xff]  ;;  %v243_v11 = vld [vmem:[%s4071_s0 + $0x10] sm:$0xff]  ;;  %v261_v13 = vld [vmem:[%s4071_s0 + $0xa0] sm:$0xff]  ;;  %s2386_s24 = scalar_lea.vmem %s4071_s0, %s2364_s18 }
  0x10   : > { %2008 = vmatprep.subr.msk.bf16.mxu0 %vm2315_vm1, %v2006_v3  ;;  %2054 = vmatprep.subr.msk.bf16.mxu1 %vm2315_vm1, %v2006_v3  ;;  %v2012_v10 = vpack.c.bf16 %v260_v8, %v259_v6  ;;  %s4575_s23 = smov (!%p206_p3, %s1837_s23), 31  ;;  %v244_v12 = vld [vmem:[%s4071_s0 + $0x18] sm:$0xff]  ;;  %v262_v14 = vld [vmem:[%s4071_s0 + $0xa8] sm:$0xff]  ;;  %v245_v21 = vld [vmem:[%s4071_s0 + $0x20] sm:$0xff] }
  0x11   : > { %2011 = vmatpush3.bf16.xpose.msk.msra.mxu0 %vm2315_vm1, %v2009_v7  ;;  %2062 = vmatpush3.bf16.xpose.msk.msra.mxu1 %vm2315_vm1, %v2009_v7  ;;  %s2346_s8 = sshll.u32 %s4575_s23, 3  ;;  %v2015_v16 = vpack.c.bf16 %v244_v12, %v243_v11  ;;  %v2018_v18 = vpack.c.bf16 %v262_v14, %v261_v13  ;;  %v246_v22 = vld [vmem:[%s4071_s0 + $0x28] sm:$0xff]  ;;  %v263_v23 = vld [vmem:[%s4071_s0 + $0xb0] sm:$0xff]  ;;  %v264_v24 = vld [vmem:[%s4071_s0 + $0xb8] sm:$0xff] }
  0x12   : > { %2014 = vmatprep.subr.msk.bf16.mxu0 %vm2315_vm1, %v2012_v10  ;;  %2055 = vmatprep.subr.msk.bf16.mxu1 %vm2315_vm1, %v2012_v10  ;;  %s2358_s17 = scalar_lea.vmem %s4072_s1, %s2346_s8  ;;  %v2021_v27 = vpack.c.bf16 %v246_v22, %v245_v21  ;;  %v225_v28 = vld [vmem:[%s2386_s24] sm:$0xff]  ;;  %v2024_v29 = vpack.c.bf16 %v264_v24, %v263_v23  ;;  %v247_v35 = vld [vmem:[%s4071_s0 + $0x30] sm:$0xff]  ;;  %v248_v36 = vld [vmem:[%s4071_s0 + $0x38] sm:$0xff]  ;;  %s2500_s21 = scalar_lea.vmem %s4073_s2, %s2346_s8 }
  0x13   : > { %v597_v15 = vld [vmem:[%s2358_s17 + $0x10] sm:$0xff]  ;;  %v595_v17 = vld [vmem:[%s2358_s17] sm:$0xff]  ;;  %v598_v19 = vld [vmem:[%s2358_s17 + $0x18] sm:$0xff]  ;;  %v2397_v30 = vmul.f32 14.285714, %v225_v28  ;;  %v2027_v41 = vpack.c.bf16 %v248_v36, %v247_v35  ;;  %s3934_s27 = scalar_lea.vmem %s4075_s4, %s2346_s8 }
  0x14   : > { %632 = vmax.xlane.f32.xlu1 %v597_v15  ;;  %628 = vmax.xlane.f32.xlu0 %v595_v17  ;;  %v596_v20 = vld [vmem:[%s2358_s17 + $0x8] sm:$0xff]  ;;  %v599_v26 = vld [vmem:[%s2358_s17 + $0x20] sm:$0xff]  ;;  %v602_v32 = vld [vmem:[%s2358_s17 + $0x38] sm:$0xff] }
  0x15   : > { %v600_v25 = vld [vmem:[%s2358_s17 + $0x28] sm:$0xff]  ;;  %v233_v31 = vld [vmem:[%s2386_s24 + $0x40] sm:$0xff]  ;;  %v601_v33 = vld [vmem:[%s2358_s17 + $0x30] sm:$0xff]  ;;  %1974 = vmatprep.mubr.msk.f32.mxu0 %vm289_vm0, %v2397_v30 }
  0x16   : > { %v2404_v34 = vmul.f32 14.285714, %v233_v31  ;;  %v265_v37 = vld [vmem:[%s4071_s0 + $0xc0] sm:$0xff]  ;;  %v266_v38 = vld [vmem:[%s4071_s0 + $0xc8] sm:$0xff]  ;;  %v606_v43 = vld [vmem:[%s2358_s17 + $0x58] sm:$0xff] }
  0x17   : > { %v604_v39 = vld [vmem:[%s2358_s17 + $0x48] sm:$0xff]  ;;  %v603_v40 = vld [vmem:[%s2358_s17 + $0x40] sm:$0xff]  ;;  %v2030_v42 = vpack.c.bf16 %v266_v38, %v265_v37  ;;  %v605_v44 = vld [vmem:[%s2358_s17 + $0x50] sm:$0xff] }
  0x18   : > { %634 = vmax.xlane.f32.xlu1 %v598_v19  ;;  %630 = vmax.xlane.f32.xlu0 %v596_v20  ;;  %v249_v45 = vld [vmem:[%s4071_s0 + $0x40] sm:$0xff]  ;;  %v250_v46 = vld [vmem:[%s4071_s0 + $0x48] sm:$0xff]  ;;  %v267_v47 = vld [vmem:[%s4071_s0 + $0xd0] sm:$0xff] }
  0x19   : > { %2017 = vmatpush3.bf16.xpose.msk.msra.mxu0 %vm2315_vm1, %v2015_v16  ;;  %2063 = vmatpush3.bf16.xpose.msk.msra.mxu1 %vm2315_vm1, %v2015_v16  ;;  %v268_v48 = vld [vmem:[%s4071_s0 + $0xd8] sm:$0xff]  ;;  %v608_v49 = vld [vmem:[%s2358_s17 + $0x68] sm:$0xff]  ;;  %v607_v50 = vld [vmem:[%s2358_s17 + $0x60] sm:$0xff]  ;;  %v2033_v51 = vpack.c.bf16 %v250_v46, %v249_v45 }
  0x1a   : > { %2020 = vmatprep.subr.msk.bf16.mxu0 %vm2315_vm1, %v2018_v18  ;;  %2056 = vmatprep.subr.msk.bf16.mxu1 %vm2315_vm1, %v2018_v18  ;;  %v2036_v52 = vpack.c.bf16 %v268_v48, %v267_v47  ;;  %v610_v53 = vld [vmem:[%s2358_s17 + $0x78] sm:$0xff]  ;;  %v609_v54 = vld [vmem:[%s2358_s17 + $0x70] sm:$0xff]  ;;  %v269_v57 = vld [vmem:[%s4071_s0 + $0xe0] sm:$0xff] }
  0x1b   : > { %1990 = vmatprep.mubr.msk.f32.mxu1 %vm289_vm0, %v2404_v34  ;;  %v251_v55 = vld [vmem:[%s4071_s0 + $0x50] sm:$0xff]  ;;  %v252_v56 = vld [vmem:[%s4071_s0 + $0x58] sm:$0xff]  ;;  %v270_v58 = vld [vmem:[%s4071_s0 + $0xe8] sm:$0xff] }
  0x1c   : > { %638 = vmax.xlane.f32.xlu1 %v600_v25  ;;  %636 = vmax.xlane.f32.xlu0 %v599_v26  ;;  %v2039_v59 = vpack.c.bf16 %v252_v56, %v251_v55  ;;  %v2042_v60 = vpack.c.bf16 %v270_v58, %v269_v57  ;;  %v253_v61 = vld [vmem:[%s4071_s0 + $0x60] sm:$0xff]  ;;  %v254_v62 = vld [vmem:[%s4071_s0 + $0x68] sm:$0xff]  ;;  %v271_v63 = vld [vmem:[%s4071_s0 + $0xf0] sm:$0xff] }
  0x1d   : > { %v272_v0 = vld [vmem:[%s4071_s0 + $0xf8] sm:$0xff]  ;;  %v2045_v1 = vpack.c.bf16 %v254_v62, %v253_v61  ;;  %v2507_v3 = vld [vmem:[%s2500_s21 + $0x8] sm:$0xff]  ;;  %v255_v5 = vld [vmem:[%s4071_s0 + $0x70] sm:$0xff] }
  0x1e   : > { %v2048_v2 = vpack.c.bf16 %v272_v0, %v271_v63  ;;  %v256_v6 = vld [vmem:[%s4071_s0 + $0x78] sm:$0xff]  ;;  %v2521_v8 = vld [vmem:[%s2500_s21 + $0x10] sm:$0xff]  ;;  %v2524_v9 = vld [vmem:[%s2500_s21] sm:$0xff] }
  0x1f   : > { %v2051_v7 = vpack.c.bf16 %v256_v6, %v255_v5  ;;  %v2532_v10 = vld [vmem:[%s2500_s21 + $0x18] sm:$0xff]  ;;  %v226_v11 = vld [vmem:[%s2386_s24 + $0x8] sm:$0xff]  ;;  %v227_v16 = vld [vmem:[%s2386_s24 + $0x10] sm:$0xff]  ;;  %v2659_v5 = vstv %s2364_s18 }
  0x20   : > { %642 = vmax.xlane.f32.xlu1 %v602_v32  ;;  %640 = vmax.xlane.f32.xlu0 %v601_v33  ;;  %v234_v12 = vld [vmem:[%s2386_s24 + $0x48] sm:$0xff]  ;;  %v274_v14 = vmul.f32 14.285714, %v226_v11  ;;  %v235_v17 = vld [vmem:[%s2386_s24 + $0x50] sm:$0xff]  ;;  %v2545_v4 = vld [vmem:[%s2500_s21 + $0x20] sm:$0xff] }
  0x21   : > { %2023 = vmatpush3.bf16.xpose.msk.msra.mxu0 %vm2315_vm1, %v2021_v27  ;;  %2064 = vmatpush3.bf16.xpose.msk.msra.mxu1 %vm2315_vm1, %v2021_v27  ;;  %v2538_v13 = vld [vmem:[%s2500_s21 + $0x48] sm:$0xff]  ;;  %v282_v15 = vmul.f32 14.285714, %v234_v12  ;;  %v2548_v18 = vld [vmem:[%s2500_s21 + $0x58] sm:$0xff]  ;;  %v275_v19 = vmul.f32 14.285714, %v227_v16 }
  0x22   : > { %2026 = vmatprep.subr.msk.bf16.mxu0 %vm2315_vm1, %v2024_v29  ;;  %2057 = vmatprep.subr.msk.bf16.mxu1 %vm2315_vm1, %v2024_v29  ;;  %v283_v20 = vmul.f32 14.285714, %v235_v17  ;;  %v228_v21 = vld [vmem:[%s2386_s24 + $0x18] sm:$0xff]  ;;  %v2561_v23 = vld [vmem:[%s2500_s21 + $0x28] sm:$0xff]  ;;  %v229_v27 = vld [vmem:[%s2386_s24 + $0x20] sm:$0xff] }
  0x23   : > { %v236_v22 = vld [vmem:[%s2386_s24 + $0x58] sm:$0xff]  ;;  %v2564_v24 = vld [vmem:[%s2500_s21 + $0x68] sm:$0xff]  ;;  %v276_v25 = vmul.f32 14.285714, %v228_v21  ;;  %v237_v28 = vld [vmem:[%s2386_s24 + $0x60] sm:$0xff] }
  0x24   : > { %646 = vmax.xlane.f32.xlu1 %v604_v39  ;;  %644 = vmax.xlane.f32.xlu0 %v603_v40  ;;  %v284_v26 = vmul.f32 14.285714, %v236_v22  ;;  %v2575_v29 = vld [vmem:[%s2500_s21 + $0x30] sm:$0xff]  ;;  %v277_v31 = vmul.f32 14.285714, %v229_v27  ;;  %v230_v33 = vld [vmem:[%s2386_s24 + $0x28] sm:$0xff] }
  0x25   : > { %v285_v32 = vmul.f32 14.285714, %v237_v28  ;;  %v2589_v35 = vld [vmem:[%s2500_s21 + $0x38] sm:$0xff]  ;;  %v278_v36 = vmul.f32 14.285714, %v230_v33  ;;  %v231_v38 = vld [vmem:[%s2386_s24 + $0x30] sm:$0xff] }
  0x26   : > { %v239_v39 = vld [vmem:[%s2386_s24 + $0x70] sm:$0xff]  ;;  %v2599_v40 = vld [vmem:[%s2500_s21 + $0x40] sm:$0xff]  ;;  %v4092_v33 = vmov 0.0  }
  0x27   : > { %v2609_v45 = vld [vmem:[%s2500_s21 + $0x50] sm:$0xff]  ;;  %v2617_v48 = vld [vmem:[%s2500_s21 + $0x60] sm:$0xff] }
  0x28   : > { %650 = vmax.xlane.f32.xlu1 %v606_v43  ;;  %648 = vmax.xlane.f32.xlu0 %v605_v44  ;;  %v232_v43 = vld [vmem:[%s2386_s24 + $0x38] sm:$0xff]  ;;  %v627_v11 = vld [vmem:[%s4074_s3] sm:$0x3] }
  0x29   : > { %2029 = vmatpush3.bf16.xpose.msk.msra.mxu0 %vm2315_vm1, %v2027_v41  ;;  %2065 = vmatpush3.bf16.xpose.msk.msra.mxu1 %vm2315_vm1, %v2027_v41  ;;  %v279_v41 = vmul.f32 14.285714, %v231_v38  ;;  %v240_v44 = vld [vmem:[%s2386_s24 + $0x78] sm:$0xff]  ;;  %v280_v46 = vmul.f32 14.285714, %v232_v43 }
  0x2a   : > { %2032 = vmatprep.subr.msk.bf16.mxu0 %vm2315_vm1, %v2030_v42  ;;  %2058 = vmatprep.subr.msk.bf16.mxu1 %vm2315_vm1, %v2030_v42  ;;  %v287_v42 = vmul.f32 14.285714, %v239_v39  ;;  %v288_v47 = vmul.f32 14.285714, %v240_v44 }
  0x2c   : > { %654 = vmax.xlane.f32.xlu1 %v608_v49  ;;  %652 = vmax.xlane.f32.xlu0 %v607_v50  ;;  %v625_v49 = vld [vmem:[%s2500_s21 + $0x70] sm:$0xff] }
  0x30   : > { %658 = vmax.xlane.f32.xlu1 %v610_v53  ;;  %656 = vmax.xlane.f32.xlu0 %v609_v54 }
  0x31   : > { %2035 = vmatpush3.bf16.xpose.msk.msra.mxu0 %vm2315_vm1, %v2033_v51  ;;  %2066 = vmatpush3.bf16.xpose.msk.msra.mxu1 %vm2315_vm1, %v2033_v51 }
  0x32   : > { %2038 = vmatprep.subr.msk.bf16.mxu0 %vm2315_vm1, %v2036_v52  ;;  %2059 = vmatprep.subr.msk.bf16.mxu1 %vm2315_vm1, %v2036_v52 }
  0x39   : > { %2041 = vmatpush3.bf16.xpose.msk.msra.mxu0 %vm2315_vm1, %v2039_v59  ;;  %2067 = vmatpush3.bf16.xpose.msk.msra.mxu1 %vm2315_vm1, %v2039_v59 }
  0x3a   : > { %2044 = vmatprep.subr.msk.bf16.mxu0 %vm2315_vm1, %v2042_v60  ;;  %2060 = vmatprep.subr.msk.bf16.mxu1 %vm2315_vm1, %v2042_v60  ;;  %v772_v60 = vlaneseq }
  0x3c   : > { %v2651_v63 = vshrl.u32 %v772_v60, 7  ;;  %v2661_v6 = vand.u32 127, %v772_v60 }
  0x3e   : > { %v777_v0 = vadd.s32 8, %v2651_v63  ;;  %v895_v12 = vsub.s32 1, %v2651_v63  ;;  %v2675_v17 = vadd.s32 128, %v2661_v6  ;;  %v2693_v27 = vadd.s32 %v2659_v5, %v2651_v63 }
  0x3f   : > { %v781_v60 = vadd.s32 40, %v2651_v63 }
  0x40   : > { %4241 = vst [vmem:[#allocation10_spill] sm:$0xff] %v2675_v17  ;;  %v2681_v21 = vrot.slane %v627_v11, %v895_v12  ;;  %4244 = vst [vmem:[#allocation13_spill] sm:$0xff] %v2693_v27  ;;  %vm4094_vm9 = vcmp.ne.s32.totalorder %v2693_v27, %v2661_v6  ;;  %vm4091_vm10 = vcmp.ne.s32.totalorder %v2693_v27, %v2675_v17  ;;  %v4327_v27 = vmov 0 }
  0x41   : > { %2047 = vmatpush3.bf16.xpose.msk.msra.mxu0 %vm2315_vm1, %v2045_v1  ;;  %2068 = vmatpush3.bf16.xpose.msk.msra.mxu1 %vm2315_vm1, %v2045_v1 }
  0x42   : > { %2050 = vmatprep.subr.msk.bf16.mxu0 %vm2315_vm1, %v2048_v2  ;;  %2061 = vmatprep.subr.msk.bf16.mxu1 %vm2315_vm1, %v2048_v2 }
  0x43   : > { %845 = vperm.xlu1 %2081, %v2507_v3  }
  0x46   : > { %842 = vperm.xlu0 %2080, %v2524_v9  }
  0x47   : > { %848 = vperm.xlu1 %2081, %v2521_v8  }
  0x49   : > { %2053 = vmatpush3.bf16.xpose.msk.msra.mxu0 %vm2315_vm1, %v2051_v7  ;;  %2069 = vmatpush3.bf16.xpose.msk.msra.mxu1 %vm2315_vm1, %v2051_v7  ;;  %v891_v7 = vsub.s32 0, %v2651_v63 }
  0x4a   : > { %869 = vperm.xlu0 %2080, %v2538_v13  }
  0x4b   : > { %851 = vperm.xlu1 %2081, %v2532_v10  }
  0x4e   : > { %875 = vperm.xlu0 %2080, %v2548_v18  }
  0x4f   : > { %854 = vperm.xlu1 %2081, %v2545_v4  }
  0x50   : > { %1975 = vmatmul.mubr.msk.f32.vlgmr.msra.gmra.mrb[0].mxu0 %vm289_vm0, %v2397_v30  ;;  %1991 = vmatmul.mubr.msk.f32.vlgmr.msra.gmra.mrb[0].mxu1 %vm289_vm0, %v2404_v34  ;;  %v2578_v30 = vld [vmem:[%s2500_s21 + $0x78] sm:$0xff]  ;;  %v238_v34 = vld [vmem:[%s2386_s24 + $0x68] sm:$0xff] }
  0x51   : > { %1976 = vmatprep.mubr.msk.f32.mxu0 %vm289_vm0, %v274_v14  ;;  %1992 = vmatprep.mubr.msk.f32.mxu1 %vm289_vm0, %v282_v15  ;;  %v286_v37 = vmul.f32 14.285714, %v238_v34 }
  0x52   : > { %881 = vperm.xlu0 %2080, %v2564_v24  }
  0x53   : > { %857 = vperm.xlu1 %2081, %v2561_v23  }
  0x54   : > { %1977 = vmatmul.mubr.msk.f32.gmra.mrb[2].mxu0 %vm289_vm0, %v274_v14  ;;  %1993 = vmatmul.mubr.msk.f32.gmra.mrb[2].mxu1 %vm289_vm0, %v282_v15  ;;  %v778_v14 = vadd.s32 16, %v2651_v63  ;;  %v2670_v15 = vadd.s32 %v2659_v5, %v777_v0 }
  0x55   : > { %1978 = vmatprep.mubr.msk.f32.mxu0 %vm289_vm0, %v275_v19  ;;  %1994 = vmatprep.mubr.msk.f32.mxu1 %vm289_vm0, %v283_v20 }
  0x56   : > { %887 = vperm.xlu0 %2080, %v2578_v30   ;;  %4239 = vst [vmem:[#allocation8_spill] sm:$0xff] %v2670_v15  ;;  %v2684_v22 = vadd.s32 %v2659_v5, %v778_v14  ;;  %vm4085_vm2 = vcmp.ne.s32.totalorder %v2670_v15, %v2661_v6  ;;  %vm4078_vm3 = vcmp.ne.s32.totalorder %v2670_v15, %v2675_v17 }
  0x57   : > { %860 = vperm.xlu1 %2081, %v2575_v29  }
  0x58   : > { %1979 = vmatmul.mubr.msk.f32.gmra.mrb[4].mxu0 %vm289_vm0, %v275_v19  ;;  %1995 = vmatmul.mubr.msk.f32.gmra.mrb[4].mxu1 %vm289_vm0, %v283_v20  ;;  %v2677_v19 = vrot.slane %v627_v11, %v891_v7  ;;  %4243 = vst [vmem:[#allocation12_spill] sm:$0xff] %v2684_v22  ;;  %vm4076_vm7 = vcmp.ne.s32.totalorder %v2684_v22, %v2661_v6  ;;  %v4257_v7 = vmov 0 }
  0x59   : > { %1980 = vmatprep.mubr.msk.f32.mxu0 %vm289_vm0, %v276_v25  ;;  %1996 = vmatprep.mubr.msk.f32.mxu1 %vm289_vm0, %v284_v26  ;;  %vm4077_vm14 = vcmp.ne.s32.totalorder %v2684_v22, %v2675_v17 }
  0x5b   : > { %863 = vperm.xlu1 %2081, %v2589_v35  }
  0x5c   : > { %1981 = vmatmul.mubr.msk.f32.gmra.mrb[6].mxu0 %vm289_vm0, %v276_v25  ;;  %1997 = vmatmul.mubr.msk.f32.gmra.mrb[6].mxu1 %vm289_vm0, %v284_v26  ;;  %v779_v25 = vadd.s32 24, %v2651_v63 }
  0x5d   : > { %1982 = vmatprep.mubr.msk.f32.mxu0 %vm289_vm0, %v277_v31  ;;  %1998 = vmatprep.mubr.msk.f32.mxu1 %vm289_vm0, %v285_v32 }
  0x5f   : > { %866 = vperm.xlu1 %2081, %v2599_v40  }
  0x60   : > { %1983 = vmatmul.mubr.msk.f32.gmra.mrb[8].mxu0 %vm289_vm0, %v277_v31  ;;  %1999 = vmatmul.mubr.msk.f32.gmra.mrb[8].mxu1 %vm289_vm0, %v285_v32  ;;  %v780_v31 = vadd.s32 32, %v2651_v63 }
  0x61   : > { %1984 = vmatprep.mubr.msk.f32.mxu0 %vm289_vm0, %v278_v36  ;;  %2000 = vmatprep.mubr.msk.f32.mxu1 %vm289_vm0, %v286_v37 }
  0x62   : > { %v2760_v44 = vadd.s32 %v2659_v5, %v780_v31  ;;  %v4262_v31 = vmov 0 }
  0x63   : > { %872 = vperm.xlu1 %2081, %v2609_v45  }
  0x64   : > { %1985 = vmatmul.mubr.msk.f32.gmra.mrb[10].mxu0 %vm289_vm0, %v278_v36  ;;  %2001 = vmatmul.mubr.msk.f32.gmra.mrb[10].mxu1 %vm289_vm0, %v286_v37  ;;  %v2722_v36 = vadd.s32 %v2659_v5, %v779_v25  ;;  %4254 = vst [vmem:[#allocation15_spill] sm:$0xff] %v2760_v44  ;;  %v4259_v25 = vmov 0 }
  0x65   : > { %1986 = vmatprep.mubr.msk.f32.mxu0 %vm289_vm0, %v279_v41  ;;  %2002 = vmatprep.mubr.msk.f32.mxu1 %vm289_vm0, %v287_v42 }
  0x66   : > { %4249 = vst [vmem:[#allocation14_spill] sm:$0xff] %v2722_v36 }
  0x67   : > { %878 = vperm.xlu1 %2081, %v2617_v48  }
  0x68   : > { %1987 = vmatmul.mubr.msk.f32.gmra.mrb[12].mxu0 %vm289_vm0, %v279_v41  ;;  %2003 = vmatmul.mubr.msk.f32.gmra.mrb[12].mxu1 %vm289_vm0, %v287_v42  ;;  %v4250_v42 = vmov 0 }
  0x69   : > { %1988 = vmatprep.mubr.msk.f32.mxu0 %vm289_vm0, %v280_v46  ;;  %2004 = vmatprep.mubr.msk.f32.mxu1 %vm289_vm0, %v288_v47 }
  0x6b   : > { %884 = vperm.xlu1 %2081, %v625_v49  }
  0x6c   : > { %1989 = vmatmul.mubr.msk.f32.gmra.mrb[14].mxu0 %vm289_vm0, %v280_v46  ;;  %2005 = vmatmul.mubr.msk.f32.gmra.mrb[14].mxu1 %vm289_vm0, %v288_v47 }
  0xa1   : > { %v2627_v50 = vpop.xlane.xlu1 %632  ;;  %v2629_v51 = vpop.xlane.xlu0 %628 }
  0xa5   : > { %v2631_v52 = vpop.xlane.xlu1 %634  ;;  %v2633_v53 = vpop.xlane.xlu0 %630 }
  0xa9   : > { %v2635_v54 = vpop.xlane.xlu1 %638  ;;  %v2637_v55 = vpop.xlane.xlu0 %636 }
  0xaa   : > { %4233 = vst [vmem:[#allocation2_spill] sm:$0xff] %v2635_v54  ;;  %4234 = vst [vmem:[#allocation3_spill] sm:$0xff] %v2637_v55  ;;  %v4323_v54 = vmov 0 }
  0xad   : > { %v2639_v56 = vpop.xlane.xlu1 %642  ;;  %v2641_v57 = vpop.xlane.xlu0 %640 }
  0xae   : > { %4235 = vst [vmem:[#allocation4_spill] sm:$0xff] %v2639_v56  ;;  %4236 = vst [vmem:[#allocation5_spill] sm:$0xff] %v2641_v57  ;;  %v784_v57 = vadd.s32 64, %v2651_v63 }
  0xb1   : > { %v2643_v58 = vpop.xlane.xlu1 %646  ;;  %v2645_v59 = vpop.xlane.xlu0 %644 }
  0xb5   : > { %v2647_v61 = vpop.xlane.xlu1 %650  ;;  %v2649_v62 = vpop.xlane.xlu0 %648 }
  0xb9   : > { %v2654_v1 = vpop.xlane.xlu1 %654  ;;  %v2656_v2 = vpop.xlane.xlu0 %652 }
  0xba   : > { %4237 = vst [vmem:[#allocation6_spill] sm:$0xff] %v2654_v1  ;;  %4238 = vst [vmem:[#allocation7_spill] sm:$0xff] %v2656_v2  ;;  %v4304_v2 = vmov 0 }
  0xbd   : > { %v2672_v16 = vpop.xlane.xlu1 %658  ;;  %v2679_v20 = vpop.xlane.xlu0 %656 }
  0xbe   : > { %4240 = vst [vmem:[#allocation9_spill] sm:$0xff] %v2672_v16  ;;  %4242 = vst [vmem:[#allocation11_spill] sm:$0xff] %v2679_v20 }
  0xc2   : > { %v2689_v26 = vpop.permute.xlu1 %845 }
  0xc3   : > { %vm899_vm4 = vcmp.eq.s32.totalorder %v2689_v26, %v2677_v19  ;;  %vm900_vm5 = vcmp.eq.s32.totalorder %v2689_v26, %v2681_v21 }
  0xc4   : > { %vm2704_vm6 = vmand %vm899_vm4, %vm4085_vm2  ;;  %vm4084_vm4 = vcmp.ne.s32.totalorder %v2722_v36, %v2661_v6 }
  0xc5   : > { %vm2714_vm8 = vmand %vm900_vm5, %vm4078_vm3  ;;  %v1910_v34 = vsel %vm2704_vm6, 1.0, %v4092_v33  ;;  %v2731_v39 = vpop.permute.xlu0 %842 }
  0xc6   : > { %v2724_v37 = vpop.permute.xlu1 %848  ;;  %v1911_v38 = vsel %vm2714_vm8, 1.0, %v4092_v33  ;;  %vm897_vm12 = vcmp.eq.s32.totalorder %v2731_v39, %v2677_v19  ;;  %vm898_vm13 = vcmp.eq.s32.totalorder %v2731_v39, %v2681_v21 }
  0xc7   : > { %vm901_vm11 = vcmp.eq.s32.totalorder %v2724_v37, %v2677_v19  ;;  %v1396_v41 = vadd.f32 %v1911_v38, %v1910_v34  ;;  %vm902_vm15 = vcmp.eq.s32.totalorder %v2724_v37, %v2681_v21  ;;  %vm2755_vm1 = vmand %vm897_vm12, %vm4094_vm9 }
  0xc8   : > { %vm2748_vm0 = vmand %vm901_vm11, %vm4076_vm7  ;;  %v1908_v49 = vsel %vm2755_vm1, 1.0, %v4092_v33  ;;  %vm4083_vm11 = vcmp.ne.s32.totalorder %v2722_v36, %v2675_v17 }
  0xc9   : > { %v4251_v42 = vsel %vm2748_vm0, 4294967295, %v4250_v42  ;;  %1397 = vadd.xlane.f32.xlu1 %v1396_v41  ;;  %vm2769_vm5 = vmand %vm898_vm13, %vm4091_vm10  ;;  %v1912_v11 = vsel %vm2748_vm0, 1.0, %v4092_v33  ;;  %v782_v41 = vadd.s32 48, %v2651_v63  ;;  %v2829_v20 = vpop.permute.xlu0 %869 }
  0xca   : > { %v2764_v46 = vpop.permute.xlu1 %851  ;;  %v1909_v0 = vsel %vm2769_vm5, 1.0, %v4092_v33  ;;  %vm2785_vm12 = vmand %vm902_vm15, %vm4077_vm14  ;;  %vm4090_vm14 = vcmp.ne.s32.totalorder %v2760_v44, %v2661_v6  ;;  %4267 = vst [vmem:[#allocation20_spill] sm:$0xff] %v2829_v20 }
  0xcb   : > { %v4258_v7 = vsel %vm2785_vm12, 4294967295, %v4257_v7  ;;  %vm903_vm13 = vcmp.eq.s32.totalorder %v2764_v46, %v2677_v19  ;;  %vm904_vm7 = vcmp.eq.s32.totalorder %v2764_v46, %v2681_v21  ;;  %v1393_v12 = vadd.f32 %v1909_v0, %v1908_v49 }
  0xcc   : > { %v1913_v14 = vsel %vm2785_vm12, 1.0, %v4092_v33  ;;  %vm2802_vm15 = vmand %vm903_vm13, %vm4084_vm4  ;;  %v2823_v0 = vadd.s32 %v2659_v5, %v781_v60  ;;  %v4268_v60 = vmov 0 }
  0xcd   : > { %v4260_v25 = vsel %vm2802_vm15, 4294967295, %v4259_v25  ;;  %vm2811_vm3 = vmand %vm904_vm7, %vm4083_vm11  ;;  %v1914_v34 = vsel %vm2802_vm15, 1.0, %v4092_v33  ;;  %1394 = vadd.xlane.f32.xlu0 %v1393_v12  ;;  %v1399_v38 = vadd.f32 %v1913_v14, %v1912_v11  ;;  %vm4089_vm7 = vcmp.ne.s32.totalorder %v2760_v44, %v2675_v17 }
  0xce   : > { %4261 = vst [vmem:[#allocation16_spill] sm:$0xff] %v4260_v25  ;;  %v4263_v31 = vsel %vm2811_vm3, 4294967295, %v4262_v31  ;;  %v1915_v49 = vsel %vm2811_vm3, 1.0, %v4092_v33  ;;  %4265 = vst [vmem:[#allocation18_spill] sm:$0xff] %v2823_v0  ;;  %v2825_v36 = vpop.permute.xlu1 %854  ;;  %v785_v12 = vadd.s32 72, %v2651_v63  ;;  %v4271_v11 = vmov 0 }
  0xcf   : > { %4264 = vst [vmem:[#allocation17_spill] sm:$0xff] %v4263_v31  ;;  %4266 = vst [vmem:[#allocation19_spill] sm:$0xff] %v2825_v36  ;;  %v1402_v22 = vadd.f32 %v1915_v49, %v1914_v34  ;;  %vm905_vm13 = vcmp.eq.s32.totalorder %v2825_v36, %v2677_v19  ;;  %vm906_vm11 = vcmp.eq.s32.totalorder %v2825_v36, %v2681_v21 }
  0xd0   : > { %vm2839_vm4 = vmand %vm905_vm13, %vm4090_vm14  ;;  %v2854_v34 = vadd.s32 %v2659_v5, %v782_v41  ;;  %vm4104_vm13 = vcmp.ne.s32.totalorder %v2823_v0, %v2661_v6  ;;  %v2867_v44 = vadd.s32 %v2659_v5, %v785_v12  ;;  %v787_v41 = vadd.s32 88, %v2651_v63  ;;  %v2882_v12 = vpop.permute.xlu0 %875 }
  0xd1   : > { %v4269_v60 = vsel %vm2839_vm4, 4294967295, %v4268_v60  ;;  %1403 = vadd.xlane.f32.xlu1 %v1402_v22  ;;  %1400 = vadd.xlane.f32.xlu0 %v1399_v38  ;;  %vm2846_vm2 = vmand %vm906_vm11, %vm4089_vm7  ;;  %v1916_v14 = vsel %vm2839_vm4, 1.0, %v4092_v33  ;;  %v783_v22 = vadd.s32 56, %v2651_v63  ;;  %4280 = vst [vmem:[#allocation27_spill] sm:$0xff] %v2882_v12 }
  0xd2   : > { %4270 = vst [vmem:[#allocation21_spill] sm:$0xff] %v4269_v60  ;;  %v4272_v11 = vsel %vm2846_vm2, 4294967295, %v4271_v11  ;;  %4274 = vst [vmem:[#allocation23_spill] sm:$0xff] %v2854_v34  ;;  %v2859_v38 = vpop.permute.xlu1 %857  ;;  %v1917_v49 = vsel %vm2846_vm2, 1.0, %v4092_v33  ;;  %v4277_v33 = vmov 0  ;;  %vm4113_vm9 = vcmp.ne.s32.totalorder %v2854_v34, %v2661_v6 }
  0xd3   : > { %4273 = vst [vmem:[#allocation22_spill] sm:$0xff] %v4272_v11  ;;  %4275 = vst [vmem:[#allocation24_spill] sm:$0xff] %v2859_v38  ;;  %v1405_v60 = vadd.f32 %v1917_v49, %v1916_v14  ;;  %vm907_vm7 = vcmp.eq.s32.totalorder %v2859_v38, %v2677_v19  ;;  %vm908_vm14 = vcmp.eq.s32.totalorder %v2859_v38, %v2681_v21  ;;  %v4282_v14 = vmov 0 }
  0xd4   : > { %4276 = vst [vmem:[#allocation25_spill] sm:$0xff] %v2867_v44  ;;  %vm2878_vm10 = vmand %vm907_vm7, %vm4104_vm13  ;;  %vm4281_vm2 = vcmp.ne.s32.totalorder %v2823_v0, %v2675_v17  ;;  %v4285_v49 = vmov 0.0   ;;  %v2899_v1 = vadd.s32 %v2659_v5, %v783_v22  ;;  %v2909_v0 = vadd.s32 %v2659_v5, %v787_v41 }
  0xd5   : > { %v4278_v33 = vsel %vm2878_vm10, 4294967295, %v4277_v33  ;;  %1406 = vadd.xlane.f32.xlu0 %v1405_v60  ;;  %vm2891_vm4 = vmand %vm908_vm14, %vm4281_vm2  ;;  %v1918_v11 = vsel %vm2878_vm10, 1.0, %v4285_v49  ;;  %v789_v38 = vadd.s32 104, %v2651_v63  ;;  %vm915_vm13 = vcmp.eq.s32.totalorder %v2829_v20, %v2677_v19 }
  0xd6   : > { %4279 = vst [vmem:[#allocation26_spill] sm:$0xff] %v4278_v33  ;;  %v4283_v14 = vsel %vm2891_vm4, 4294967295, %v4282_v14  ;;  %4286 = vst [vmem:[#allocation29_spill] sm:$0xff] %v2899_v1  ;;  %v2901_v60 = vpop.permute.xlu1 %860  ;;  %v1919_v15 = vsel %vm2891_vm4, 1.0, %v4285_v49  ;;  %v2926_v41 = vadd.s32 %v2659_v5, %v784_v57  ;;  %v786_v33 = vadd.s32 80, %v2651_v63 }
  0xd7   : > { %4284 = vst [vmem:[#allocation28_spill] sm:$0xff] %v4283_v14  ;;  %4287 = vst [vmem:[#allocation30_spill] sm:$0xff] %v2901_v60  ;;  %vm909_vm2 = vcmp.eq.s32.totalorder %v2901_v60, %v2677_v19  ;;  %vm910_vm14 = vcmp.eq.s32.totalorder %v2901_v60, %v2681_v21  ;;  %v1408_v22 = vadd.f32 %v1919_v15, %v1918_v11  ;;  %v4289_v14 = vmov 0 }
  0xd8   : > { %4288 = vst [vmem:[#allocation31_spill] sm:$0xff] %v2909_v0  ;;  %vm2921_vm11 = vmand %vm909_vm2, %vm4113_vm9  ;;  %vm4121_vm7 = vcmp.ne.s32.totalorder %v2867_v44, %v2675_v17  ;;  %vm4293_vm10 = vcmp.ne.s32.totalorder %v2854_v34, %v2675_v17  ;;  %v4294_v15 = vmov 0  ;;  %v791_v11 = vadd.s32 120, %v2651_v63 }
  0xd9   : > { %v4290_v14 = vsel %vm2921_vm11, 4294967295, %v4289_v14  ;;  %4292 = vst [vmem:[#allocation33_spill] sm:$0xff] %v2926_v41  ;;  %vm2936_vm3 = vmand %vm910_vm14, %vm4293_vm10  ;;  %v1920_v57 = vsel %vm2921_vm11, 1.0, %v4285_v49  ;;  %1409 = vadd.xlane.f32.xlu1 %v1408_v22  ;;  %vm4298_vm14 = vcmp.ne.s32.totalorder %v2867_v44, %v2661_v6  ;;  %v2960_v22 = vpop.permute.xlu0 %881  ;;  %v2965_v36 = vadd.s32 %v2659_v5, %v789_v38 }
  0xda   : > { %4291 = vst [vmem:[#allocation32_spill] sm:$0xff] %v4290_v14  ;;  %v4295_v15 = vsel %vm2936_vm3, 4294967295, %v4294_v15  ;;  %v2946_v60 = vpop.permute.xlu1 %863  ;;  %v1921_v34 = vsel %vm2936_vm3, 1.0, %v4285_v49  ;;  %vm2956_vm9 = vmand %vm915_vm13, %vm4298_vm14  ;;  %v4299_v14 = vmov 0  ;;  %vm4303_vm13 = vcmp.eq.s32.totalorder %v2829_v20, %v2681_v21 }
  0xdb   : > { %4296 = vst [vmem:[#allocation34_spill] sm:$0xff] %v4295_v15  ;;  %4297 = vst [vmem:[#allocation35_spill] sm:$0xff] %v2946_v60  ;;  %v4300_v14 = vsel %vm2956_vm9, 4294967295, %v4299_v14  ;;  %v1411_v15 = vadd.f32 %v1921_v34, %v1920_v57  ;;  %vm911_vm4 = vcmp.eq.s32.totalorder %v2946_v60, %v2677_v19  ;;  %vm912_vm10 = vcmp.eq.s32.totalorder %v2946_v60, %v2681_v21 }
  0xdc   : > { %4301 = vst [vmem:[#allocation36_spill] sm:$0xff] %v2960_v22  ;;  %4302 = vst [vmem:[#allocation37_spill] sm:$0xff] %v2965_v36  ;;  %v2986_v34 = vadd.s32 %v2659_v5, %v786_v33  ;;  %vm4307_vm11 = vcmp.ne.s32.totalorder %v2899_v1, %v2661_v6  ;;  %v4308_v38 = vmov 0  ;;  %vm4311_vm2 = vcmp.ne.s32.totalorder %v2899_v1, %v2675_v17 }
  0xdd   : > { %vm2977_vm14 = vmand %vm4303_vm13, %vm4121_vm7  ;;  %vm4137_vm13 = vcmp.ne.s32.totalorder %v2909_v0, %v2675_v17  ;;  %1412 = vadd.xlane.f32.xlu0 %v1411_v15  ;;  %v4312_v33 = vmov 0  ;;  %v788_v20 = vadd.s32 96, %v2651_v63  ;;  %v3013_v60 = vadd.s32 %v2659_v5, %v791_v11 }
  0xde   : > { %v4305_v2 = vsel %vm2977_vm14, 4294967295, %v4304_v2  ;;  %4306 = vst [vmem:[#allocation38_spill] sm:$0xff] %v2986_v34  ;;  %vm2991_vm15 = vmand %vm911_vm4, %vm4307_vm11  ;;  %v3015_v15 = vpop.permute.xlu1 %866  ;;  %v1926_v1 = vsel %vm2956_vm9, 1.0, %v4285_v49  ;;  %vm4317_vm4 = vcmp.ne.s32.totalorder %v2909_v0, %v2661_v6  ;;  %vm4318_vm11 = vcmp.eq.s32.totalorder %v2882_v12, %v2677_v19 }
  0xdf   : > { %v4309_v38 = vsel %vm2991_vm15, 4294967295, %v4308_v38  ;;  %vm3004_vm12 = vmand %vm912_vm10, %vm4311_vm2  ;;  %v1922_v57 = vsel %vm2991_vm15, 1.0, %v4285_v49  ;;  %4315 = vst [vmem:[#allocation41_spill] sm:$0xff] %v3013_v60  ;;  %v4319_v11 = vmov 0  ;;  %vm913_vm3 = vcmp.eq.s32.totalorder %v3015_v15, %v2677_v19 }
  0xe0   : > { %4310 = vst [vmem:[#allocation39_spill] sm:$0xff] %v4309_v38  ;;  %v4313_v33 = vsel %vm3004_vm12, 4294967295, %v4312_v33  ;;  %4316 = vst [vmem:[#allocation42_spill] sm:$0xff] %v3015_v15  ;;  %v1923_v44 = vsel %vm3004_vm12, 1.0, %v4285_v49  ;;  %v1927_v38 = vsel %vm2977_vm14, 1.0, %v4285_v49  ;;  %vm914_vm7 = vcmp.eq.s32.totalorder %v3015_v15, %v2681_v21 }
  0xe1   : > { %4314 = vst [vmem:[#allocation40_spill] sm:$0xff] %v4313_v33  ;;  %vm3032_vm2 = vmand %vm4318_vm11, %vm4317_vm4  ;;  %v1414_v33 = vadd.f32 %v1923_v44, %v1922_v57  ;;  %vm4322_vm12 = vcmp.eq.s32.totalorder %v2882_v12, %v2681_v21  ;;  %vm923_vm11 = vcmp.eq.s32.totalorder %v2960_v22, %v2677_v19  ;;  %vm4326_vm10 = vcmp.ne.s32.totalorder %v2926_v41, %v2661_v6  ;;  %v3065_v44 = vpop.permute.xlu0 %887 }
  0xe2   : > { %v4320_v11 = vsel %vm3032_vm2, 4294967295, %v4319_v11  ;;  %vm3048_vm4 = vmand %vm4322_vm12, %vm4137_vm13  ;;  %4329 = vst [vmem:[#allocation45_spill] sm:$0xff] %v3065_v44  ;;  %v4331_v57 = vmov 0  ;;  %v3082_v15 = vadd.s32 %v2659_v5, %v788_v20  ;;  %v790_v0 = vadd.s32 112, %v2651_v63  ;;  %v3085_v16 = vpop.permute.xlu1 %872 }
  0xe3   : > { %4321 = vst [vmem:[#allocation43_spill] sm:$0xff] %v4320_v11  ;;  %v4324_v54 = vsel %vm3048_vm4, 4294967295, %v4323_v54  ;;  %vm3057_vm15 = vmand %vm913_vm3, %vm4326_vm10  ;;  %vm4330_vm3 = vcmp.ne.s32.totalorder %v2926_v41, %v2675_v17  ;;  %1415 = vadd.xlane.f32.xlu1 %v1414_v33  ;;  %v1420_v55 = vadd.f32 %v1927_v38, %v1926_v1  ;;  %v1930_v31 = vsel %vm3032_vm2, 1.0, %v4285_v49 }
  0xe4   : > { %4325 = vst [vmem:[#allocation44_spill] sm:$0xff] %v4324_v54  ;;  %v4328_v27 = vsel %vm3057_vm15, 4294967295, %v4327_v27  ;;  %vm3074_vm10 = vmand %vm914_vm7, %vm4330_vm3  ;;  %v1924_v12 = vsel %vm3057_vm15, 1.0, %v4285_v49  ;;  %v1931_v33 = vsel %vm3048_vm4, 1.0, %v4285_v49  ;;  %vm4335_vm7 = vcmp.ne.s32.totalorder %v2965_v36, %v2661_v6 }
  0xe5   : > { %v4332_v57 = vsel %vm3074_vm10, 4294967295, %v4331_v57  ;;  %4333 = vst [vmem:[#allocation46_spill] sm:$0xff] %v3082_v15  ;;  %4334 = vst [vmem:[#allocation47_spill] sm:$0xff] %v3085_v16  ;;  %v1925_v41 = vsel %vm3074_vm10, 1.0, %v4285_v49  ;;  %v4336_v63 = vmov 0  ;;  %vm917_vm0 = vcmp.eq.s32.totalorder %v3085_v16, %v2677_v19 }
  0xe6   : > { %vm3102_vm3 = vmand %vm923_vm11, %vm4335_vm7  ;;  %v1417_v1 = vadd.f32 %v1925_v41, %v1924_v12  ;;  %vm918_vm13 = vcmp.eq.s32.totalorder %v3085_v16, %v2681_v21  ;;  %vm4339_vm4 = vcmp.ne.s32.totalorder %v2965_v36, %v2675_v17  ;;  %vm4340_vm11 = vcmp.eq.s32.totalorder %v2960_v22, %v2681_v21 }
  0xe7   : > { %v4337_v63 = vsel %vm3102_vm3, 4294967295, %v4336_v63  ;;  %vm3120_vm7 = vmand %vm4340_vm11, %vm4339_vm4  ;;  %v4341_v20 = vmov 0  ;;  %vm4344_vm14 = vcmp.ne.s32.totalorder %v2986_v34, %v2661_v6  ;;  %v4345_v12 = vmov 0  ;;  %1421 = vadd.xlane.f32.xlu1 %v1420_v55 }
  0xe8   : > { %4338 = vst [vmem:[#allocation48_spill] sm:$0xff] %v4337_v63  ;;  %v4342_v20 = vsel %vm3120_vm7, 4294967295, %v4341_v20  ;;  %vm3127_vm2 = vmand %vm917_vm0, %vm4344_vm14  ;;  %vm4164_vm9 = vcmp.ne.s32.totalorder %v3013_v60, %v2675_v17  ;;  %1418 = vadd.xlane.f32.xlu0 %v1417_v1  ;;  %vm4348_vm4 = vcmp.ne.s32.totalorder %v2986_v34, %v2675_v17  ;;  %v4349_v41 = vmov 0  ;;  %v3150_v1 = vpop.permute.xlu1 %878 }
  0xe9   : > { %4343 = vst [vmem:[#allocation49_spill] sm:$0xff] %v4342_v20  ;;  %v4346_v12 = vsel %vm3127_vm2, 4294967295, %v4345_v12  ;;  %vm3138_vm11 = vmand %vm918_vm13, %vm4348_vm4  ;;  %v1928_v38 = vsel %vm3127_vm2, 1.0, %v4285_v49  ;;  %v3148_v22 = vadd.s32 %v2659_v5, %v790_v0  ;;  %v1426_v16 = vadd.f32 %v1931_v33, %v1930_v31 }
  0xea   : > { %4347 = vst [vmem:[#allocation50_spill] sm:$0xff] %v4346_v12  ;;  %v4350_v41 = vsel %vm3138_vm11, 4294967295, %v4349_v41  ;;  %4353 = vst [vmem:[#allocation53_spill] sm:$0xff] %v3150_v1  ;;  %v1929_v36 = vsel %vm3138_vm11, 1.0, %v4285_v49  ;;  %v1934_v34 = vsel %vm3102_vm3, 1.0, %v4285_v49  ;;  %v1935_v5 = vsel %vm3120_vm7, 1.0, %v4285_v49 }
  0xeb   : > { %4351 = vst [vmem:[#allocation51_spill] sm:$0xff] %v4350_v41  ;;  %4352 = vst [vmem:[#allocation52_spill] sm:$0xff] %v3148_v22  ;;  %vm4354_vm13 = vcmp.ne.s32.totalorder %v3013_v60, %v2661_v6  ;;  %vm4355_vm4 = vcmp.eq.s32.totalorder %v3065_v44, %v2677_v19  ;;  %v4356_v55 = vmov 0  ;;  %v1423_v31 = vadd.f32 %v1929_v36, %v1928_v38  ;;  %1427 = vadd.xlane.f32.xlu1 %v1426_v16 }
  0xec   : > { %vm3169_vm0 = vmand %vm4355_vm4, %vm4354_vm13  ;;  %vm921_vm14 = vcmp.eq.s32.totalorder %v3150_v1, %v2677_v19  ;;  %vm922_vm12 = vcmp.eq.s32.totalorder %v3150_v1, %v2681_v21  ;;  %vm4359_vm7 = vcmp.eq.s32.totalorder %v3065_v44, %v2681_v21  ;;  %v4360_v0 = vmov 0  ;;  %v3206_v1 = vpop.permute.xlu1 %884 }
  0xed   : > { %v4357_v55 = vsel %vm3169_vm0, 4294967295, %v4356_v55  ;;  %vm3183_vm3 = vmand %vm4359_vm7, %vm4164_vm9  ;;  %vm4363_vm13 = vcmp.ne.s32.totalorder %v3082_v15, %v2661_v6  ;;  %v4364_v36 = vmov 0  ;;  %1424 = vadd.xlane.f32.xlu0 %v1423_v31  ;;  %vm4367_vm11 = vcmp.ne.s32.totalorder %v3082_v15, %v2675_v17  ;;  %4371 = vst [vmem:[#allocation58_spill] sm:$0xff] %v3206_v1 }
  0xee   : > { %4358 = vst [vmem:[#allocation54_spill] sm:$0xff] %v4357_v55  ;;  %v4361_v0 = vsel %vm3183_vm3, 4294967295, %v4360_v0  ;;  %vm3190_vm4 = vmand %vm921_vm14, %vm4363_vm13  ;;  %v4368_v33 = vmov 0  ;;  %vm4195_vm7 = vcmp.ne.s32.totalorder %v3148_v22, %v2661_v6  ;;  %v1432_v44 = vadd.f32 %v1935_v5, %v1934_v34 }
  0xef   : > { %4362 = vst [vmem:[#allocation55_spill] sm:$0xff] %v4361_v0  ;;  %v4365_v36 = vsel %vm3190_vm4, 4294967295, %v4364_v36  ;;  %vm3197_vm2 = vmand %vm922_vm12, %vm4367_vm11  ;;  %v1932_v38 = vsel %vm3190_vm4, 1.0, %v4285_v49  ;;  %vm4196_vm12 = vcmp.ne.s32.totalorder %v3148_v22, %v2675_v17  ;;  %v1938_v60 = vsel %vm3169_vm0, 1.0, %v4285_v49 }
  0xf0   : > { %4366 = vst [vmem:[#allocation56_spill] sm:$0xff] %v4365_v36  ;;  %v4369_v33 = vsel %vm3197_vm2, 4294967295, %v4368_v33  ;;  %v1933_v31 = vsel %vm3197_vm2, 1.0, %v4285_v49  ;;  %v1939_v15 = vsel %vm3183_vm3, 1.0, %v4285_v49  ;;  %vm925_vm11 = vcmp.eq.s32.totalorder %v3206_v1, %v2677_v19  ;;  %1433 = vadd.xlane.f32.xlu1 %v1432_v44 }
  0xf1   : > { %4370 = vst [vmem:[#allocation57_spill] sm:$0xff] %v4369_v33  ;;  %vm926_vm14 = vcmp.eq.s32.totalorder %v3206_v1, %v2681_v21  ;;  %v1429_v16 = vadd.f32 %v1933_v31, %v1932_v38  ;;  %vm3226_vm13 = vmand %vm925_vm11, %vm4195_vm7  ;;  %v4372_v34 = vmov 0  ;;  %v4375_v5 = vmov 0 }
  0xf2   : > { %v4373_v34 = vsel %vm3226_vm13, 4294967295, %v4372_v34  ;;  %vm3233_vm9 = vmand %vm926_vm14, %vm4196_vm12  ;;  %v1936_v19 = vsel %vm3226_vm13, 1.0, %v4285_v49  ;;  %v1438_v21 = vadd.f32 %v1939_v15, %v1938_v60  ;;  %vm1250_vm11 = vcmp.ge.s32.totalorder %v2507_v3, 0 }
  0xf3   : > { %4374 = vst [vmem:[#allocation59_spill] sm:$0xff] %v4373_v34  ;;  %1430 = vadd.xlane.f32.xlu0 %v1429_v16  ;;  %v4376_v5 = vsel %vm3233_vm9, 4294967295, %v4375_v5  ;;  %v1937_v38 = vsel %vm3233_vm9, 1.0, %v4285_v49  ;;  %vm1266_vm14 = vcmp.lt.s32.totalorder %v2507_v3, 128  ;;  %vm1249_vm12 = vcmp.ge.s32.totalorder %v2524_v9, 0 }
  0xf4   : > { %4377 = vst [vmem:[#allocation60_spill] sm:$0xff] %v4376_v5  ;;  %v1435_v31 = vadd.f32 %v1937_v38, %v1936_v19  ;;  %1439 = vadd.xlane.f32.xlu1 %v1438_v21  ;;  %vm1282_vm7 = vmand %vm1250_vm11, %vm1266_vm14  ;;  %vm1265_vm3 = vcmp.lt.s32.totalorder %v2524_v9, 128  ;;  %vm1252_vm0 = vcmp.ge.s32.totalorder %v2532_v10, 0  ;;  %vm1268_vm9 = vcmp.lt.s32.totalorder %v2532_v10, 128 }
  0xf5   : > { %vm1281_vm13 = vmand %vm1249_vm12, %vm1265_vm3  ;;  %vm1251_vm2 = vcmp.ge.s32.totalorder %v2521_v8, 0  ;;  %vm1267_vm4 = vcmp.lt.s32.totalorder %v2521_v8, 128  ;;  %vm1253_vm14 = vcmp.ge.s32.totalorder %v2545_v4, 0  ;;  %vm1269_vm10 = vcmp.lt.s32.totalorder %v2545_v4, 128 }
  0xf6   : > { %vm1283_vm11 = vmand %vm1251_vm2, %vm1267_vm4  ;;  %vm1254_vm2 = vcmp.ge.s32.totalorder %v2561_v23, 0  ;;  %vm1270_vm3 = vcmp.lt.s32.totalorder %v2561_v23, 128  ;;  %vm1255_vm4 = vcmp.ge.s32.totalorder %v2575_v29, 0 }
  0xf7   : > { %1436 = vadd.xlane.f32.xlu0 %v1435_v31 }
 0x123   : > { %v3243_v16 = vpop.f32.mrb[0].mxu0  ;;  %v3245_v1 = vpop.f32.mrb[0].mxu1 }
 0x124   : > { %v3247_v22 = vpop.f32.mrb[1].mxu0  ;;  %v3249_v0 = vpop.f32.mrb[1].mxu1 }
 0x125   : > { %v660_v55 = vmax.f32 %v3243_v16, %v3247_v22  ;;  %v684_v60 = vmax.f32 %v3245_v1, %v3249_v0 }
 0x127   : > { %v3255_v15 = vpop.f32.mrb[2].mxu0  ;;  %661 = vmax.xlane.f32.xlu0 %v660_v55  ;;  %v3257_v44 = vpop.f32.mrb[2].mxu1 }
 0x128   : > { %v3259_v19 = vpop.f32.mrb[3].mxu0  ;;  %v3261_v21 = vpop.f32.mrb[3].mxu1 }
 0x129   : > { %v663_v38 = vmax.f32 %v3255_v15, %v3259_v19  ;;  %v687_v31 = vmax.f32 %v3257_v44, %v3261_v21 }
 0x12b   : > { %v3267_v5 = vpop.f32.mrb[4].mxu0  ;;  %685 = vmax.xlane.f32.xlu0 %v684_v60  ;;  %664 = vmax.xlane.f32.xlu1 %v663_v38  ;;  %v3269_v34 = vpop.f32.mrb[4].mxu1 }
 0x12c   : > { %v3271_v20 = vpop.f32.mrb[5].mxu0  ;;  %v3273_v55 = vpop.f32.mrb[5].mxu1 }
 0x12d   : > { %v666_v63 = vmax.f32 %v3267_v5, %v3271_v20  ;;  %v690_v33 = vmax.f32 %v3269_v34, %v3273_v55 }
 0x12f   : > { %v3279_v36 = vpop.f32.mrb[6].mxu0  ;;  %667 = vmax.xlane.f32.xlu0 %v666_v63  ;;  %688 = vmax.xlane.f32.xlu1 %v687_v31  ;;  %v3281_v17 = vpop.f32.mrb[6].mxu1 }
 0x130   : > { %4378 = vst [vmem:[#allocation61_spill] sm:$0xff] %v3279_v36  ;;  %4379 = vst [vmem:[#allocation62_spill] sm:$0xff] %v3281_v17  ;;  %v3283_v60 = vpop.f32.mrb[7].mxu0  ;;  %v3285_v38 = vpop.f32.mrb[7].mxu1 }
 0x131   : > { %4380 = vst [vmem:[#allocation63_spill] sm:$0xff] %v3283_v60  ;;  %4381 = vst [vmem:[#allocation64_spill] sm:$0xff] %v3285_v38  ;;  %v669_v54 = vmax.f32 %v3279_v36, %v3283_v60  ;;  %v693_v11 = vmax.f32 %v3281_v17, %v3285_v38 }
 0x133   : > { %v3291_v25 = vpop.f32.mrb[8].mxu0  ;;  %691 = vmax.xlane.f32.xlu0 %v690_v33  ;;  %670 = vmax.xlane.f32.xlu1 %v669_v54  ;;  %v3293_v56 = vpop.f32.mrb[8].mxu1 }
 0x134   : > { %4382 = vst [vmem:[#allocation65_spill] sm:$0xff] %v3291_v25  ;;  %4383 = vst [vmem:[#allocation66_spill] sm:$0xff] %v3293_v56  ;;  %v3295_v63 = vpop.f32.mrb[9].mxu0  ;;  %v3297_v31 = vpop.f32.mrb[9].mxu1 }
 0x135   : > { %4384 = vst [vmem:[#allocation67_spill] sm:$0xff] %v3295_v63  ;;  %4385 = vst [vmem:[#allocation68_spill] sm:$0xff] %v3297_v31  ;;  %v672_v41 = vmax.f32 %v3291_v25, %v3295_v63  ;;  %v696_v12 = vmax.f32 %v3293_v56, %v3297_v31 }
 0x137   : > { %v3303_v60 = vpop.f32.mrb[10].mxu0  ;;  %673 = vmax.xlane.f32.xlu0 %v672_v41  ;;  %694 = vmax.xlane.f32.xlu1 %v693_v11  ;;  %v3305_v38 = vpop.f32.mrb[10].mxu1 }
 0x138   : > { %4386 = vst [vmem:[#allocation69_spill] sm:$0xff] %v3303_v60  ;;  %4387 = vst [vmem:[#allocation70_spill] sm:$0xff] %v3305_v38  ;;  %v3307_v33 = vpop.f32.mrb[11].mxu0  ;;  %v3309_v54 = vpop.f32.mrb[11].mxu1 }
 0x139   : > { %4388 = vst [vmem:[#allocation71_spill] sm:$0xff] %v3307_v33  ;;  %4389 = vst [vmem:[#allocation72_spill] sm:$0xff] %v3309_v54  ;;  %v675_v17 = vmax.f32 %v3303_v60, %v3307_v33  ;;  %v699_v36 = vmax.f32 %v3305_v38, %v3309_v54 }
 0x13b   : > { %v3315_v63 = vpop.f32.mrb[12].mxu0  ;;  %697 = vmax.xlane.f32.xlu0 %v696_v12  ;;  %676 = vmax.xlane.f32.xlu1 %v675_v17  ;;  %v3317_v31 = vpop.f32.mrb[12].mxu1 }
 0x13c   : > { %v3319_v41 = vpop.f32.mrb[13].mxu0  ;;  %v3321_v11 = vpop.f32.mrb[13].mxu1 }
 0x13d   : > { %4390 = vst [vmem:[#allocation73_spill] sm:$0xff] %v3321_v11  ;;  %v678_v56 = vmax.f32 %v3315_v63, %v3319_v41  ;;  %v702_v25 = vmax.f32 %v3317_v31, %v3321_v11 }
 0x13f   : > { %v3327_v33 = vpop.f32.mrb[14].mxu0  ;;  %679 = vmax.xlane.f32.xlu0 %v678_v56  ;;  %700 = vmax.xlane.f32.xlu1 %v699_v36  ;;  %v3329_v54 = vpop.f32.mrb[14].mxu1  ;;  %v3344_v56 = vsel %vm1282_vm7, 1.0, %v4285_v49  ;;  %vm1284_vm7 = vmand %vm1252_vm0, %vm1268_vm9 }
 0x140   : > { %v3331_v12 = vpop.f32.mrb[15].mxu0  ;;  %v3333_v17 = vpop.f32.mrb[15].mxu1  ;;  %4391 = vst [vmem:[#allocation74_spill] sm:$0xff] %v3344_v56  ;;  %vm1285_vm9 = vmand %vm1253_vm14, %vm1269_vm10  ;;  %vm1271_vm10 = vcmp.lt.s32.totalorder %v2575_v29, 128  ;;  %vm1273_vm14 = vcmp.lt.s32.totalorder %v2599_v40, 128 }
 0x141   : > { %v681_v38 = vmax.f32 %v3327_v33, %v3331_v12  ;;  %v705_v60 = vmax.f32 %v3329_v54, %v3333_v17  ;;  %vm1286_vm0 = vmand %vm1254_vm2, %vm1270_vm3  ;;  %vm1258_vm2 = vcmp.ge.s32.totalorder %v2538_v13, 0  ;;  %vm1274_vm3 = vcmp.lt.s32.totalorder %v2538_v13, 128 }
 0x142   : > { %v3384_v23 = vsel %vm1286_vm0, 1.0, %v4285_v49  ;;  %vm1287_vm12 = vmand %vm1255_vm4, %vm1271_vm10  ;;  %vm1259_vm10 = vcmp.ge.s32.totalorder %v2609_v45, 0 }
 0x143   : > { %703 = vmax.xlane.f32.xlu0 %v702_v25  ;;  %682 = vmax.xlane.f32.xlu1 %v681_v38  ;;  %v3354_v25 = vsel %vm1281_vm13, 1.0, %v4285_v49  ;;  %v3362_v38 = vsel %vm1284_vm7, 1.0, %v4285_v49  ;;  %4397 = vst [vmem:[#allocation80_spill] sm:$0xff] %v3384_v23  ;;  %vm1256_vm13 = vcmp.ge.s32.totalorder %v2589_v35, 0  ;;  %vm1272_vm7 = vcmp.lt.s32.totalorder %v2589_v35, 128  ;;  %vm1290_vm4 = vmand %vm1258_vm2, %vm1274_vm3 }
 0x144   : > { %4393 = vst [vmem:[#allocation76_spill] sm:$0xff] %v3354_v25  ;;  %4395 = vst [vmem:[#allocation78_spill] sm:$0xff] %v3362_v38  ;;  %vm1262_vm2 = vcmp.ge.s32.totalorder %v2564_v24, 0  ;;  %vm1278_vm3 = vcmp.lt.s32.totalorder %v2564_v24, 128 }
 0x147   : > { %706 = vmax.xlane.f32.xlu1 %v705_v60 }
 0x156   : > { %v1398_v36 = vpop.xlane.xlu1 %1397 }
 0x157   : > { %v1570_v11 = vmul.f32 0.05, %v1398_v36 }
 0x159   : > { %v3351_v3 = vadd.f32 %v3344_v56, %v1570_v11  ;;  %v3365_v11 = vsel %vm1283_vm11, 1.0, %v4285_v49  ;;  %vm1257_vm11 = vcmp.ge.s32.totalorder %v2599_v40, 0 }
 0x15a   : > { %v1395_v9 = vpop.xlane.xlu0 %1394  ;;  %vm1289_vm0 = vmand %vm1257_vm11, %vm1273_vm14  ;;  %vm1261_vm11 = vcmp.ge.s32.totalorder %v2617_v48, 0  ;;  %vm1277_vm14 = vcmp.lt.s32.totalorder %v2617_v48, 128 }
 0x15b   : > { %4392 = vst [vmem:[#allocation75_spill] sm:$0xff] %v3351_v3  ;;  %v1569_v60 = vmul.f32 0.05, %v1395_v9  ;;  %v3412_v40 = vsel %vm1289_vm0, 1.0, %v4285_v49  ;;  %vm1293_vm0 = vmand %vm1261_vm11, %vm1277_vm14  ;;  %vm4419_vm11 = vnez %v4305_v2  ;;  %vm4420_vm14 = vnez %v4251_v42 }
 0x15c   : > { %4403 = vst [vmem:[#allocation86_spill] sm:$0xff] %v3412_v40 }
 0x15d   : > { %v3359_v10 = vadd.f32 %v3354_v25, %v1569_v60  ;;  %v3376_v60 = vsel %vm1285_vm9, 1.0, %v4285_v49  ;;  %vm1288_vm9 = vmand %vm1256_vm13, %vm1272_vm7  ;;  %vm1260_vm13 = vcmp.ge.s32.totalorder %v2548_v18, 0  ;;  %vm1276_vm7 = vcmp.lt.s32.totalorder %v2548_v18, 128 }
 0x15e   : > { %v1404_v8 = vpop.xlane.xlu1 %1403  ;;  %v1401_v36 = vpop.xlane.xlu0 %1400  ;;  %4396 = vst [vmem:[#allocation79_spill] sm:$0xff] %v3376_v60  ;;  %v3402_v35 = vsel %vm1288_vm9, 1.0, %v4285_v49  ;;  %vm1292_vm15 = vmand %vm1260_vm13, %vm1276_vm7  ;;  %vm961_vm13 = vcmp.eq.s32.totalorder %v2661_v6, %v2731_v39  ;;  %vm962_vm7 = vcmp.eq.s32.totalorder %v2661_v6, %v2689_v26 }
 0x15f   : > { %4394 = vst [vmem:[#allocation77_spill] sm:$0xff] %v3359_v10  ;;  %v1572_v56 = vmul.f32 0.05, %v1404_v8  ;;  %v1571_v3 = vmul.f32 0.05, %v1401_v36  ;;  %v3392_v36 = vsel %vm1287_vm12, 1.0, %v4285_v49 }
 0x160   : > { %4399 = vst [vmem:[#allocation82_spill] sm:$0xff] %v3392_v36  ;;  %4401 = vst [vmem:[#allocation84_spill] sm:$0xff] %v3402_v35  ;;  %vm1275_vm12 = vcmp.lt.s32.totalorder %v2609_v45, 128 }
 0x161   : > { %v3370_v4 = vadd.f32 %v3362_v38, %v1572_v56  ;;  %v3373_v9 = vadd.f32 %v3365_v11, %v1571_v3  ;;  %vm1291_vm9 = vmand %vm1259_vm10, %vm1275_vm12  ;;  %vm1264_vm10 = vcmp.ge.s32.totalorder %v2578_v30, 0  ;;  %vm1280_vm12 = vcmp.lt.s32.totalorder %v2578_v30, 128 }
 0x162   : > { %v1407_v25 = vpop.xlane.xlu0 %1406 }
 0x163   : > { %v1573_v10 = vmul.f32 0.05, %v1407_v25 }
 0x165   : > { %v3381_v8 = vadd.f32 %v3376_v60, %v1573_v10 }
 0x166   : > { %v1410_v56 = vpop.xlane.xlu1 %1409 }
 0x167   : > { %v1574_v3 = vmul.f32 0.05, %v1410_v56 }
 0x169   : > { %v3389_v25 = vadd.f32 %v3384_v23, %v1574_v3 }
 0x16a   : > { %v1413_v29 = vpop.xlane.xlu0 %1412 }
 0x16b   : > { %4398 = vst [vmem:[#allocation81_spill] sm:$0xff] %v3389_v25  ;;  %v1575_v10 = vmul.f32 0.05, %v1413_v29 }
 0x16d   : > { %v3399_v56 = vadd.f32 %v3392_v36, %v1575_v10  ;;  %v3415_v10 = vsel %vm1290_vm4, 1.0, %v4285_v49  ;;  %vm1294_vm4 = vmand %vm1262_vm2, %vm1278_vm3  ;;  %vm964_vm2 = vcmp.eq.s32.totalorder %v2661_v6, %v2764_v46 }
 0x16e   : > { %4404 = vst [vmem:[#allocation87_spill] sm:$0xff] %v3415_v10 }
 0x16f   : > { %4400 = vst [vmem:[#allocation83_spill] sm:$0xff] %v3399_v56 }
 0x170   : > { %v1416_v3 = vpop.xlane.xlu1 %1415 }
 0x171   : > { %v1576_v23 = vmul.f32 0.05, %v1416_v3 }
 0x173   : > { %v3409_v13 = vadd.f32 %v3402_v35, %v1576_v23  ;;  %v3428_v35 = vsel %vm1291_vm9, 1.0, %v4285_v49  ;;  %vm4421_vm9 = vnez %v4258_v7 }
 0x174   : > { %v1422_v3 = vpop.xlane.xlu1 %1421  ;;  %4405 = vst [vmem:[#allocation88_spill] sm:$0xff] %v3428_v35 }
 0x175   : > { %4402 = vst [vmem:[#allocation85_spill] sm:$0xff] %v3409_v13  ;;  %v1419_v29 = vpop.xlane.xlu0 %1418  ;;  %v1578_v36 = vmul.f32 0.05, %v1422_v3  ;;  %v3431_v3 = vsel %vm1292_vm15, 1.0, %v4285_v49  ;;  %vm1296_vm15 = vmand %vm1264_vm10, %vm1280_vm12 }
 0x176   : > { %v1577_v45 = vmul.f32 0.05, %v1419_v29  ;;  %4406 = vst [vmem:[#allocation89_spill] sm:$0xff] %v3431_v3 }
 0x177   : > { %v3425_v23 = vadd.f32 %v3415_v10, %v1578_v36  ;;  %v3439_v36 = vsel %vm1293_vm0, 1.0, %v4285_v49 }
 0x178   : > { %v3422_v18 = vadd.f32 %v3412_v40, %v1577_v45  ;;  %v1428_v48 = vpop.xlane.xlu1 %1427  ;;  %4408 = vst [vmem:[#allocation91_spill] sm:$0xff] %v3439_v36 }
 0x179   : > { %v1580_v13 = vmul.f32 0.05, %v1428_v48 }
 0x17a   : > { %v1425_v60 = vpop.xlane.xlu0 %1424 }
 0x17b   : > { %v1579_v29 = vmul.f32 0.05, %v1425_v60  ;;  %v3442_v10 = vadd.f32 %v3431_v3, %v1580_v13  ;;  %v3445_v60 = vsel %vm1294_vm4, 1.0, %v4285_v49 }
 0x17c   : > { %4410 = vst [vmem:[#allocation93_spill] sm:$0xff] %v3445_v60 }
 0x17d   : > { %v3436_v24 = vadd.f32 %v3428_v35, %v1579_v29  ;;  %4409 = vst [vmem:[#allocation92_spill] sm:$0xff] %v3442_v10  ;;  %v1434_v40 = vpop.xlane.xlu1 %1433  ;;  %v2242_v10 = vld [vmem:[%s2358_s17] sm:$0xff] }
 0x17e   : > { %v1582_v56 = vmul.f32 0.05, %v1434_v40 }
 0x17f   : > { %4407 = vst [vmem:[#allocation90_spill] sm:$0xff] %v3436_v24  ;;  %v3454_v24 = vsel %vm1296_vm15, 1.0, %v4285_v49 }
 0x180   : > { %v1431_v45 = vpop.xlane.xlu0 %1430  ;;  %v3451_v29 = vadd.f32 %v3445_v60, %v1582_v56  ;;  %4413 = vst [vmem:[#allocation96_spill] sm:$0xff] %v3454_v24 }
 0x181   : > { %v1581_v48 = vmul.f32 0.05, %v1431_v45  ;;  %v1440_v35 = vpop.xlane.xlu1 %1439 }
 0x182   : > { %4412 = vst [vmem:[#allocation95_spill] sm:$0xff] %v3451_v29  ;;  %v1584_v38 = vmul.f32 0.05, %v1440_v35 }
 0x183   : > { %v3448_v30 = vadd.f32 %v3439_v36, %v1581_v48 }
 0x184   : > { %v3457_v13 = vadd.f32 %v3454_v24, %v1584_v38  ;;  %v3459_v3 = vpop.xlane.xlu0 %1436 }
 0x185   : > { %4411 = vst [vmem:[#allocation94_spill] sm:$0xff] %v3448_v30  ;;  %4415 = vst [vmem:[#allocation98_spill] sm:$0xff] %v3459_v3 }
 0x186   : > { %4414 = vst [vmem:[#allocation97_spill] sm:$0xff] %v3457_v13 }
 0x1b4   : > { %v662_v45 = vpop.xlane.xlu0 %661 }
 0x1b5   : > { %v708_v40 = vmax.f32 %v2629_v51, %v662_v45 }
 0x1b7   : > { %v724_v48 = vsub.f32 %v2242_v10, %v708_v40  ;;  %v740_v56 = vsub.f32 %v3243_v16, %v708_v40  ;;  %v741_v60 = vsub.f32 %v3247_v22, %v708_v40  ;;  %v2243_v16 = vld [vmem:[%s2358_s17 + $0x40] sm:$0xff]  ;;  %v2244_v40 = vld [vmem:[%s2358_s17 + $0x8] sm:$0xff] }
 0x1b8   : > { %v665_v36 = vpop.xlane.xlu1 %664  ;;  %v686_v29 = vpop.xlane.xlu0 %685 }
 0x1b9   : > { %v709_v38 = vmax.f32 %v2633_v53, %v665_v36  ;;  %v716_v35 = vmax.f32 %v2645_v59, %v686_v29  ;;  %v1441_v24 = vsel %vm961_vm13, %v724_v48, 0.0  ;;  %v1489_v51 = vsel %vm2755_vm1, %v740_v56, 0.0 }
 0x1ba   : > { %1457 = vadd.xlane.f32.xlu0 %v1441_v24  ;;  %v1490_v10 = vsel %vm2769_vm5, %v741_v60, 0.0  ;;  %v977_v22 = vmul.f32 1.442695, %v724_v48  ;;  %v1009_v36 = vmul.f32 1.442695, %v740_v56  ;;  %vm4416_vm1 = vnez %v4328_v27  ;;  %v2246_v27 = vld [vmem:[%s2358_s17 + $0x50] sm:$0xff] }
 0x1bb   : > { %v3474_v45 = vsub.f32 %v2243_v16, %v716_v35  ;;  %v725_v13 = vsub.f32 %v2244_v40, %v709_v38  ;;  %v1521_v30 = vadd.f32 %v1490_v10, %v1489_v51  ;;  %v742_v53 = vsub.f32 %v3255_v15, %v709_v38  ;;  %v2247_v40 = vld [vmem:[%s2358_s17 + $0x10] sm:$0xff] }
 0x1bc   : > { %v689_v39 = vpop.xlane.xlu1 %688  ;;  %v668_v49 = vpop.xlane.xlu0 %667  ;;  %v743_v59 = vsub.f32 %v3259_v19, %v709_v38  ;;  %v756_v43 = vsub.f32 %v3245_v1, %v716_v35  ;;  %v1011_v29 = vmul.f32 1.442695, %v741_v60  ;;  %2082 = vpow2.f32 %v977_v22 }
 0x1bd   : > { %v717_v47 = vmax.f32 %v2643_v58, %v689_v39  ;;  %v1442_v24 = vsel %vm962_vm7, %v725_v13, 0.0  ;;  %v993_v48 = vmul.f32 1.442695, %v3474_v45  ;;  %v1491_v26 = vsel %vm2704_vm6, %v742_v53, 0.0 }
 0x1be   : > { %1459 = vadd.xlane.f32.xlu1 %v1442_v24  ;;  %1522 = vadd.xlane.f32.xlu0 %v1521_v30  ;;  %v1492_v15 = vsel %vm2714_vm8, %v743_v59, 0.0  ;;  %v710_v19 = vmax.f32 %v2627_v50, %v668_v49  ;;  %v757_v56 = vsub.f32 %v3249_v0, %v716_v35  ;;  %v1505_v60 = vsel %vm4416_vm1, %v756_v43, 0.0  ;;  %v2245_v30 = vld [vmem:[%s2358_s17 + $0x48] sm:$0xff] }
 0x1bf   : > { %v1524_v58 = vadd.f32 %v1492_v15, %v1491_v26  ;;  %v3493_v51 = vsub.f32 %v2245_v30, %v717_v47  ;;  %v979_v28 = vmul.f32 1.442695, %v725_v13  ;;  %2084 = vpow2.f32 %v1009_v36  ;;  %v2248_v26 = vld [vmem:[%s2358_s17 + $0x58] sm:$0xff] }
 0x1c0   : > { %v671_v1 = vpop.xlane.xlu1 %670  ;;  %v692_v38 = vpop.xlane.xlu0 %691  ;;  %2086 = vpow2.f32 %v1011_v29  ;;  %vm4417_vm6 = vnez %v4332_v57  ;;  %v1013_v49 = vmul.f32 1.442695, %v742_v53  ;;  %v1015_v10 = vmul.f32 1.442695, %v743_v59 }
 0x1c1   : > { %v718_v32 = vmax.f32 %v2649_v62, %v692_v38  ;;  %v1506_v50 = vsel %vm4417_vm6, %v757_v56, 0.0  ;;  %v758_v0 = vsub.f32 %v3257_v44, %v717_v47  ;;  %2088 = vpow2.f32 %v993_v48 }
 0x1c2   : > { %1525 = vadd.xlane.f32.xlu1 %v1524_v58  ;;  %v1545_v16 = vadd.f32 %v1506_v50, %v1505_v60  ;;  %v759_v13 = vsub.f32 %v3261_v21, %v717_v47  ;;  %v726_v39 = vsub.f32 %v2247_v40, %v710_v19  ;;  %v995_v62 = vmul.f32 1.442695, %v3493_v51  ;;  %v2249_v60 = vld [vmem:[%s2358_s17 + $0x18] sm:$0xff] }
 0x1c3   : > { %v3500_v35 = vsub.f32 %v2246_v27, %v718_v32  ;;  %2090 = vpow2.f32 %v979_v28  ;;  %vm963_vm8 = vcmp.eq.s32.totalorder %v2661_v6, %v2724_v37  ;;  %v1043_v44 = vmul.f32 1.442695, %v757_v56  ;;  %v4424_v27 = vld [vmem:[#allocation51_spill] sm:$0xff] }
 0x1c4   : > { %v695_v22 = vpop.xlane.xlu1 %694  ;;  %1546 = vadd.xlane.f32.xlu0 %v1545_v16  ;;  %vm4418_vm5 = vnez %v4300_v14  ;;  %v1508_v21 = vsel %vm4419_vm11, %v759_v13, 0.0  ;;  %v744_v59 = vsub.f32 %v3267_v5, %v710_v19  ;;  %v711_v47 = vmax.f32 %v2631_v52, %v671_v1  ;;  %v674_v58 = vpop.xlane.xlu0 %673 }
 0x1c5   : > { %v3506_v57 = vmax.f32 %v2647_v61, %v695_v22  ;;  %v1507_v53 = vsel %vm4418_vm5, %v758_v0, 0.0  ;;  %2092 = vpow2.f32 %v1013_v49  ;;  %v1041_v24 = vmul.f32 1.442695, %v756_v43 }
 0x1c6   : > { %v1548_v36 = vadd.f32 %v1508_v21, %v1507_v53  ;;  %v997_v61 = vmul.f32 1.442695, %v3500_v35  ;;  %2094 = vpow2.f32 %v1015_v10  ;;  %v1443_v29 = vsel %vm963_vm8, %v726_v39, 0.0  ;;  %v2083_v14 = vpop.eup %2082  ;;  %v4422_v10 = vld [vmem:[#allocation50_spill] sm:$0xff] }
 0x1c7   : > { %v745_v48 = vsub.f32 %v3271_v20, %v710_v19  ;;  %2096 = vpow2.f32 %v995_v62  ;;  %v3522_v2 = vsub.f32 %v2248_v26, %v3506_v57  ;;  %v1047_v5 = vmul.f32 1.442695, %v759_v13 }
 0x1c8   : > { %v3517_v37 = vpop.xlane.xlu1 %676  ;;  %1549 = vadd.xlane.f32.xlu1 %v1548_v36  ;;  %1461 = vadd.xlane.f32.xlu0 %v1443_v29  ;;  %2098 = vpow2.f32 %v1043_v44  ;;  %v1045_v52 = vmul.f32 1.442695, %v758_v0  ;;  %v1493_v43 = vsel %vm4420_vm14, %v744_v59, 0.0  ;;  %v981_v20 = vmul.f32 1.442695, %v726_v39  ;;  %v4427_v44 = vld [vmem:[#allocation63_spill] sm:$0xff] }
 0x1c9   : > { %v1494_v15 = vsel %vm4421_vm9, %v745_v48, 0.0  ;;  %v3528_v1 = vpop.eup %2084  ;;  %2100 = vpow2.f32 %v1041_v24  ;;  %v727_v30 = vsub.f32 %v2249_v60, %v711_v47  ;;  %v760_v28 = vsub.f32 %v3269_v34, %v718_v32 }
 0x1ca   : > { %v1527_v19 = vadd.f32 %v1494_v15, %v1493_v43  ;;  %v3530_v38 = vpop.eup %2086  ;;  %2102 = vpow2.f32 %v997_v61  ;;  %v761_v42 = vsub.f32 %v3273_v55, %v718_v32  ;;  %v999_v7 = vmul.f32 1.442695, %v3522_v2  ;;  %v4426_v32 = vld [vmem:[#allocation61_spill] sm:$0xff]  ;;  %v698_v61 = vpop.xlane.xlu0 %697  ;;  %v4429_v43 = vld [vmem:[#allocation16_spill] sm:$0xff] }
 0x1cb   : > { %2104 = vpow2.f32 %v1047_v5  ;;  %v2089_v50 = vpop.eup %2088  ;;  %v1017_v49 = vmul.f32 1.442695, %v744_v59  ;;  %vm4423_vm3 = vnez %v4422_v10  ;;  %v1019_v34 = vmul.f32 1.442695, %v745_v48  ;;  %v4428_v59 = vld [vmem:[#allocation4_spill] sm:$0xff] }
 0x1cc   : > { %v3532_v56 = vpop.xlane.xlu1 %700  ;;  %1073 = vadd.xlane.f32.xlu1 %v2083_v14  ;;  %1528 = vadd.xlane.f32.xlu0 %v1527_v19  ;;  %2106 = vpow2.f32 %v1045_v52  ;;  %v1509_v16 = vsel %vm4423_vm3, %v760_v28, 0.0  ;;  %vm4425_vm0 = vnez %v4424_v27  ;;  %v746_v22 = vsub.f32 %v4426_v32, %v711_v47  ;;  %v4435_v27 = vld [vmem:[#allocation64_spill] sm:$0xff] }
 0x1cd   : > { %v3542_v0 = vpop.eup %2090  ;;  %2108 = vpow2.f32 %v981_v20  ;;  %v1510_v55 = vsel %vm4425_vm0, %v761_v42, 0.0  ;;  %v983_v13 = vmul.f32 1.442695, %v727_v30  ;;  %v1444_v40 = vsel %vm964_vm2, %v727_v30, 0.0  ;;  %v4431_v20 = vld [vmem:[#allocation17_spill] sm:$0xff] }
 0x1ce   : > { %v1551_v39 = vadd.f32 %v1510_v55, %v1509_v16  ;;  %v747_v53 = vsub.f32 %v4427_v44, %v711_v47  ;;  %2110 = vpow2.f32 %v999_v7  ;;  %v1051_v46 = vmul.f32 1.442695, %v761_v42  ;;  %v4433_v7 = vld [vmem:[#allocation9_spill] sm:$0xff]  ;;  %v4434_v16 = vld [vmem:[#allocation62_spill] sm:$0xff] }
 0x1cf   : > { %v3548_v21 = vpop.eup %2092  ;;  %2112 = vpow2.f32 %v1017_v49  ;;  %v1049_v29 = vmul.f32 1.442695, %v760_v28  ;;  %v1021_v26 = vmul.f32 1.442695, %v746_v22  ;;  %vm4430_vm4 = vnez %v4429_v43  ;;  %v4444_v43 = vld [vmem:[#allocation24_spill] sm:$0xff] }
 0x1d0   : > { %v683_v62 = vpop.xlane.xlu1 %682  ;;  %1463 = vadd.xlane.f32.xlu1 %v1444_v40  ;;  %v2095_v36 = vpop.eup %2094  ;;  %1552 = vadd.xlane.f32.xlu0 %v1551_v39  ;;  %2114 = vpow2.f32 %v1019_v34  ;;  %v1023_v52 = vmul.f32 1.442695, %v747_v53  ;;  %v1495_v15 = vsel %vm4430_vm4, %v746_v22, 0.0  ;;  %vm4432_vm10 = vnez %v4431_v20  ;;  %v4436_v22 = vld [vmem:[#allocation3_spill] sm:$0xff] }
 0x1d1   : > { %v3551_v24 = vmax.f32 %v4428_v59, %v683_v62  ;;  %v3553_v48 = vpop.eup %2096  ;;  %2116 = vpow2.f32 %v983_v13  ;;  %v1496_v19 = vsel %vm4432_vm10, %v747_v53, 0.0  ;;  %v762_v34 = vsub.f32 %v4434_v16, %v3506_v57  ;;  %v680_v40 = vpop.xlane.xlu0 %679  ;;  %v4437_v53 = vld [vmem:[#allocation43_spill] sm:$0xff]  ;;  %v4441_v59 = vld [vmem:[#allocation2_spill] sm:$0xff] }
 0x1d2   : > { %v2099_v5 = vpop.eup %2098  ;;  %2118 = vpow2.f32 %v1051_v46  ;;  %v1530_v42 = vadd.f32 %v1496_v19, %v1495_v15  ;;  %v763_v55 = vsub.f32 %v4435_v27, %v3506_v57  ;;  %v712_v13 = vmax.f32 %v4436_v22, %v674_v58  ;;  %v4439_v58 = vld [vmem:[#allocation13_spill] sm:$0xff]  ;;  %v4445_v19 = vld [vmem:[#allocation44_spill] sm:$0xff] }
 0x1d3   : > { %v3557_v14 = vsub.f32 %v3327_v33, %v3551_v24  ;;  %v3561_v47 = vsub.f32 %v3331_v12, %v3551_v24  ;;  %v2101_v30 = vpop.eup %2100  ;;  %2120 = vpow2.f32 %v1049_v29  ;;  %v1053_v44 = vmul.f32 1.442695, %v762_v34  ;;  %v4442_v29 = vld [vmem:[#allocation7_spill] sm:$0xff] }
 0x1d4   : > { %v707_v60 = vpop.xlane.xlu1 %706  ;;  %v3568_v28 = vpop.eup %2102  ;;  %1089 = vadd.xlane.f32.xlu0 %v2089_v50  ;;  %2122 = vpow2.f32 %v1021_v26  ;;  %1531 = vadd.xlane.f32.xlu1 %v1530_v42  ;;  %vm4438_vm12 = vnez %v4437_v53  ;;  %vm4440_vm15 = vcmp.ne.s32.totalorder %v4439_v58, %v2661_v6  ;;  %v3598_v26 = vmax.f32 %v4442_v29, %v698_v61 }
 0x1d5   : > { %v1037_v33 = vmul.f32 1.442695, %v3557_v14  ;;  %v1039_v12 = vmul.f32 1.442695, %v3561_v47  ;;  %v3572_v49 = vmax.f32 %v4433_v7, %v707_v60  ;;  %v2105_v10 = vpop.eup %2104  ;;  %2124 = vpow2.f32 %v1023_v52  ;;  %v4443_v52 = vld [vmem:[#allocation19_spill] sm:$0xff]  ;;  %v4449_v60 = vld [vmem:[#allocation33_spill] sm:$0xff] }
 0x1d6   : > { %v2107_v32 = vpop.eup %2106  ;;  %v1511_v57 = vsel %vm4438_vm12, %v762_v34, 0.0  ;;  %v1105_v46 = vsel %vm4440_vm15, %v3528_v1, 0.0  ;;  %vm965_vm13 = vcmp.eq.s32.totalorder %v2661_v6, %v4443_v52  ;;  %vm966_vm7 = vcmp.eq.s32.totalorder %v2661_v6, %v4444_v43  ;;  %v4474_v43 = vld [vmem:[#allocation68_spill] sm:$0xff] }
 0x1d7   : > { %v3581_v50 = vsub.f32 %v3329_v54, %v3572_v49  ;;  %v3585_v39 = vsub.f32 %v3333_v17, %v3572_v49  ;;  %v3587_v62 = vpop.eup %2108  ;;  %2126 = vpow2.f32 %v1037_v33  ;;  %v713_v54 = vmax.f32 %v4441_v59, %v3517_v37  ;;  %v4447_v37 = vld [vmem:[#allocation10_spill] sm:$0xff] }
 0x1d8   : > { %2128 = vpow2.f32 %v1039_v12  ;;  %v3605_v15 = vpop.eup %2110  ;;  %v1055_v20 = vmul.f32 1.442695, %v763_v55  ;;  %vm4446_vm1 = vnez %v4445_v19  ;;  %vm4448_vm6 = vcmp.ne.s32.totalorder %v4439_v58, %v4447_v37  ;;  %v4455_v58 = vld [vmem:[#allocation25_spill] sm:$0xff]  ;;  %v2251_v19 = vld [vmem:[%s2358_s17 + $0x28] sm:$0xff] }
 0x1d9   : > { %v1069_v17 = vmul.f32 1.442695, %v3581_v50  ;;  %v1512_v1 = vsel %vm4446_vm1, %v763_v55, 0.0  ;;  %v1106_v61 = vsel %vm4448_vm6, %v3530_v38, 0.0  ;;  %vm4450_vm8 = vcmp.ne.s32.totalorder %v4449_v60, %v2661_v6  ;;  %v3616_v12 = vpop.eup %2112  ;;  %v4452_v38 = vld [vmem:[#allocation8_spill] sm:$0xff] }
 0x1da   : > { %v1121_v33 = vsel %vm4450_vm8, %v2101_v30, 0.0  ;;  %v1071_v42 = vmul.f32 1.442695, %v3585_v39  ;;  %v1554_v7 = vadd.f32 %v1512_v1, %v1511_v57  ;;  %v1137_v16 = vadd.f32 %v1106_v61, %v1105_v46  ;;  %v3622_v27 = vpop.eup %2114  ;;  %v704_v57 = vpop.xlane.xlu0 %703  ;;  %v4458_v61 = vld [vmem:[#allocation65_spill] sm:$0xff] }
 0x1db   : > { %vm4451_vm5 = vcmp.ne.s32.totalorder %v4449_v60, %v4447_v37  ;;  %2130 = vpow2.f32 %v1053_v44  ;;  %vm4453_vm11 = vcmp.ne.s32.totalorder %v4452_v38, %v2661_v6  ;;  %vm4454_vm14 = vcmp.ne.s32.totalorder %v4452_v38, %v4447_v37  ;;  %v3631_v53 = vpop.eup %2116 }
 0x1dc   : > { %v1122_v34 = vsel %vm4451_vm5, %v2099_v5, 0.0  ;;  %v1107_v30 = vsel %vm4453_vm11, %v3548_v21, 0.0  ;;  %v1108_v22 = vsel %vm4454_vm14, %v2095_v36, 0.0  ;;  %2132 = vpow2.f32 %v1069_v17  ;;  %1555 = vadd.xlane.f32.xlu1 %v1554_v7  ;;  %1138 = vadd.xlane.f32.xlu0 %v1137_v16  ;;  %v3639_v21 = vpop.eup %2118  ;;  %v2250_v36 = vld [vmem:[%s2358_s17 + $0x20] sm:$0xff] }
 0x1dd   : > { %v1161_v55 = vadd.f32 %v1122_v34, %v1121_v33  ;;  %v1140_v5 = vadd.f32 %v1108_v22, %v1107_v30  ;;  %vm4456_vm9 = vcmp.ne.s32.totalorder %v4455_v58, %v2661_v6  ;;  %vm4457_vm2 = vcmp.ne.s32.totalorder %v4455_v58, %v4447_v37  ;;  %v2121_v1 = vpop.eup %2120  ;;  %v4459_v33 = vld [vmem:[#allocation67_spill] sm:$0xff]  ;;  %v4462_v30 = vld [vmem:[#allocation6_spill] sm:$0xff]  ;;  %v4463_v22 = vld [vmem:[#allocation5_spill] sm:$0xff] }
 0x1de   : > { %v1123_v44 = vsel %vm4456_vm9, %v2107_v32, 0.0  ;;  %v1124_v46 = vsel %vm4457_vm2, %v2105_v10, 0.0  ;;  %2134 = vpow2.f32 %v1055_v20  ;;  %v3642_v29 = vsub.f32 %v2250_v36, %v712_v13  ;;  %v4460_v32 = vld [vmem:[#allocation69_spill] sm:$0xff]  ;;  %v4461_v34 = vld [vmem:[#allocation71_spill] sm:$0xff]  ;;  %v2123_v10 = vpop.eup %2122 }
 0x1df   : > { %v1164_v59 = vadd.f32 %v1124_v46, %v1123_v44  ;;  %v3645_v17 = vsub.f32 %v2251_v19, %v713_v54  ;;  %v748_v60 = vsub.f32 %v4458_v61, %v712_v13  ;;  %v749_v7 = vsub.f32 %v4459_v33, %v712_v13  ;;  %v4464_v44 = vld [vmem:[#allocation11_spill] sm:$0xff]  ;;  %v2125_v36 = vpop.eup %2124  ;;  %v4465_v61 = vld [vmem:[#allocation21_spill] sm:$0xff]  ;;  %v4467_v33 = vld [vmem:[#allocation22_spill] sm:$0xff] }
 0x1e0   : > { %v750_v16 = vsub.f32 %v4460_v32, %v713_v54  ;;  %v751_v38 = vsub.f32 %v4461_v34, %v713_v54  ;;  %v3653_v20 = vmax.f32 %v4462_v30, %v3532_v56  ;;  %v3656_v58 = vmax.f32 %v4463_v22, %v680_v40  ;;  %1091 = vadd.xlane.f32.xlu1 %v3553_v48  ;;  %v4469_v34 = vld [vmem:[#allocation26_spill] sm:$0xff]  ;;  %v4471_v30 = vld [vmem:[#allocation28_spill] sm:$0xff] }
 0x1e1   : > { %v3659_v46 = vmax.f32 %v4464_v44, %v704_v57  ;;  %2136 = vpow2.f32 %v1071_v42  ;;  %1162 = vadd.xlane.f32.xlu0 %v1161_v55  ;;  %v1025_v13 = vmul.f32 1.442695, %v748_v60  ;;  %v1027_v19 = vmul.f32 1.442695, %v749_v7  ;;  %v3666_v32 = vpop.eup %2126  ;;  %v4473_v44 = vld [vmem:[#allocation66_spill] sm:$0xff] }
 0x1e2   : > { %vm4466_vm3 = vnez %v4465_v61  ;;  %vm4468_vm0 = vnez %v4467_v33  ;;  %v1445_v40 = vsel %vm965_vm13, %v3642_v29, 0.0  ;;  %v1446_v48 = vsel %vm966_vm7, %v3645_v17, 0.0  ;;  %v3676_v57 = vpop.eup %2128 }
 0x1e3   : > { %v1497_v54 = vsel %vm4466_vm3, %v748_v60, 0.0  ;;  %v1498_v56 = vsel %vm4468_vm0, %v749_v7, 0.0  ;;  %v1029_v55 = vmul.f32 1.442695, %v750_v16  ;;  %v1031_v60 = vmul.f32 1.442695, %v751_v38 }
 0x1e4   : > { %v1533_v42 = vadd.f32 %v1498_v56, %v1497_v54  ;;  %vm4470_vm4 = vnez %v4469_v34  ;;  %vm4472_vm10 = vnez %v4471_v30  ;;  %v764_v52 = vsub.f32 %v4473_v44, %v3598_v26  ;;  %v4475_v54 = vld [vmem:[#allocation70_spill] sm:$0xff]  ;;  %1141 = vadd.xlane.f32.xlu1 %v1140_v5  ;;  %v4478_v30 = vld [vmem:[#allocation72_spill] sm:$0xff] }
 0x1e5   : > { %v1499_v7 = vsel %vm4470_vm4, %v750_v16, 0.0  ;;  %v1500_v22 = vsel %vm4472_vm10, %v751_v38, 0.0  ;;  %2138 = vpow2.f32 %v1025_v13  ;;  %v765_v33 = vsub.f32 %v4474_v43, %v3598_v26  ;;  %1075 = vadd.xlane.f32.xlu0 %v3542_v0  ;;  %v4476_v16 = vld [vmem:[#allocation56_spill] sm:$0xff]  ;;  %v2131_v13 = vpop.eup %2130 }
 0x1e6   : > { %v3684_v61 = vadd.f32 %v1500_v22, %v1499_v7  ;;  %v766_v56 = vsub.f32 %v4475_v54, %v3653_v20  ;;  %2140 = vpow2.f32 %v1027_v19  ;;  %vm4477_vm12 = vnez %v4476_v16  ;;  %v4479_v22 = vld [vmem:[#allocation57_spill] sm:$0xff]  ;;  %v3697_v25 = vpop.eup %2132  ;;  %v4481_v19 = vld [vmem:[#allocation48_spill] sm:$0xff] }
 0x1e7   : > { %v1513_v34 = vsel %vm4477_vm12, %v764_v52, 0.0  ;;  %v1057_v38 = vmul.f32 1.442695, %v764_v52  ;;  %v767_v44 = vsub.f32 %v4478_v30, %v3653_v20  ;;  %2142 = vpow2.f32 %v1029_v55  ;;  %v4483_v52 = vld [vmem:[#allocation49_spill] sm:$0xff]  ;;  %v4485_v55 = vld [vmem:[#allocation12_spill] sm:$0xff] }
 0x1e8   : > { %v1059_v7 = vmul.f32 1.442695, %v765_v33  ;;  %vm4480_vm15 = vnez %v4479_v22  ;;  %v1061_v3 = vmul.f32 1.442695, %v766_v56  ;;  %2144 = vpow2.f32 %v1031_v60  ;;  %v2135_v16 = vpop.eup %2134  ;;  %1165 = vadd.xlane.f32.xlu1 %v1164_v59 }
 0x1e9   : > { %v1514_v43 = vsel %vm4480_vm15, %v765_v33, 0.0  ;;  %v1063_v0 = vmul.f32 1.442695, %v767_v44  ;;  %vm4482_vm13 = vnez %v4481_v19  ;;  %vm4484_vm7 = vnez %v4483_v52  ;;  %1465 = vadd.xlane.f32.xlu0 %v1445_v40 }
 0x1ea   : > { %v1557_v5 = vadd.f32 %v1514_v43, %v1513_v34  ;;  %v1515_v54 = vsel %vm4482_vm13, %v766_v56, 0.0  ;;  %2146 = vpow2.f32 %v1059_v7  ;;  %v1516_v30 = vsel %vm4484_vm7, %v767_v44, 0.0  ;;  %v4488_v34 = vld [vmem:[#allocation14_spill] sm:$0xff] }
 0x1eb   : > { %vm4486_vm1 = vcmp.ne.s32.totalorder %v4485_v55, %v2661_v6  ;;  %vm4487_vm6 = vcmp.ne.s32.totalorder %v4485_v55, %v4447_v37  ;;  %2148 = vpow2.f32 %v1057_v38  ;;  %v1560_v33 = vadd.f32 %v1516_v30, %v1515_v54  ;;  %v3716_v7 = vpop.eup %2136  ;;  %v4491_v43 = vld [vmem:[#allocation38_spill] sm:$0xff]  ;;  %v4494_v38 = vld [vmem:[#allocation31_spill] sm:$0xff] }
 0x1ec   : > { %v1109_v22 = vsel %vm4486_vm1, %v3616_v12, 0.0  ;;  %v1110_v60 = vsel %vm4487_vm6, %v3622_v27, 0.0  ;;  %vm4489_vm8 = vcmp.ne.s32.totalorder %v4488_v34, %v2661_v6  ;;  %2150 = vpow2.f32 %v1061_v3  ;;  %1467 = vadd.xlane.f32.xlu1 %v1446_v48 }
 0x1ed   : > { %v3711_v56 = vadd.f32 %v1110_v60, %v1109_v22  ;;  %v1111_v44 = vsel %vm4489_vm8, %v2123_v10, 0.0  ;;  %vm4490_vm5 = vcmp.ne.s32.totalorder %v4488_v34, %v4447_v37  ;;  %vm4492_vm11 = vcmp.ne.s32.totalorder %v4491_v43, %v2661_v6  ;;  %1534 = vadd.xlane.f32.xlu0 %v1533_v42  ;;  %v4502_v22 = vld [vmem:[#allocation32_spill] sm:$0xff] }
 0x1ee   : > { %v1112_v12 = vsel %vm4490_vm5, %v2125_v36, 0.0  ;;  %v1125_v27 = vsel %vm4492_vm11, %v2121_v1, 0.0  ;;  %vm4493_vm14 = vcmp.ne.s32.totalorder %v4491_v43, %v4447_v37  ;;  %2152 = vpow2.f32 %v1063_v0  ;;  %v4506_v43 = vld [vmem:[#allocation59_spill] sm:$0xff] }
 0x1ef   : > { %v1126_v59 = vsel %vm4493_vm14, %v3639_v21, 0.0  ;;  %v3728_v40 = vadd.f32 %v1112_v12, %v1111_v44  ;;  %vm4495_vm9 = vcmp.ne.s32.totalorder %v4494_v38, %v2661_v6  ;;  %vm4496_vm2 = vcmp.ne.s32.totalorder %v4494_v38, %v4447_v37  ;;  %v4497_v21 = vld [vmem:[#allocation39_spill] sm:$0xff]  ;;  %v2139_v55 = vpop.eup %2138 }
 0x1f0   : > { %v3730_v10 = vadd.f32 %v1126_v59, %v1125_v27  ;;  %v1127_v3 = vsel %vm4495_vm9, %v2131_v13, 0.0  ;;  %v1128_v36 = vsel %vm4496_vm2, %v2135_v16, 0.0  ;;  %v752_v1 = vsub.f32 %v3315_v63, %v3656_v58  ;;  %v4499_v13 = vld [vmem:[#allocation40_spill] sm:$0xff]  ;;  %v4501_v63 = vld [vmem:[#allocation73_spill] sm:$0xff]  ;;  %v2141_v34 = vpop.eup %2140  ;;  %1537 = vadd.xlane.f32.xlu1 %v3684_v61 }
 0x1f1   : > { %v753_v19 = vsub.f32 %v3319_v41, %v3656_v58  ;;  %vm4498_vm3 = vnez %v4497_v21  ;;  %v3745_v54 = vadd.f32 %v1128_v36, %v1127_v3  ;;  %vm4500_vm0 = vnez %v4499_v13  ;;  %v2143_v27 = vpop.eup %2142  ;;  %v4508_v59 = vld [vmem:[#allocation60_spill] sm:$0xff]  ;;  %v4510_v36 = vld [vmem:[#allocation54_spill] sm:$0xff]  ;;  %1558 = vadd.xlane.f32.xlu0 %v1557_v5 }
 0x1f2   : > { %v1503_v0 = vsel %vm4498_vm3, %v3557_v14, 0.0  ;;  %v1504_v52 = vsel %vm4500_vm0, %v3561_v47, 0.0  ;;  %v768_v16 = vsub.f32 %v3317_v31, %v3659_v46  ;;  %v769_v30 = vsub.f32 %v4501_v63, %v3659_v46  ;;  %v4504_v14 = vld [vmem:[#allocation34_spill] sm:$0xff] }
 0x1f3   : > { %v1035_v41 = vmul.f32 1.442695, %v753_v19  ;;  %vm4503_vm4 = vnez %v4502_v22  ;;  %vm4505_vm10 = vnez %v4504_v14  ;;  %v1033_v42 = vmul.f32 1.442695, %v752_v1 }
 0x1f4   : > { %v1501_v60 = vsel %vm4503_vm4, %v752_v1, 0.0  ;;  %v1502_v48 = vsel %vm4505_vm10, %v753_v19, 0.0  ;;  %v3760_v12 = vadd.f32 %v1504_v52, %v1503_v0  ;;  %v1067_v47 = vmul.f32 1.442695, %v769_v30  ;;  %v2145_v1 = vpop.eup %2144  ;;  %v4512_v0 = vld [vmem:[#allocation55_spill] sm:$0xff]  ;;  %1561 = vadd.xlane.f32.xlu1 %v1560_v33 }
 0x1f5   : > { %v3758_v44 = vadd.f32 %v1502_v48, %v1501_v60  ;;  %vm4507_vm12 = vnez %v4506_v43  ;;  %2154 = vpow2.f32 %v1035_v41  ;;  %vm4509_vm15 = vnez %v4508_v59  ;;  %v4514_v52 = vld [vmem:[#allocation15_spill] sm:$0xff]  ;;  %v4517_v41 = vld [vmem:[#allocation18_spill] sm:$0xff]  ;;  %1077 = vadd.xlane.f32.xlu0 %v3587_v62  ;;  %v4526_v59 = vld [vmem:[#allocation37_spill] sm:$0xff] }
 0x1f6   : > { %v1517_v31 = vsel %vm4507_vm12, %v768_v16, 0.0  ;;  %v1518_v38 = vsel %vm4509_vm15, %v769_v30, 0.0  ;;  %v1065_v3 = vmul.f32 1.442695, %v768_v16  ;;  %vm4511_vm13 = vnez %v4510_v36  ;;  %v2147_v30 = vpop.eup %2146 }
 0x1f7   : > { %v1519_v19 = vsel %vm4511_vm13, %v3581_v50, 0.0  ;;  %2156 = vpow2.f32 %v1033_v42  ;;  %v1563_v21 = vadd.f32 %v1518_v38, %v1517_v31  ;;  %vm4513_vm7 = vnez %v4512_v0  ;;  %v2149_v5 = vpop.eup %2148 }
 0x1f8   : > { %v1520_v13 = vsel %vm4513_vm7, %v3585_v39, 0.0  ;;  %vm4515_vm1 = vcmp.ne.s32.totalorder %v4514_v52, %v2661_v6  ;;  %2158 = vpow2.f32 %v1067_v47  ;;  %vm4516_vm6 = vcmp.ne.s32.totalorder %v4514_v52, %v4447_v37  ;;  %v2151_v14 = vpop.eup %2150  ;;  %1079 = vadd.xlane.f32.xlu1 %v3631_v53  ;;  %v4535_v53 = vld [vmem:[#allocation52_spill] sm:$0xff] }
 0x1f9   : > { %v1113_v63 = vsel %vm4515_vm1, %v2139_v55, 0.0  ;;  %v1566_v16 = vadd.f32 %v1520_v13, %v1519_v19  ;;  %v1114_v50 = vsel %vm4516_vm6, %v2141_v34, 0.0  ;;  %vm4518_vm8 = vcmp.ne.s32.totalorder %v4517_v41, %v2661_v6  ;;  %v4520_v55 = vld [vmem:[#allocation46_spill] sm:$0xff]  ;;  %v4523_v34 = vld [vmem:[#allocation29_spill] sm:$0xff]  ;;  %v2153_v31 = vpop.eup %2152  ;;  %1093 = vadd.xlane.f32.xlu0 %v3568_v28  ;;  %v4532_v13 = vld [vmem:[#allocation23_spill] sm:$0xff] }
 0x1fa   : > { %v1115_v61 = vsel %vm4518_vm8, %v2143_v27, 0.0  ;;  %2160 = vpow2.f32 %v1065_v3  ;;  %v3782_v22 = vadd.f32 %v1114_v50, %v1113_v63  ;;  %vm4519_vm5 = vcmp.ne.s32.totalorder %v4517_v41, %v4447_v37 }
 0x1fb   : > { %v1116_v39 = vsel %vm4519_vm5, %v2145_v1, 0.0  ;;  %vm4521_vm11 = vcmp.ne.s32.totalorder %v4520_v55, %v4447_v37  ;;  %vm4522_vm14 = vcmp.ne.s32.totalorder %v4520_v55, %v2661_v6  ;;  %vm4524_vm9 = vcmp.ne.s32.totalorder %v4523_v34, %v2661_v6  ;;  %v2255_v55 = vld [vmem:[%s2358_s17 + $0x38] sm:$0xff] }
 0x1fc   : > { %v1130_v60 = vsel %vm4521_vm11, %v2147_v30, 0.0  ;;  %v3790_v48 = vadd.f32 %v1116_v39, %v1115_v61  ;;  %v1129_v42 = vsel %vm4522_vm14, %v2149_v5, 0.0  ;;  %v1119_v47 = vsel %vm4524_vm9, %v3666_v32, 0.0  ;;  %v4528_v32 = vld [vmem:[#allocation41_spill] sm:$0xff]  ;;  %v2252_v30 = vld [vmem:[%s2358_s17 + $0x60] sm:$0xff]  ;;  %1095 = vadd.xlane.f32.xlu1 %v3605_v15  ;;  %v2253_v15 = vld [vmem:[%s2358_s17 + $0x68] sm:$0xff] }
 0x1fd   : > { %vm4525_vm2 = vcmp.ne.s32.totalorder %v4523_v34, %v4447_v37  ;;  %v3804_v27 = vadd.f32 %v1130_v60, %v1129_v42  ;;  %vm4527_vm3 = vcmp.ne.s32.totalorder %v4526_v59, %v2661_v6  ;;  %vm4529_vm0 = vcmp.ne.s32.totalorder %v4528_v32, %v2661_v6  ;;  %1144 = vadd.xlane.f32.xlu0 %v3711_v56  ;;  %v2256_v60 = vld [vmem:[%s2358_s17 + $0x70] sm:$0xff] }
 0x1fe   : > { %v1120_v43 = vsel %vm4525_vm2, %v3676_v57, 0.0  ;;  %v1131_v38 = vsel %vm4527_vm3, %v2151_v14, 0.0  ;;  %v1135_v36 = vsel %vm4529_vm0, %v3697_v25, 0.0  ;;  %vm4530_vm4 = vcmp.ne.s32.totalorder %v4526_v59, %v4447_v37 }
 0x1ff   : > { %v3809_v3 = vadd.f32 %v1120_v43, %v1119_v47  ;;  %v1132_v57 = vsel %vm4530_vm4, %v2153_v31, 0.0  ;;  %vm4531_vm10 = vcmp.ne.s32.totalorder %v4528_v32, %v4447_v37  ;;  %v2155_v1 = vpop.eup %2154  ;;  %vm4533_vm12 = vcmp.ne.s32.totalorder %v4532_v13, %v4447_v37  ;;  %v4539_v31 = vld [vmem:[#allocation35_spill] sm:$0xff] }
 0x200   : > { %v1136_v62 = vsel %vm4531_vm10, %v3716_v7, 0.0  ;;  %v1176_v33 = vadd.f32 %v1132_v57, %v1131_v38  ;;  %v1118_v25 = vsel %vm4533_vm12, %v2155_v1, 0.0  ;;  %vm4534_vm15 = vcmp.ne.s32.totalorder %v4532_v13, %v2661_v6  ;;  %1147 = vadd.xlane.f32.xlu1 %v3728_v40  ;;  %v2254_v40 = vld [vmem:[%s2358_s17 + $0x30] sm:$0xff]  ;;  %v4542_v32 = vld [vmem:[#allocation47_spill] sm:$0xff]  ;;  %v4547_v13 = vld [vmem:[#allocation45_spill] sm:$0xff] }
 0x201   : > { %v3822_v19 = vadd.f32 %v1136_v62, %v1135_v36  ;;  %v2157_v0 = vpop.eup %2156  ;;  %v3834_v50 = vsub.f32 %v2252_v30, %v3598_v26  ;;  %vm4536_vm13 = vcmp.ne.s32.totalorder %v4535_v53, %v4447_v37  ;;  %v985_v61 = vmul.f32 1.442695, %v3642_v29  ;;  %1168 = vadd.xlane.f32.xlu0 %v3730_v10  ;;  %v4543_v62 = vld [vmem:[#allocation27_spill] sm:$0xff]  ;;  %v4545_v1 = vld [vmem:[#allocation36_spill] sm:$0xff] }
 0x202   : > { %v2159_v52 = vpop.eup %2158  ;;  %v1117_v63 = vsel %vm4534_vm15, %v2157_v0, 0.0  ;;  %vm4537_vm7 = vcmp.ne.s32.totalorder %v4535_v53, %v2661_v6  ;;  %v3850_v56 = vsub.f32 %v2253_v15, %v3653_v20  ;;  %v987_v37 = vmul.f32 1.442695, %v3645_v17 }
 0x203   : > { %v1155_v28 = vadd.f32 %v1118_v25, %v1117_v63  ;;  %v1134_v41 = vsel %vm4536_vm13, %v2159_v52, 0.0  ;;  %v1001_v26 = vmul.f32 1.442695, %v3834_v50  ;;  %2162 = vpow2.f32 %v985_v61 }
 0x204   : > { %v2161_v7 = vpop.eup %2160  ;;  %1171 = vadd.xlane.f32.xlu1 %v3745_v54  ;;  %v1003_v29 = vmul.f32 1.442695, %v3850_v56  ;;  %v730_v20 = vsub.f32 %v2254_v40, %v3656_v58  ;;  %v731_v17 = vsub.f32 %v2255_v55, %v3551_v24  ;;  %vm968_vm6 = vcmp.eq.s32.totalorder %v2661_v6, %v4539_v31 }
 0x205   : > { %v1133_v5 = vsel %vm4537_vm7, %v2161_v7, 0.0  ;;  %2164 = vpow2.f32 %v1001_v26  ;;  %1540 = vadd.xlane.f32.xlu0 %v3758_v44  ;;  %v738_v44 = vsub.f32 %v2256_v60, %v3659_v46  ;;  %vm971_vm11 = vcmp.eq.s32.totalorder %v2661_v6, %v4542_v32 }
 0x206   : > { %v1179_v39 = vadd.f32 %v1134_v41, %v1133_v5  ;;  %2166 = vpow2.f32 %v987_v37  ;;  %v989_v54 = vmul.f32 1.442695, %v730_v20  ;;  %v991_v34 = vmul.f32 1.442695, %v731_v17 }
 0x207   : > { %2168 = vpow2.f32 %v1003_v29  ;;  %v1448_v59 = vsel %vm968_vm6, %v731_v17, 0.0  ;;  %v1451_v57 = vsel %vm971_vm11, %v3500_v35, 0.0  ;;  %vm972_vm14 = vcmp.eq.s32.totalorder %v2661_v6, %v4543_v62 }
 0x208   : > { %1543 = vadd.xlane.f32.xlu1 %v3760_v12  ;;  %2170 = vpow2.f32 %v989_v54  ;;  %v1005_v12 = vmul.f32 1.442695, %v738_v44  ;;  %vm974_vm2 = vcmp.eq.s32.totalorder %v2661_v6, %v4545_v1  ;;  %vm976_vm0 = vcmp.eq.s32.totalorder %v2661_v6, %v4547_v13 }
 0x209   : > { %1564 = vadd.xlane.f32.xlu0 %v1563_v21  ;;  %v2257_v21 = vld [vmem:[%s2358_s17 + $0x78] sm:$0xff]  ;;  %2172 = vpow2.f32 %v991_v34  ;;  %v1454_v35 = vsel %vm974_vm2, %v3850_v56, 0.0  ;;  %vm1745_vm4 = vcmask 7168  }
 0x20a   : > { %v739_v58 = vsub.f32 %v2257_v21, %v3572_v49  ;;  %2174 = vpow2.f32 %v1005_v12 }
 0x20c   : > { %1567 = vadd.xlane.f32.xlu1 %v1566_v16  ;;  %v1007_v24 = vmul.f32 1.442695, %v739_v58  ;;  %v1456_v25 = vsel %vm976_vm0, %v739_v58, 0.0 }
 0x20d   : > { %v2163_v10 = vpop.eup %2162 }
 0x20e   : > { %1081 = vadd.xlane.f32.xlu0 %v2163_v10  ;;  %2176 = vpow2.f32 %v1007_v24  ;;  %v4548_v10 = vld [vmem:[#allocation77_spill] sm:$0xff] }
 0x20f   : > { %v2165_v14 = vpop.eup %2164  ;;  %v1665_v55 = vadd.f32 1e-12, %v4548_v10 }
 0x210   : > { %v2167_v42 = vpop.eup %2166 }
 0x211   : > { %1083 = vadd.xlane.f32.xlu1 %v2167_v42  ;;  %v2169_v47 = vpop.eup %2168 }
 0x212   : > { %1097 = vadd.xlane.f32.xlu0 %v2165_v14  ;;  %v2171_v46 = vpop.eup %2170 }
 0x213   : > { %v2173_v16 = vpop.eup %2172 }
 0x214   : > { %v2175_v43 = vpop.eup %2174 }
 0x215   : > { %1099 = vadd.xlane.f32.xlu1 %v2169_v47  ;;  %v4549_v47 = vld [vmem:[#allocation75_spill] sm:$0xff] }
 0x216   : > { %1150 = vadd.xlane.f32.xlu0 %v3782_v22  ;;  %v4538_v22 = vld [vmem:[#allocation30_spill] sm:$0xff]  ;;  %v1666_v24 = vadd.f32 1e-12, %v4549_v47 }
 0x217   : > { %vm967_vm1 = vcmp.eq.s32.totalorder %v2661_v6, %v4538_v22 }
 0x218   : > { %v2177_v49 = vpop.eup %2176 }
 0x219   : > { %1153 = vadd.xlane.f32.xlu1 %v3790_v48  ;;  %v1447_v48 = vsel %vm967_vm1, %v730_v20, 0.0 }
 0x21a   : > { %1174 = vadd.xlane.f32.xlu0 %v3804_v27  ;;  %v4540_v27 = vld [vmem:[#allocation42_spill] sm:$0xff] }
 0x21b   : > { %vm969_vm8 = vcmp.eq.s32.totalorder %v2661_v6, %v4540_v27 }
 0x21c   : > { %v1449_v38 = vsel %vm969_vm8, %v3474_v45, 0.0  ;;  %v1452_v45 = vsel %vm972_vm14, %v3522_v2, 0.0 }
 0x21d   : > { %1177 = vadd.xlane.f32.xlu1 %v1176_v33  ;;  %v4544_v33 = vld [vmem:[#allocation53_spill] sm:$0xff] }
 0x21e   : > { %1085 = vadd.xlane.f32.xlu0 %v2171_v46  ;;  %vm973_vm9 = vcmp.eq.s32.totalorder %v2661_v6, %v4544_v33 }
 0x221   : > { %1087 = vadd.xlane.f32.xlu1 %v2173_v16 }
 0x222   : > { %1101 = vadd.xlane.f32.xlu0 %v2175_v43 }
 0x225   : > { %1103 = vadd.xlane.f32.xlu1 %v2177_v49 }
 0x226   : > { %1156 = vadd.xlane.f32.xlu0 %v1155_v28 }
 0x229   : > { %1159 = vadd.xlane.f32.xlu1 %v3809_v3  ;;  %v4541_v3 = vld [vmem:[#allocation20_spill] sm:$0xff] }
 0x22a   : > { %1180 = vadd.xlane.f32.xlu0 %v1179_v39  ;;  %vm970_vm5 = vcmp.eq.s32.totalorder %v2661_v6, %v4541_v3 }
 0x22b   : > { %v1450_v36 = vsel %vm970_vm5, %v3493_v51, 0.0  ;;  %v4546_v51 = vld [vmem:[#allocation58_spill] sm:$0xff] }
 0x22c   : > { %vm975_vm3 = vcmp.eq.s32.totalorder %v2661_v6, %v4546_v51 }
 0x22d   : > { %1183 = vadd.xlane.f32.xlu1 %v3822_v19  ;;  %v1453_v19 = vsel %vm973_vm9, %v3834_v50, 0.0  ;;  %v1455_v0 = vsel %vm975_vm3, %v738_v44, 0.0 }
 0x22e   : > { %1469 = vadd.xlane.f32.xlu0 %v1447_v48 }
 0x231   : > { %1471 = vadd.xlane.f32.xlu1 %v1448_v59 }
 0x232   : > { %1473 = vadd.xlane.f32.xlu0 %v1449_v38 }
 0x235   : > { %1475 = vadd.xlane.f32.xlu1 %v1450_v36 }
 0x236   : > { %1477 = vadd.xlane.f32.xlu0 %v1451_v57 }
 0x239   : > { %1479 = vadd.xlane.f32.xlu1 %v1452_v45 }
 0x23a   : > { %1481 = vadd.xlane.f32.xlu0 %v1453_v19 }
 0x23d   : > { %1483 = vadd.xlane.f32.xlu1 %v1454_v35 }
 0x23e   : > { %1485 = vadd.xlane.f32.xlu0 %v1455_v0  ;;  %v4550_v0 = vld [vmem:[#allocation76_spill] sm:$0xff] }
 0x241   : > { %1487 = vadd.xlane.f32.xlu1 %v1456_v25 }
 0x247   : > { %v1458_v2 = vpop.xlane.xlu0 %1457 }
 0x24b   : > { %v1460_v52 = vpop.xlane.xlu1 %1459  ;;  %v1523_v63 = vpop.xlane.xlu0 %1522 }
 0x24c   : > { %v1601_v21 = vmul.f32 0.05, %v1523_v63 }
 0x24e   : > { %v1617_v22 = vadd.f32 %v1601_v21, %v1458_v2 }
 0x24f   : > { %v1526_v7 = vpop.xlane.xlu1 %1525 }
 0x250   : > { %v1602_v36 = vmul.f32 0.05, %v1526_v7 }
 0x251   : > { %v3896_v30 = vpop.xlane.xlu0 %1546 }
 0x252   : > { %v1618_v35 = vadd.f32 %v1602_v36, %v1460_v52 }
 0x255   : > { %v3898_v50 = vpop.xlane.xlu1 %1549  ;;  %v3900_v28 = vpop.xlane.xlu0 %1461 }
 0x259   : > { %v1074_v53 = vpop.xlane.xlu1 %1073  ;;  %v3902_v41 = vpop.xlane.xlu0 %1528 }
 0x25d   : > { %v3904_v61 = vpop.xlane.xlu1 %1463  ;;  %v3906_v5 = vpop.xlane.xlu0 %1552 }
 0x261   : > { %v3908_v6 = vpop.xlane.xlu1 %1531  ;;  %v1090_v39 = vpop.xlane.xlu0 %1089 }
 0x269   : > { %v3910_v26 = vpop.xlane.xlu1 %1555  ;;  %v1139_v15 = vpop.xlane.xlu0 %1138 }
 0x26a   : > { %v1185_v56 = vadd.f32 %v1139_v15, %v1074_v53 }
 0x26c   : > { %v1201_v37 = vadd.f32 1e-12, %v1185_v56 }
 0x26d   : > { %v1092_v29 = vpop.xlane.xlu1 %1091 }
 0x26e   : > { %v1163_v40 = vpop.xlane.xlu0 %1162  ;;  %2178 = vlog2.f32 %v1201_v37 }
 0x26f   : > { %v1193_v20 = vadd.f32 %v1163_v40, %v1090_v39 }
 0x271   : > { %v1209_v17 = vadd.f32 1e-12, %v1193_v20  ;;  %v1142_v54 = vpop.xlane.xlu1 %1141 }
 0x272   : > { %v1076_v60 = vpop.xlane.xlu0 %1075 }
 0x273   : > { %2180 = vlog2.f32 %v1209_v17  ;;  %v1186_v44 = vadd.f32 %v1142_v54, %v1076_v60 }
 0x274   : > { %2182 = vrcp.f32 %v1665_v55 }
 0x275   : > { %v1202_v14 = vadd.f32 1e-12, %v1186_v44  ;;  %v1166_v42 = vpop.xlane.xlu1 %1165 }
 0x276   : > { %v3913_v34 = vpop.xlane.xlu0 %1465  ;;  %v1194_v12 = vadd.f32 %v1166_v42, %v1092_v29 }
 0x277   : > { %2184 = vlog2.f32 %v1202_v14  ;;  %v1667_v14 = vadd.f32 1e-12, %v3373_v9 }
 0x278   : > { %v2179_v58 = vpop.eup %2178  ;;  %v1210_v46 = vadd.f32 1e-12, %v1194_v12 }
 0x279   : > { %v1218_v16 = vmul.f32 0.6931472, %v2179_v58  ;;  %v3916_v43 = vpop.xlane.xlu1 %1467  ;;  %v1668_v58 = vadd.f32 1e-12, %v3370_v4 }
 0x27a   : > { %v3918_v49 = vpop.xlane.xlu0 %1534  ;;  %2186 = vlog2.f32 %v1210_v46  ;;  %v1603_v46 = vmul.f32 0.05, %v3902_v41 }
 0x27b   : > { %v1633_v48 = vmul.f32 %v4548_v10, %v1218_v16  ;;  %2188 = vrcp.f32 %v1666_v24  ;;  %v4551_v10 = vld [vmem:[#allocation74_spill] sm:$0xff] }
 0x27d   : > { %v2181_v31 = vpop.eup %2180  ;;  %v1649_v27 = vsub.f32 %v1617_v22, %v1633_v48  ;;  %v3921_v38 = vpop.xlane.xlu1 %1537 }
 0x27e   : > { %v1234_v59 = vmul.f32 0.6931472, %v2181_v31  ;;  %v3923_v3 = vpop.xlane.xlu0 %1558  ;;  %v2183_v32 = vpop.eup %2182 }
 0x27f   : > { %v1682_v57 = vmul.f32 %v2183_v32, %v1649_v27  ;;  %v1619_v27 = vadd.f32 %v1603_v46, %v3900_v28 }
 0x280   : > { %v3926_v62 = vmul.f32 %v3422_v18, %v1234_v59  ;;  %v1604_v59 = vmul.f32 0.05, %v3908_v6 }
 0x281   : > { %v2185_v33 = vpop.eup %2184  ;;  %v1713_v45 = vmul.f32 -1.0, %v1682_v57  ;;  %v3928_v1 = vpop.xlane.xlu1 %1561 }
 0x282   : > { %v1220_v19 = vmul.f32 0.6931472, %v2185_v33  ;;  %v1078_v51 = vpop.xlane.xlu0 %1077  ;;  %v1620_v41 = vadd.f32 %v1604_v59, %v3904_v61  ;;  %v4556_v59 = vld [vmem:[#allocation90_spill] sm:$0xff] }
 0x283   : > { %v1729_v13 = vmul.f32 %v4550_v0, %v1713_v45 }
 0x284   : > { %v1634_v25 = vmul.f32 %v4549_v47, %v1220_v19  ;;  %v2187_v2 = vpop.eup %2186 }
 0x285   : > { %1746 = vst.msk [vmem:[%s3934_s27] sm:$0xff] %vm1745_vm4, %v1729_v13  ;;  %v1236_v7 = vmul.f32 0.6931472, %v2187_v2  ;;  %v1080_v53 = vpop.xlane.xlu1 %1079  ;;  %v2189_v15 = vpop.eup %2188 }
 0x286   : > { %v1650_v63 = vsub.f32 %v1618_v35, %v1634_v25  ;;  %v3940_v39 = vpop.xlane.xlu0 %1093 }
 0x287   : > { %v3943_v37 = vmul.f32 %v3425_v23, %v1236_v7 }
 0x288   : > { %v1684_v56 = vmul.f32 %v2189_v15, %v1650_v63  ;;  %v1669_v15 = vadd.f32 1e-12, %v3381_v8 }
 0x289   : > { %v3945_v52 = vpop.xlane.xlu1 %1095 }
 0x28a   : > { %v1714_v29 = vmul.f32 -1.0, %v1684_v56  ;;  %v1145_v40 = vpop.xlane.xlu0 %1144 }
 0x28b   : > { %v1187_v20 = vadd.f32 %v1145_v40, %v1078_v51  ;;  %v4552_v40 = vld [vmem:[#allocation81_spill] sm:$0xff] }
 0x28c   : > { %v1730_v55 = vmul.f32 %v4551_v10, %v1714_v29  ;;  %v4553_v10 = vld [vmem:[#allocation78_spill] sm:$0xff] }
 0x28d   : > { %v1203_v17 = vadd.f32 1e-12, %v1187_v20  ;;  %v1148_v54 = vpop.xlane.xlu1 %1147  ;;  %v1670_v20 = vadd.f32 1e-12, %v4552_v40 }
 0x28e   : > { %1747 = vst.msk [vmem:[%s3934_s27 + $0x8] sm:$0xff] %vm1745_vm4, %v1730_v55  ;;  %v1169_v60 = vpop.xlane.xlu0 %1168  ;;  %v1188_v44 = vadd.f32 %v1148_v54, %v1080_v53 }
 0x28f   : > { %2190 = vlog2.f32 %v1203_v17  ;;  %v4554_v17 = vld [vmem:[#allocation83_spill] sm:$0xff] }
 0x290   : > { %v1204_v42 = vadd.f32 1e-12, %v1188_v44  ;;  %v1671_v54 = vadd.f32 1e-12, %v4554_v17  ;;  %v4555_v44 = vld [vmem:[#allocation85_spill] sm:$0xff] }
 0x291   : > { %v1172_v12 = vpop.xlane.xlu1 %1171 }
 0x292   : > { %v3951_v21 = vpop.xlane.xlu0 %1540  ;;  %2192 = vlog2.f32 %v1204_v42  ;;  %v1195_v42 = vadd.f32 %v1169_v60, %v3940_v39 }
 0x293   : > { %2194 = vrcp.f32 %v1667_v14  ;;  %v1672_v14 = vadd.f32 1e-12, %v4555_v44 }
 0x294   : > { %2196 = vrcp.f32 %v1668_v58 }
 0x295   : > { %v3954_v47 = vpop.xlane.xlu1 %1543 }
 0x296   : > { %v3956_v24 = vpop.xlane.xlu0 %1564 }
 0x299   : > { %v2191_v16 = vpop.eup %2190  ;;  %v3959_v48 = vpop.xlane.xlu1 %1567 }
 0x29a   : > { %v1222_v22 = vmul.f32 0.6931472, %v2191_v16  ;;  %v1673_v16 = vadd.f32 1e-12, %v3422_v18  ;;  %v1605_v18 = vmul.f32 0.05, %v3918_v49 }
 0x29b   : > { %v1082_v31 = vpop.xlane.xlu0 %1081  ;;  %v1606_v49 = vmul.f32 0.05, %v3921_v38 }
 0x29c   : > { %v1635_v32 = vmul.f32 %v3373_v9, %v1222_v22  ;;  %v2193_v36 = vpop.eup %2192  ;;  %v1196_v22 = vadd.f32 %v1172_v12, %v3945_v52 }
 0x29d   : > { %v1224_v33 = vmul.f32 0.6931472, %v2193_v36  ;;  %v2195_v51 = vpop.eup %2194 }
 0x29e   : > { %v1651_v57 = vsub.f32 %v1619_v27, %v1635_v32  ;;  %v1084_v45 = vpop.xlane.xlu1 %1083  ;;  %v2197_v63 = vpop.eup %2196  ;;  %v1674_v27 = vadd.f32 1e-12, %v3425_v23  ;;  %v1675_v32 = vadd.f32 1e-12, %v4556_v59  ;;  %v4557_v23 = vld [vmem:[#allocation98_spill] sm:$0xff] }
 0x29f   : > { %v1098_v19 = vpop.xlane.xlu0 %1097  ;;  %v1636_v0 = vmul.f32 %v3370_v4, %v1224_v33  ;;  %v1212_v33 = vadd.f32 1e-12, %v1196_v22 }
 0x2a0   : > { %v1686_v35 = vmul.f32 %v2195_v51, %v1651_v57  ;;  %v1211_v57 = vadd.f32 1e-12, %v1195_v42  ;;  %v1583_v51 = vmul.f32 0.05, %v4557_v23 }
 0x2a1   : > { %v1652_v25 = vsub.f32 %v1620_v41, %v1636_v0  ;;  %v4558_v0 = vmov 0.0  }
 0x2a2   : > { %v1715_v13 = vmul.f32 -1.0, %v1686_v35  ;;  %v1100_v2 = vpop.xlane.xlu1 %1099 }
 0x2a3   : > { %v1151_v28 = vpop.xlane.xlu0 %1150  ;;  %v1688_v7 = vmul.f32 %v2197_v63, %v1652_v25  ;;  %v1621_v63 = vadd.f32 %v1605_v18, %v3913_v34 }
 0x2a4   : > { %v1189_v6 = vadd.f32 %v1151_v28, %v1082_v31  ;;  %v1731_v9 = vmul.f32 %v3365_v11, %v1715_v13  ;;  %v2258_v31 = vld [vmem:[%s2500_s21 + $0x70] sm:$0xff] }
 0x2a5   : > { %v1716_v56 = vmul.f32 -1.0, %v1688_v7  ;;  %vm1263_vm10 = vcmp.ge.s32.totalorder %v2258_v31, 0  ;;  %vm1279_vm12 = vcmp.lt.s32.totalorder %v2258_v31, 128  ;;  %v4559_v7 = vld [vmem:[#allocation92_spill] sm:$0xff] }
 0x2a6   : > { %v1205_v53 = vadd.f32 1e-12, %v1189_v6  ;;  %1748 = vst.msk [vmem:[%s3934_s27 + $0x10] sm:$0xff] %vm1745_vm4, %v1731_v9  ;;  %v1154_v61 = vpop.xlane.xlu1 %1153  ;;  %vm1295_vm15 = vmand %vm1263_vm10, %vm1279_vm12 }
 0x2a7   : > { %v1175_v29 = vpop.xlane.xlu0 %1174  ;;  %v1190_v4 = vadd.f32 %v1154_v61, %v1084_v45  ;;  %v1732_v55 = vmul.f32 %v4553_v10, %v1716_v56  ;;  %v3985_v13 = vsel %vm1295_vm15, 1.0, %v4558_v0  ;;  %v4560_v61 = vld [vmem:[#allocation94_spill] sm:$0xff] }
 0x2a8   : > { %2198 = vlog2.f32 %v1205_v53  ;;  %v1197_v36 = vadd.f32 %v1175_v29, %v1098_v19  ;;  %v1676_v53 = vadd.f32 1e-12, %v4559_v7  ;;  %v1677_v29 = vadd.f32 1e-12, %v4560_v61 }
 0x2a9   : > { %v1206_v11 = vadd.f32 1e-12, %v1190_v4  ;;  %2200 = vrcp.f32 %v1669_v15  ;;  %1749 = vst.msk [vmem:[%s3934_s27 + $0x18] sm:$0xff] %vm1745_vm4, %v1732_v55  ;;  %v3993_v4 = vadd.f32 %v3985_v13, %v1583_v51  ;;  %v1609_v51 = vmul.f32 0.05, %v3896_v30 }
 0x2aa   : > { %v1178_v58 = vpop.xlane.xlu1 %1177  ;;  %v1213_v45 = vadd.f32 1e-12, %v1197_v36  ;;  %v1612_v30 = vmul.f32 0.05, %v3910_v26 }
 0x2ab   : > { %v1086_v46 = vpop.xlane.xlu0 %1085  ;;  %2202 = vlog2.f32 %v1206_v11  ;;  %v1198_v52 = vadd.f32 %v1178_v58, %v1100_v2  ;;  %v1679_v36 = vadd.f32 1e-12, %v3993_v4 }
 0x2ac   : > { %2204 = vrcp.f32 %v1670_v20 }
 0x2ad   : > { %2206 = vrcp.f32 %v1671_v54  ;;  %v1214_v6 = vadd.f32 1e-12, %v1198_v52  ;;  %v4562_v52 = vld [vmem:[#allocation79_spill] sm:$0xff] }
 0x2ae   : > { %2208 = vrcp.f32 %v1672_v14  ;;  %v1088_v39 = vpop.xlane.xlu1 %1087  ;;  %v1622_v14 = vadd.f32 %v1606_v49, %v3916_v43 }
 0x2af   : > { %v1102_v60 = vpop.xlane.xlu0 %1101  ;;  %2210 = vrcp.f32 %v1673_v16  ;;  %v4561_v16 = vld [vmem:[#allocation95_spill] sm:$0xff] }
 0x2b0   : > { %2212 = vrcp.f32 %v1674_v27  ;;  %v1678_v22 = vadd.f32 1e-12, %v4561_v16 }
 0x2b1   : > { %2214 = vrcp.f32 %v1675_v32 }
 0x2b2   : > { %v2199_v12 = vpop.eup %2198  ;;  %2216 = vlog2.f32 %v1211_v57  ;;  %v1104_v35 = vpop.xlane.xlu1 %1103 }
 0x2b3   : > { %v1226_v41 = vmul.f32 0.6931472, %v2199_v12  ;;  %v1157_v19 = vpop.xlane.xlu0 %1156  ;;  %2218 = vlog2.f32 %v1212_v33  ;;  %v2201_v28 = vpop.eup %2200 }
 0x2b4   : > { %v1191_v25 = vadd.f32 %v1157_v19, %v1086_v46  ;;  %2220 = vlog2.f32 %v1213_v45  ;;  %v4563_v19 = vld [vmem:[#allocation97_spill] sm:$0xff] }
 0x2b5   : > { %v1637_v2 = vmul.f32 %v3381_v8, %v1226_v41  ;;  %v2203_v9 = vpop.eup %2202  ;;  %v1680_v0 = vadd.f32 1e-12, %v4563_v19 }
 0x2b6   : > { %v1207_v15 = vadd.f32 1e-12, %v1191_v25  ;;  %v2205_v56 = vpop.eup %2204  ;;  %v1228_v10 = vmul.f32 0.6931472, %v2203_v9  ;;  %v1160_v55 = vpop.xlane.xlu1 %1159  ;;  %v1611_v9 = vmul.f32 0.05, %v3906_v5 }
 0x2b7   : > { %v1653_v20 = vsub.f32 %v1621_v63, %v1637_v2  ;;  %v1181_v34 = vpop.xlane.xlu0 %1180  ;;  %v3995_v54 = vpop.eup %2206  ;;  %v1192_v8 = vadd.f32 %v1160_v55, %v1088_v39  ;;  %v1607_v55 = vmul.f32 0.05, %v3951_v21  ;;  %v1615_v21 = vmul.f32 0.05, %v3956_v24 }
 0x2b8   : > { %2222 = vlog2.f32 %v1207_v15  ;;  %v1199_v38 = vadd.f32 %v1181_v34, %v1102_v60  ;;  %v3997_v11 = vpop.eup %2208  ;;  %v1638_v58 = vmul.f32 %v4552_v40, %v1228_v10  ;;  %v4564_v15 = vld [vmem:[#allocation80_spill] sm:$0xff]  ;;  %v1614_v10 = vmul.f32 0.05, %v3928_v1 }
 0x2b9   : > { %v1690_v42 = vmul.f32 %v2201_v28, %v1653_v20  ;;  %2224 = vlog2.f32 %v1214_v6  ;;  %v2211_v46 = vpop.eup %2210  ;;  %v1208_v31 = vadd.f32 1e-12, %v1192_v8  ;;  %v1613_v20 = vmul.f32 0.05, %v3923_v3 }
 0x2ba   : > { %2226 = vrcp.f32 %v1676_v53  ;;  %v1215_v27 = vadd.f32 1e-12, %v1199_v38  ;;  %v4002_v32 = vpop.eup %2212  ;;  %v1654_v39 = vsub.f32 %v1622_v14, %v1638_v58  ;;  %v1184_v60 = vpop.xlane.xlu1 %1183  ;;  %v1608_v8 = vmul.f32 0.05, %v3954_v47 }
 0x2bb   : > { %2228 = vrcp.f32 %v1677_v29  ;;  %v1717_v57 = vmul.f32 -1.0, %v1690_v42  ;;  %v1470_v43 = vpop.xlane.xlu0 %1469  ;;  %v4005_v33 = vpop.eup %2214  ;;  %v1200_v40 = vadd.f32 %v1184_v60, %v1104_v35  ;;  %v1610_v35 = vmul.f32 0.05, %v3898_v50 }
 0x2bc   : > { %2230 = vlog2.f32 %v1208_v31  ;;  %v2217_v18 = vpop.eup %2216  ;;  %v1692_v45 = vmul.f32 %v2205_v56, %v1654_v39 }
 0x2bd   : > { %v1733_v12 = vmul.f32 %v4562_v52, %v1717_v57  ;;  %2232 = vlog2.f32 %v1215_v27  ;;  %v2219_v23 = vpop.eup %2218  ;;  %v1216_v41 = vadd.f32 1e-12, %v1200_v40  ;;  %v1238_v2 = vmul.f32 0.6931472, %v2217_v18 }
 0x2be   : > { %2234 = vrcp.f32 %v1678_v22  ;;  %v1718_v25 = vmul.f32 -1.0, %v1692_v45  ;;  %v1472_v28 = vpop.xlane.xlu1 %1471  ;;  %v2221_v49 = vpop.eup %2220  ;;  %v1240_v53 = vmul.f32 0.6931472, %v2219_v23  ;;  %v1623_v27 = vadd.f32 %v1607_v55, %v1470_v43  ;;  %v4565_v43 = vld [vmem:[#allocation86_spill] sm:$0xff] }
 0x2bf   : > { %2236 = vrcp.f32 %v1679_v36  ;;  %1750 = vst.msk [vmem:[%s3934_s27 + $0x20] sm:$0xff] %vm1745_vm4, %v1733_v12  ;;  %v1474_v63 = vpop.xlane.xlu0 %1473  ;;  %v1242_v5 = vmul.f32 0.6931472, %v2221_v49  ;;  %v1643_v3 = vmul.f32 %v4556_v59, %v1238_v2  ;;  %v1624_v59 = vadd.f32 %v1608_v8, %v1472_v28 }
 0x2c0   : > { %2238 = vlog2.f32 %v1216_v41  ;;  %v1625_v6 = vadd.f32 %v1609_v51, %v1474_v63  ;;  %v1734_v56 = vmul.f32 %v4564_v15, %v1718_v25  ;;  %v1644_v47 = vmul.f32 %v4559_v7, %v1240_v53 }
 0x2c1   : > { %2240 = vrcp.f32 %v1680_v0  ;;  %v1645_v45 = vmul.f32 %v4560_v61, %v1242_v5 }
 0x2c2   : > { %v2223_v29 = vpop.eup %2222  ;;  %v1657_v50 = vsub.f32 %v1625_v6, %v3926_v62  ;;  %1751 = vst.msk [vmem:[%s3934_s27 + $0x28] sm:$0xff] %vm1745_vm4, %v1734_v56  ;;  %v1476_v38 = vpop.xlane.xlu1 %1475  ;;  %v4567_v56 = vld [vmem:[#allocation88_spill] sm:$0xff] }
 0x2c3   : > { %v2225_v34 = vpop.eup %2224  ;;  %v1230_v26 = vmul.f32 0.6931472, %v2223_v29  ;;  %v1478_v14 = vpop.xlane.xlu0 %1477  ;;  %v1626_v22 = vadd.f32 %v1610_v35, %v1476_v38 }
 0x2c4   : > { %v2227_v42 = vpop.eup %2226  ;;  %v1698_v58 = vmul.f32 %v2211_v46, %v1657_v50  ;;  %v1627_v1 = vadd.f32 %v1611_v9, %v1478_v14  ;;  %v1244_v57 = vmul.f32 0.6931472, %v2225_v34  ;;  %v4568_v34 = vld [vmem:[#allocation82_spill] sm:$0xff] }
 0x2c5   : > { %v2229_v31 = vpop.eup %2228  ;;  %v1639_v62 = vmul.f32 %v4554_v17, %v1230_v26  ;;  %v1658_v60 = vsub.f32 %v1626_v22, %v3943_v37  ;;  %v1616_v26 = vmul.f32 0.05, %v3959_v48 }
 0x2c6   : > { %v2231_v36 = vpop.eup %2230  ;;  %v1721_v39 = vmul.f32 -1.0, %v1698_v58  ;;  %v1659_v40 = vsub.f32 %v1627_v1, %v1643_v3  ;;  %v1480_v12 = vpop.xlane.xlu1 %1479  ;;  %v1646_v2 = vmul.f32 %v4561_v16, %v1244_v57 }
 0x2c7   : > { %v2233_v18 = vpop.eup %2232  ;;  %v1232_v46 = vmul.f32 0.6931472, %v2231_v36  ;;  %v1655_v52 = vsub.f32 %v1623_v27, %v1639_v62  ;;  %v1482_v24 = vpop.xlane.xlu0 %1481  ;;  %v1700_v7 = vmul.f32 %v4002_v32, %v1658_v60  ;;  %v1628_v63 = vadd.f32 %v1612_v30, %v1480_v12  ;;  %v4566_v30 = vld [vmem:[#allocation87_spill] sm:$0xff]  ;;  %v4573_v12 = vld [vmem:[#allocation96_spill] sm:$0xff] }
 0x2c8   : > { %v2235_v23 = vpop.eup %2234  ;;  %v1246_v17 = vmul.f32 0.6931472, %v2233_v18  ;;  %v1737_v51 = vmul.f32 %v4565_v43, %v1721_v39  ;;  %v1702_v41 = vmul.f32 %v4005_v33, %v1659_v40  ;;  %v1629_v49 = vadd.f32 %v1613_v20, %v1482_v24  ;;  %v4571_v36 = vld [vmem:[#allocation91_spill] sm:$0xff] }
 0x2c9   : > { %v2237_v0 = vpop.eup %2236  ;;  %v1694_v37 = vmul.f32 %v3995_v54, %v1655_v52  ;;  %v1640_v25 = vmul.f32 %v4555_v44, %v1232_v46  ;;  %v1722_v61 = vmul.f32 -1.0, %v1700_v7  ;;  %v1660_v53 = vsub.f32 %v1628_v63, %v1644_v47 }
 0x2ca   : > { %v2239_v28 = vpop.eup %2238  ;;  %1754 = vst.msk [vmem:[%s3934_s27 + $0x40] sm:$0xff] %vm1745_vm4, %v1737_v51  ;;  %v1723_v35 = vmul.f32 -1.0, %v1702_v41  ;;  %v1647_v6 = vmul.f32 %v3993_v4, %v1246_v17  ;;  %v1484_v54 = vpop.xlane.xlu1 %1483  ;;  %v1661_v20 = vsub.f32 %v1629_v49, %v1645_v45 }
 0x2cb   : > { %v1248_v9 = vmul.f32 0.6931472, %v2239_v28  ;;  %v1719_v32 = vmul.f32 -1.0, %v1694_v37  ;;  %v1656_v33 = vsub.f32 %v1624_v59, %v1640_v25  ;;  %v1486_v44 = vpop.xlane.xlu0 %1485  ;;  %v1738_v15 = vmul.f32 %v4566_v30, %v1722_v61  ;;  %v2241_v50 = vpop.eup %2240 }
 0x2cc   : > { %v1739_v29 = vmul.f32 %v4567_v56, %v1723_v35  ;;  %v1630_v55 = vadd.f32 %v1614_v10, %v1484_v54  ;;  %v1704_v8 = vmul.f32 %v2227_v42, %v1660_v53  ;;  %v1631_v5 = vadd.f32 %v1615_v21, %v1486_v44  ;;  %v4569_v21 = vld [vmem:[#allocation84_spill] sm:$0xff] }
 0x2cd   : > { %v1735_v16 = vmul.f32 %v4568_v34, %v1719_v32  ;;  %v1696_v4 = vmul.f32 %v3997_v11, %v1656_v33  ;;  %1755 = vst.msk [vmem:[%s3934_s27 + $0x48] sm:$0xff] %vm1745_vm4, %v1738_v15  ;;  %v1706_v38 = vmul.f32 %v2229_v31, %v1661_v20  ;;  %v1648_v48 = vmul.f32 %v4563_v19, %v1248_v9  ;;  %v4570_v31 = vld [vmem:[#allocation89_spill] sm:$0xff] }
 0x2ce   : > { %1756 = vst.msk [vmem:[%s3934_s27 + $0x50] sm:$0xff] %vm1745_vm4, %v1739_v29  ;;  %v1662_v14 = vsub.f32 %v1630_v55, %v1646_v2  ;;  %v1724_v58 = vmul.f32 -1.0, %v1704_v8  ;;  %v1663_v22 = vsub.f32 %v1631_v5, %v1647_v6  ;;  %v1488_v3 = vpop.xlane.xlu1 %1487  ;;  %v4572_v19 = vld [vmem:[#allocation93_spill] sm:$0xff] }
 0x2cf   : > { %1752 = vst.msk [vmem:[%s3934_s27 + $0x30] sm:$0xff] %vm1745_vm4, %v1735_v16  ;;  %v1720_v10 = vmul.f32 -1.0, %v1696_v4  ;;  %v1725_v11 = vmul.f32 -1.0, %v1706_v38  ;;  %v1632_v1 = vadd.f32 %v1616_v26, %v1488_v3 }
 0x2d0   : > { %v1708_v42 = vmul.f32 %v2235_v23, %v1662_v14  ;;  %v1740_v27 = vmul.f32 %v4570_v31, %v1724_v58  ;;  %v1710_v47 = vmul.f32 %v2237_v0, %v1663_v22 }
 0x2d1   : > { %v1736_v62 = vmul.f32 %v4569_v21, %v1720_v10  ;;  %v1741_v57 = vmul.f32 %v4571_v36, %v1725_v11  ;;  %v1664_v60 = vsub.f32 %v1632_v1, %v1648_v48 }
 0x2d2   : > { %v1726_v39 = vmul.f32 -1.0, %v1708_v42  ;;  %1757 = vst.msk [vmem:[%s3934_s27 + $0x58] sm:$0xff] %vm1745_vm4, %v1740_v27  ;;  %v1727_v40 = vmul.f32 -1.0, %v1710_v47 }
 0x2d3   : > { %1753 = vst.msk [vmem:[%s3934_s27 + $0x38] sm:$0xff] %vm1745_vm4, %v1736_v62  ;;  %1758 = vst.msk [vmem:[%s3934_s27 + $0x60] sm:$0xff] %vm1745_vm4, %v1741_v57  ;;  %v1712_v46 = vmul.f32 %v2241_v50, %v1664_v60 }
 0x2d4   : > { %v1742_v18 = vmul.f32 %v4572_v19, %v1726_v39  ;;  %v1743_v52 = vmul.f32 %v3985_v13, %v1727_v40 }
 0x2d5   : > { %v1728_v59 = vmul.f32 -1.0, %v1712_v46 }
 0x2d6   : > { %1759 = vst.msk [vmem:[%s3934_s27 + $0x68] sm:$0xff] %vm1745_vm4, %v1742_v18  ;;  %1760 = vst.msk [vmem:[%s3934_s27 + $0x70] sm:$0xff] %vm1745_vm4, %v1743_v52 }
 0x2d7   : > { %v1744_v45 = vmul.f32 %v4573_v12, %v1728_v59 }
 0x2d9   : > { %1761 = vst.msk [vmem:[%s3934_s27 + $0x78] sm:$0xff] %vm1745_vm4, %v1744_v45 }
 0x2da PF: > { %s14_s15 = sadd.s32 1, %s2265_s15  }
 0x2db   : > { %p11_p4 = scmp.ge.s32.totalorder %s14_s15, 4  }
 0x2dd   :  { %13 = sbr.rel (!%p11_p4) target bundleno = 1 (0x1), region = 70 }

// kernel: tpu_custom_call.1
= control target key start
LH: loop header
LB: loop body
LE: loop exit
PB: predicated region body
PF: predicated region fallthrough
CT: control target
= control target key end

     0   :  { %s2294_s15 = smov 0   ;;  %s4071_s0 = inlined_call_operand.vmem [shape: f32[256,64], index: 0, kind: input, shape index: {}]   ;;  %s4072_s1 = inlined_call_operand.vmem [shape: f32[256,128], index: 1, kind: input, shape index: {}]   ;;  %s4073_s2 = inlined_call_operand.vmem [shape: s32[256,1], index: 2, kind: input, shape index: {}]   ;;  %s4074_s3 = inlined_call_operand.vmem [shape: s32[1,256], index: 3, kind: input, shape index: {}]   ;;  %s4075_s4 = inlined_call_operand.vmem [shape: f32[256,1], index: 4, kind: output, shape index: {}]  }
   0x1 LB: > { %s1832_s16 = sadd.s32 4294967295, %s2265_s15   ;;  %p1836_p0 = scmp.ge.s32.totalorder %s2265_s15, 1  ;;  %s2265_s15 = sphi %s2294_s15, %s14_s15  }
   0x2   : > { %p174_p1 = scmp.lt.s32.totalorder %s2265_s15, 3 }
   0x4   : > { %p175_p2 = pnand %p1836_p0, %p174_p1 }
   0x6   : > { %178 = sbr.rel (%p175_p2) target bundleno = 730 (0x2da), region = 36 }
   0xd   : > { %v257_v0 = vld [vmem:[%s4071_s0 + $0x80] sm:$0xff]  ;;  %v258_v1 = vld [vmem:[%s4071_s0 + $0x88] sm:$0xff]  ;;  %vm289_vm0 = vcmask 523264   ;;  %s1837_s23 = sshll.u32 %s1832_s16, 4  ;;  %v259_v6 = vld [vmem:[%s4071_s0 + $0x90] sm:$0xff]  ;;  %v2267_v9 = vmov 0  }
   0xe   : > { %v241_v2 = vld [vmem:[%s4071_s0] sm:$0xff]  ;;  %v2006_v3 = vpack.c.bf16 %v258_v1, %v257_v0  ;;  %vm2315_vm1 = vmpackc.low %vm289_vm0, %vm289_vm0  ;;  %v242_v5 = vld [vmem:[%s4071_s0 + $0x8] sm:$0xff]  ;;  %p206_p3 = scmp.lt.s32.totalorder %s1837_s23, 31  ;;  %2081 = vset.pattern.permute.xlu1 %v2267_v9  ;;  %2080 = vset.pattern.permute.xlu0 %v2267_v9  ;;  %s2364_s18 = sshll.u32 %s1832_s16, 7 }
   0xf   : > { %v2009_v7 = vpack.c.bf16 %v242_v5, %v241_v2  ;;  %v260_v8 = vld [vmem:[%s4071_s0 + $0x98] sm:$0xff]  ;;  %v243_v11 = vld [vmem:[%s4071_s0 + $0x10] sm:$0xff]  ;;  %v261_v13 = vld [vmem:[%s4071_s0 + $0xa0] sm:$0xff]  ;;  %s2386_s24 = scalar_lea.vmem %s4071_s0, %s2364_s18 }
  0x10   : > { %2008 = vmatprep.subr.msk.bf16.mxu0 %vm2315_vm1, %v2006_v3  ;;  %2054 = vmatprep.subr.msk.bf16.mxu1 %vm2315_vm1, %v2006_v3  ;;  %v2012_v10 = vpack.c.bf16 %v260_v8, %v259_v6  ;;  %s4575_s23 = smov (!%p206_p3, %s1837_s23), 31  ;;  %v244_v12 = vld [vmem:[%s4071_s0 + $0x18] sm:$0xff]  ;;  %v262_v14 = vld [vmem:[%s4071_s0 + $0xa8] sm:$0xff]  ;;  %v245_v21 = vld [vmem:[%s4071_s0 + $0x20] sm:$0xff] }
  0x11   : > { %2011 = vmatpush3.bf16.xpose.msk.msra.mxu0 %vm2315_vm1, %v2009_v7  ;;  %2062 = vmatpush3.bf16.xpose.msk.msra.mxu1 %vm2315_vm1, %v2009_v7  ;;  %s2346_s8 = sshll.u32 %s4575_s23, 3  ;;  %v2015_v16 = vpack.c.bf16 %v244_v12, %v243_v11  ;;  %v2018_v18 = vpack.c.bf16 %v262_v14, %v261_v13  ;;  %v246_v22 = vld [vmem:[%s4071_s0 + $0x28] sm:$0xff]  ;;  %v263_v23 = vld [vmem:[%s4071_s0 + $0xb0] sm:$0xff]  ;;  %v264_v24 = vld [vmem:[%s4071_s0 + $0xb8] sm:$0xff] }
  0x12   : > { %2014 = vmatprep.subr.msk.bf16.mxu0 %vm2315_vm1, %v2012_v10  ;;  %2055 = vmatprep.subr.msk.bf16.mxu1 %vm2315_vm1, %v2012_v10  ;;  %s2358_s17 = scalar_lea.vmem %s4072_s1, %s2346_s8  ;;  %v2021_v27 = vpack.c.bf16 %v246_v22, %v245_v21  ;;  %v225_v28 = vld [vmem:[%s2386_s24] sm:$0xff]  ;;  %v2024_v29 = vpack.c.bf16 %v264_v24, %v263_v23  ;;  %v247_v35 = vld [vmem:[%s4071_s0 + $0x30] sm:$0xff]  ;;  %v248_v36 = vld [vmem:[%s4071_s0 + $0x38] sm:$0xff]  ;;  %s2500_s21 = scalar_lea.vmem %s4073_s2, %s2346_s8 }
  0x13   : > { %v597_v15 = vld [vmem:[%s2358_s17 + $0x10] sm:$0xff]  ;;  %v595_v17 = vld [vmem:[%s2358_s17] sm:$0xff]  ;;  %v598_v19 = vld [vmem:[%s2358_s17 + $0x18] sm:$0xff]  ;;  %v2397_v30 = vmul.f32 14.285714, %v225_v28  ;;  %v2027_v41 = vpack.c.bf16 %v248_v36, %v247_v35  ;;  %s3934_s27 = scalar_lea.vmem %s4075_s4, %s2346_s8 }
  0x14   : > { %632 = vmax.xlane.f32.xlu1 %v597_v15  ;;  %628 = vmax.xlane.f32.xlu0 %v595_v17  ;;  %v596_v20 = vld [vmem:[%s2358_s17 + $0x8] sm:$0xff]  ;;  %v599_v26 = vld [vmem:[%s2358_s17 + $0x20] sm:$0xff]  ;;  %v602_v32 = vld [vmem:[%s2358_s17 + $0x38] sm:$0xff] }
  0x15   : > { %v600_v25 = vld [vmem:[%s2358_s17 + $0x28] sm:$0xff]  ;;  %v233_v31 = vld [vmem:[%s2386_s24 + $0x40] sm:$0xff]  ;;  %v601_v33 = vld [vmem:[%s2358_s17 + $0x30] sm:$0xff]  ;;  %1974 = vmatprep.mubr.msk.f32.mxu0 %vm289_vm0, %v2397_v30 }
  0x16   : > { %v2404_v34 = vmul.f32 14.285714, %v233_v31  ;;  %v265_v37 = vld [vmem:[%s4071_s0 + $0xc0] sm:$0xff]  ;;  %v266_v38 = vld [vmem:[%s4071_s0 + $0xc8] sm:$0xff]  ;;  %v606_v43 = vld [vmem:[%s2358_s17 + $0x58] sm:$0xff] }
  0x17   : > { %v604_v39 = vld [vmem:[%s2358_s17 + $0x48] sm:$0xff]  ;;  %v603_v40 = vld [vmem:[%s2358_s17 + $0x40] sm:$0xff]  ;;  %v2030_v42 = vpack.c.bf16 %v266_v38, %v265_v37  ;;  %v605_v44 = vld [vmem:[%s2358_s17 + $0x50] sm:$0xff] }
  0x18   : > { %634 = vmax.xlane.f32.xlu1 %v598_v19  ;;  %630 = vmax.xlane.f32.xlu0 %v596_v20  ;;  %v249_v45 = vld [vmem:[%s4071_s0 + $0x40] sm:$0xff]  ;;  %v250_v46 = vld [vmem:[%s4071_s0 + $0x48] sm:$0xff]  ;;  %v267_v47 = vld [vmem:[%s4071_s0 + $0xd0] sm:$0xff] }
  0x19   : > { %2017 = vmatpush3.bf16.xpose.msk.msra.mxu0 %vm2315_vm1, %v2015_v16  ;;  %2063 = vmatpush3.bf16.xpose.msk.msra.mxu1 %vm2315_vm1, %v2015_v16  ;;  %v268_v48 = vld [vmem:[%s4071_s0 + $0xd8] sm:$0xff]  ;;  %v608_v49 = vld [vmem:[%s2358_s17 + $0x68] sm:$0xff]  ;;  %v607_v50 = vld [vmem:[%s2358_s17 + $0x60] sm:$0xff]  ;;  %v2033_v51 = vpack.c.bf16 %v250_v46, %v249_v45 }
  0x1a   : > { %2020 = vmatprep.subr.msk.bf16.mxu0 %vm2315_vm1, %v2018_v18  ;;  %2056 = vmatprep.subr.msk.bf16.mxu1 %vm2315_vm1, %v2018_v18  ;;  %v2036_v52 = vpack.c.bf16 %v268_v48, %v267_v47  ;;  %v610_v53 = vld [vmem:[%s2358_s17 + $0x78] sm:$0xff]  ;;  %v609_v54 = vld [vmem:[%s2358_s17 + $0x70] sm:$0xff]  ;;  %v269_v57 = vld [vmem:[%s4071_s0 + $0xe0] sm:$0xff] }
  0x1b   : > { %1990 = vmatprep.mubr.msk.f32.mxu1 %vm289_vm0, %v2404_v34  ;;  %v251_v55 = vld [vmem:[%s4071_s0 + $0x50] sm:$0xff]  ;;  %v252_v56 = vld [vmem:[%s4071_s0 + $0x58] sm:$0xff]  ;;  %v270_v58 = vld [vmem:[%s4071_s0 + $0xe8] sm:$0xff] }
  0x1c   : > { %638 = vmax.xlane.f32.xlu1 %v600_v25  ;;  %636 = vmax.xlane.f32.xlu0 %v599_v26  ;;  %v2039_v59 = vpack.c.bf16 %v252_v56, %v251_v55  ;;  %v2042_v60 = vpack.c.bf16 %v270_v58, %v269_v57  ;;  %v253_v61 = vld [vmem:[%s4071_s0 + $0x60] sm:$0xff]  ;;  %v254_v62 = vld [vmem:[%s4071_s0 + $0x68] sm:$0xff]  ;;  %v271_v63 = vld [vmem:[%s4071_s0 + $0xf0] sm:$0xff] }
  0x1d   : > { %v272_v0 = vld [vmem:[%s4071_s0 + $0xf8] sm:$0xff]  ;;  %v2045_v1 = vpack.c.bf16 %v254_v62, %v253_v61  ;;  %v2507_v3 = vld [vmem:[%s2500_s21 + $0x8] sm:$0xff]  ;;  %v255_v5 = vld [vmem:[%s4071_s0 + $0x70] sm:$0xff] }
  0x1e   : > { %v2048_v2 = vpack.c.bf16 %v272_v0, %v271_v63  ;;  %v256_v6 = vld [vmem:[%s4071_s0 + $0x78] sm:$0xff]  ;;  %v2521_v8 = vld [vmem:[%s2500_s21 + $0x10] sm:$0xff]  ;;  %v2524_v9 = vld [vmem:[%s2500_s21] sm:$0xff] }
  0x1f   : > { %v2051_v7 = vpack.c.bf16 %v256_v6, %v255_v5  ;;  %v2532_v10 = vld [vmem:[%s2500_s21 + $0x18] sm:$0xff]  ;;  %v226_v11 = vld [vmem:[%s2386_s24 + $0x8] sm:$0xff]  ;;  %v227_v16 = vld [vmem:[%s2386_s24 + $0x10] sm:$0xff]  ;;  %v2659_v5 = vstv %s2364_s18 }
  0x20   : > { %642 = vmax.xlane.f32.xlu1 %v602_v32  ;;  %640 = vmax.xlane.f32.xlu0 %v601_v33  ;;  %v234_v12 = vld [vmem:[%s2386_s24 + $0x48] sm:$0xff]  ;;  %v274_v14 = vmul.f32 14.285714, %v226_v11  ;;  %v235_v17 = vld [vmem:[%s2386_s24 + $0x50] sm:$0xff]  ;;  %v2545_v4 = vld [vmem:[%s2500_s21 + $0x20] sm:$0xff] }
  0x21   : > { %2023 = vmatpush3.bf16.xpose.msk.msra.mxu0 %vm2315_vm1, %v2021_v27  ;;  %2064 = vmatpush3.bf16.xpose.msk.msra.mxu1 %vm2315_vm1, %v2021_v27  ;;  %v2538_v13 = vld [vmem:[%s2500_s21 + $0x48] sm:$0xff]  ;;  %v282_v15 = vmul.f32 14.285714, %v234_v12  ;;  %v2548_v18 = vld [vmem:[%s2500_s21 + $0x58] sm:$0xff]  ;;  %v275_v19 = vmul.f32 14.285714, %v227_v16 }
  0x22   : > { %2026 = vmatprep.subr.msk.bf16.mxu0 %vm2315_vm1, %v2024_v29  ;;  %2057 = vmatprep.subr.msk.bf16.mxu1 %vm2315_vm1, %v2024_v29  ;;  %v283_v20 = vmul.f32 14.285714, %v235_v17  ;;  %v228_v21 = vld [vmem:[%s2386_s24 + $0x18] sm:$0xff]  ;;  %v2561_v23 = vld [vmem:[%s2500_s21 + $0x28] sm:$0xff]  ;;  %v229_v27 = vld [vmem:[%s2386_s24 + $0x20] sm:$0xff] }
  0x23   : > { %v236_v22 = vld [vmem:[%s2386_s24 + $0x58] sm:$0xff]  ;;  %v2564_v24 = vld [vmem:[%s2500_s21 + $0x68] sm:$0xff]  ;;  %v276_v25 = vmul.f32 14.285714, %v228_v21  ;;  %v237_v28 = vld [vmem:[%s2386_s24 + $0x60] sm:$0xff] }
  0x24   : > { %646 = vmax.xlane.f32.xlu1 %v604_v39  ;;  %644 = vmax.xlane.f32.xlu0 %v603_v40  ;;  %v284_v26 = vmul.f32 14.285714, %v236_v22  ;;  %v2575_v29 = vld [vmem:[%s2500_s21 + $0x30] sm:$0xff]  ;;  %v277_v31 = vmul.f32 14.285714, %v229_v27  ;;  %v230_v33 = vld [vmem:[%s2386_s24 + $0x28] sm:$0xff] }
  0x25   : > { %v285_v32 = vmul.f32 14.285714, %v237_v28  ;;  %v2589_v35 = vld [vmem:[%s2500_s21 + $0x38] sm:$0xff]  ;;  %v278_v36 = vmul.f32 14.285714, %v230_v33  ;;  %v231_v38 = vld [vmem:[%s2386_s24 + $0x30] sm:$0xff] }
  0x26   : > { %v239_v39 = vld [vmem:[%s2386_s24 + $0x70] sm:$0xff]  ;;  %v2599_v40 = vld [vmem:[%s2500_s21 + $0x40] sm:$0xff]  ;;  %v4092_v33 = vmov 0.0  }
  0x27   : > { %v2609_v45 = vld [vmem:[%s2500_s21 + $0x50] sm:$0xff]  ;;  %v2617_v48 = vld [vmem:[%s2500_s21 + $0x60] sm:$0xff] }
  0x28   : > { %650 = vmax.xlane.f32.xlu1 %v606_v43  ;;  %648 = vmax.xlane.f32.xlu0 %v605_v44  ;;  %v232_v43 = vld [vmem:[%s2386_s24 + $0x38] sm:$0xff]  ;;  %v627_v11 = vld [vmem:[%s4074_s3] sm:$0x3] }
  0x29   : > { %2029 = vmatpush3.bf16.xpose.msk.msra.mxu0 %vm2315_vm1, %v2027_v41  ;;  %2065 = vmatpush3.bf16.xpose.msk.msra.mxu1 %vm2315_vm1, %v2027_v41  ;;  %v279_v41 = vmul.f32 14.285714, %v231_v38  ;;  %v240_v44 = vld [vmem:[%s2386_s24 + $0x78] sm:$0xff]  ;;  %v280_v46 = vmul.f32 14.285714, %v232_v43 }
  0x2a   : > { %2032 = vmatprep.subr.msk.bf16.mxu0 %vm2315_vm1, %v2030_v42  ;;  %2058 = vmatprep.subr.msk.bf16.mxu1 %vm2315_vm1, %v2030_v42  ;;  %v287_v42 = vmul.f32 14.285714, %v239_v39  ;;  %v288_v47 = vmul.f32 14.285714, %v240_v44 }
  0x2c   : > { %654 = vmax.xlane.f32.xlu1 %v608_v49  ;;  %652 = vmax.xlane.f32.xlu0 %v607_v50  ;;  %v625_v49 = vld [vmem:[%s2500_s21 + $0x70] sm:$0xff] }
  0x30   : > { %658 = vmax.xlane.f32.xlu1 %v610_v53  ;;  %656 = vmax.xlane.f32.xlu0 %v609_v54 }
  0x31   : > { %2035 = vmatpush3.bf16.xpose.msk.msra.mxu0 %vm2315_vm1, %v2033_v51  ;;  %2066 = vmatpush3.bf16.xpose.msk.msra.mxu1 %vm2315_vm1, %v2033_v51 }
  0x32   : > { %2038 = vmatprep.subr.msk.bf16.mxu0 %vm2315_vm1, %v2036_v52  ;;  %2059 = vmatprep.subr.msk.bf16.mxu1 %vm2315_vm1, %v2036_v52 }
  0x39   : > { %2041 = vmatpush3.bf16.xpose.msk.msra.mxu0 %vm2315_vm1, %v2039_v59  ;;  %2067 = vmatpush3.bf16.xpose.msk.msra.mxu1 %vm2315_vm1, %v2039_v59 }
  0x3a   : > { %2044 = vmatprep.subr.msk.bf16.mxu0 %vm2315_vm1, %v2042_v60  ;;  %2060 = vmatprep.subr.msk.bf16.mxu1 %vm2315_vm1, %v2042_v60  ;;  %v772_v60 = vlaneseq }
  0x3c   : > { %v2651_v63 = vshrl.u32 %v772_v60, 7  ;;  %v2661_v6 = vand.u32 127, %v772_v60 }
  0x3e   : > { %v777_v0 = vadd.s32 8, %v2651_v63  ;;  %v895_v12 = vsub.s32 1, %v2651_v63  ;;  %v2675_v17 = vadd.s32 128, %v2661_v6  ;;  %v2693_v27 = vadd.s32 %v2659_v5, %v2651_v63 }
  0x3f   : > { %v781_v60 = vadd.s32 40, %v2651_v63 }
  0x40   : > { %4241 = vst [vmem:[#allocation10_spill] sm:$0xff] %v2675_v17  ;;  %v2681_v21 = vrot.slane %v627_v11, %v895_v12  ;;  %4244 = vst [vmem:[#allocation13_spill] sm:$0xff] %v2693_v27  ;;  %vm4094_vm9 = vcmp.ne.s32.totalorder %v2693_v27, %v2661_v6  ;;  %vm4091_vm10 = vcmp.ne.s32.totalorder %v2693_v27, %v2675_v17  ;;  %v4327_v27 = vmov 0 }
  0x41   : > { %2047 = vmatpush3.bf16.xpose.msk.msra.mxu0 %vm2315_vm1, %v2045_v1  ;;  %2068 = vmatpush3.bf16.xpose.msk.msra.mxu1 %vm2315_vm1, %v2045_v1 }
  0x42   : > { %2050 = vmatprep.subr.msk.bf16.mxu0 %vm2315_vm1, %v2048_v2  ;;  %2061 = vmatprep.subr.msk.bf16.mxu1 %vm2315_vm1, %v2048_v2 }
  0x43   : > { %845 = vperm.xlu1 %2081, %v2507_v3  }
  0x46   : > { %842 = vperm.xlu0 %2080, %v2524_v9  }
  0x47   : > { %848 = vperm.xlu1 %2081, %v2521_v8  }
  0x49   : > { %2053 = vmatpush3.bf16.xpose.msk.msra.mxu0 %vm2315_vm1, %v2051_v7  ;;  %2069 = vmatpush3.bf16.xpose.msk.msra.mxu1 %vm2315_vm1, %v2051_v7  ;;  %v891_v7 = vsub.s32 0, %v2651_v63 }
  0x4a   : > { %869 = vperm.xlu0 %2080, %v2538_v13  }
  0x4b   : > { %851 = vperm.xlu1 %2081, %v2532_v10  }
  0x4e   : > { %875 = vperm.xlu0 %2080, %v2548_v18  }
  0x4f   : > { %854 = vperm.xlu1 %2081, %v2545_v4  }
  0x50   : > { %1975 = vmatmul.mubr.msk.f32.vlgmr.msra.gmra.mrb[0].mxu0 %vm289_vm0, %v2397_v30  ;;  %1991 = vmatmul.mubr.msk.f32.vlgmr.msra.gmra.mrb[0].mxu1 %vm289_vm0, %v2404_v34  ;;  %v2578_v30 = vld [vmem:[%s2500_s21 + $0x78] sm:$0xff]  ;;  %v238_v34 = vld [vmem:[%s2386_s24 + $0x68] sm:$0xff] }
  0x51   : > { %1976 = vmatprep.mubr.msk.f32.mxu0 %vm289_vm0, %v274_v14  ;;  %1992 = vmatprep.mubr.msk.f32.mxu1 %vm289_vm0, %v282_v15  ;;  %v286_v37 = vmul.f32 14.285714, %v238_v34 }
  0x52   : > { %881 = vperm.xlu0 %2080, %v2564_v24  }
  0x53   : > { %857 = vperm.xlu1 %2081, %v2561_v23  }
  0x54   : > { %1977 = vmatmul.mubr.msk.f32.gmra.mrb[2].mxu0 %vm289_vm0, %v274_v14  ;;  %1993 = vmatmul.mubr.msk.f32.gmra.mrb[2].mxu1 %vm289_vm0, %v282_v15  ;;  %v778_v14 = vadd.s32 16, %v2651_v63  ;;  %v2670_v15 = vadd.s32 %v2659_v5, %v777_v0 }
  0x55   : > { %1978 = vmatprep.mubr.msk.f32.mxu0 %vm289_vm0, %v275_v19  ;;  %1994 = vmatprep.mubr.msk.f32.mxu1 %vm289_vm0, %v283_v20 }
  0x56   : > { %887 = vperm.xlu0 %2080, %v2578_v30   ;;  %4239 = vst [vmem:[#allocation8_spill] sm:$0xff] %v2670_v15  ;;  %v2684_v22 = vadd.s32 %v2659_v5, %v778_v14  ;;  %vm4085_vm2 = vcmp.ne.s32.totalorder %v2670_v15, %v2661_v6  ;;  %vm4078_vm3 = vcmp.ne.s32.totalorder %v2670_v15, %v2675_v17 }
  0x57   : > { %860 = vperm.xlu1 %2081, %v2575_v29  }
  0x58   : > { %1979 = vmatmul.mubr.msk.f32.gmra.mrb[4].mxu0 %vm289_vm0, %v275_v19  ;;  %1995 = vmatmul.mubr.msk.f32.gmra.mrb[4].mxu1 %vm289_vm0, %v283_v20  ;;  %v2677_v19 = vrot.slane %v627_v11, %v891_v7  ;;  %4243 = vst [vmem:[#allocation12_spill] sm:$0xff] %v2684_v22  ;;  %vm4076_vm7 = vcmp.ne.s32.totalorder %v2684_v22, %v2661_v6  ;;  %v4257_v7 = vmov 0 }
  0x59   : > { %1980 = vmatprep.mubr.msk.f32.mxu0 %vm289_vm0, %v276_v25  ;;  %1996 = vmatprep.mubr.msk.f32.mxu1 %vm289_vm0, %v284_v26  ;;  %vm4077_vm14 = vcmp.ne.s32.totalorder %v2684_v22, %v2675_v17 }
  0x5b   : > { %863 = vperm.xlu1 %2081, %v2589_v35  }
  0x5c   : > { %1981 = vmatmul.mubr.msk.f32.gmra.mrb[6].mxu0 %vm289_vm0, %v276_v25  ;;  %1997 = vmatmul.mubr.msk.f32.gmra.mrb[6].mxu1 %vm289_vm0, %v284_v26  ;;  %v779_v25 = vadd.s32 24, %v2651_v63 }
  0x5d   : > { %1982 = vmatprep.mubr.msk.f32.mxu0 %vm289_vm0, %v277_v31  ;;  %1998 = vmatprep.mubr.msk.f32.mxu1 %vm289_vm0, %v285_v32 }
  0x5f   : > { %866 = vperm.xlu1 %2081, %v2599_v40  }
  0x60   : > { %1983 = vmatmul.mubr.msk.f32.gmra.mrb[8].mxu0 %vm289_vm0, %v277_v31  ;;  %1999 = vmatmul.mubr.msk.f32.gmra.mrb[8].mxu1 %vm289_vm0, %v285_v32  ;;  %v780_v31 = vadd.s32 32, %v2651_v63 }
  0x61   : > { %1984 = vmatprep.mubr.msk.f32.mxu0 %vm289_vm0, %v278_v36  ;;  %2000 = vmatprep.mubr.msk.f32.mxu1 %vm289_vm0, %v286_v37 }
  0x62   : > { %v2760_v44 = vadd.s32 %v2659_v5, %v780_v31  ;;  %v4262_v31 = vmov 0 }
  0x63   : > { %872 = vperm.xlu1 %2081, %v2609_v45  }
  0x64   : > { %1985 = vmatmul.mubr.msk.f32.gmra.mrb[10].mxu0 %vm289_vm0, %v278_v36  ;;  %2001 = vmatmul.mubr.msk.f32.gmra.mrb[10].mxu1 %vm289_vm0, %v286_v37  ;;  %v2722_v36 = vadd.s32 %v2659_v5, %v779_v25  ;;  %4254 = vst [vmem:[#allocation15_spill] sm:$0xff] %v2760_v44  ;;  %v4259_v25 = vmov 0 }
  0x65   : > { %1986 = vmatprep.mubr.msk.f32.mxu0 %vm289_vm0, %v279_v41  ;;  %2002 = vmatprep.mubr.msk.f32.mxu1 %vm289_vm0, %v287_v42 }
  0x66   : > { %4249 = vst [vmem:[#allocation14_spill] sm:$0xff] %v2722_v36 }
  0x67   : > { %878 = vperm.xlu1 %2081, %v2617_v48  }
  0x68   : > { %1987 = vmatmul.mubr.msk.f32.gmra.mrb[12].mxu0 %vm289_vm0, %v279_v41  ;;  %2003 = vmatmul.mubr.msk.f32.gmra.mrb[12].mxu1 %vm289_vm0, %v287_v42  ;;  %v4250_v42 = vmov 0 }
  0x69   : > { %1988 = vmatprep.mubr.msk.f32.mxu0 %vm289_vm0, %v280_v46  ;;  %2004 = vmatprep.mubr.msk.f32.mxu1 %vm289_vm0, %v288_v47 }
  0x6b   : > { %884 = vperm.xlu1 %2081, %v625_v49  }
  0x6c   : > { %1989 = vmatmul.mubr.msk.f32.gmra.mrb[14].mxu0 %vm289_vm0, %v280_v46  ;;  %2005 = vmatmul.mubr.msk.f32.gmra.mrb[14].mxu1 %vm289_vm0, %v288_v47 }
  0xa1   : > { %v2627_v50 = vpop.xlane.xlu1 %632  ;;  %v2629_v51 = vpop.xlane.xlu0 %628 }
  0xa5   : > { %v2631_v52 = vpop.xlane.xlu1 %634  ;;  %v2633_v53 = vpop.xlane.xlu0 %630 }
  0xa9   : > { %v2635_v54 = vpop.xlane.xlu1 %638  ;;  %v2637_v55 = vpop.xlane.xlu0 %636 }
  0xaa   : > { %4233 = vst [vmem:[#allocation2_spill] sm:$0xff] %v2635_v54  ;;  %4234 = vst [vmem:[#allocation3_spill] sm:$0xff] %v2637_v55  ;;  %v4323_v54 = vmov 0 }
  0xad   : > { %v2639_v56 = vpop.xlane.xlu1 %642  ;;  %v2641_v57 = vpop.xlane.xlu0 %640 }
  0xae   : > { %4235 = vst [vmem:[#allocation4_spill] sm:$0xff] %v2639_v56  ;;  %4236 = vst [vmem:[#allocation5_spill] sm:$0xff] %v2641_v57  ;;  %v784_v57 = vadd.s32 64, %v2651_v63 }
  0xb1   : > { %v2643_v58 = vpop.xlane.xlu1 %646  ;;  %v2645_v59 = vpop.xlane.xlu0 %644 }
  0xb5   : > { %v2647_v61 = vpop.xlane.xlu1 %650  ;;  %v2649_v62 = vpop.xlane.xlu0 %648 }
  0xb9   : > { %v2654_v1 = vpop.xlane.xlu1 %654  ;;  %v2656_v2 = vpop.xlane.xlu0 %652 }
  0xba   : > { %4237 = vst [vmem:[#allocation6_spill] sm:$0xff] %v2654_v1  ;;  %4238 = vst [vmem:[#allocation7_spill] sm:$0xff] %v2656_v2  ;;  %v4304_v2 = vmov 0 }
  0xbd   : > { %v2672_v16 = vpop.xlane.xlu1 %658  ;;  %v2679_v20 = vpop.xlane.xlu0 %656 }
  0xbe   : > { %4240 = vst [vmem:[#allocation9_spill] sm:$0xff] %v2672_v16  ;;  %4242 = vst [vmem:[#allocation11_spill] sm:$0xff] %v2679_v20 }
  0xc2   : > { %v2689_v26 = vpop.permute.xlu1 %845 }
  0xc3   : > { %vm899_vm4 = vcmp.eq.s32.totalorder %v2689_v26, %v2677_v19  ;;  %vm900_vm5 = vcmp.eq.s32.totalorder %v2689_v26, %v2681_v21 }
  0xc4   : > { %vm2704_vm6 = vmand %vm899_vm4, %vm4085_vm2  ;;  %vm4084_vm4 = vcmp.ne.s32.totalorder %v2722_v36, %v2661_v6 }
  0xc5   : > { %vm2714_vm8 = vmand %vm900_vm5, %vm4078_vm3  ;;  %v1910_v34 = vsel %vm2704_vm6, 1.0, %v4092_v33  ;;  %v2731_v39 = vpop.permute.xlu0 %842 }
  0xc6   : > { %v2724_v37 = vpop.permute.xlu1 %848  ;;  %v1911_v38 = vsel %vm2714_vm8, 1.0, %v4092_v33  ;;  %vm897_vm12 = vcmp.eq.s32.totalorder %v2731_v39, %v2677_v19  ;;  %vm898_vm13 = vcmp.eq.s32.totalorder %v2731_v39, %v2681_v21 }
  0xc7   : > { %vm901_vm11 = vcmp.eq.s32.totalorder %v2724_v37, %v2677_v19  ;;  %v1396_v41 = vadd.f32 %v1911_v38, %v1910_v34  ;;  %vm902_vm15 = vcmp.eq.s32.totalorder %v2724_v37, %v2681_v21  ;;  %vm2755_vm1 = vmand %vm897_vm12, %vm4094_vm9 }
  0xc8   : > { %vm2748_vm0 = vmand %vm901_vm11, %vm4076_vm7  ;;  %v1908_v49 = vsel %vm2755_vm1, 1.0, %v4092_v33  ;;  %vm4083_vm11 = vcmp.ne.s32.totalorder %v2722_v36, %v2675_v17 }
  0xc9   : > { %v4251_v42 = vsel %vm2748_vm0, 4294967295, %v4250_v42  ;;  %1397 = vadd.xlane.f32.xlu1 %v1396_v41  ;;  %vm2769_vm5 = vmand %vm898_vm13, %vm4091_vm10  ;;  %v1912_v11 = vsel %vm2748_vm0, 1.0, %v4092_v33  ;;  %v782_v41 = vadd.s32 48, %v2651_v63  ;;  %v2829_v20 = vpop.permute.xlu0 %869 }
  0xca   : > { %v2764_v46 = vpop.permute.xlu1 %851  ;;  %v1909_v0 = vsel %vm2769_vm5, 1.0, %v4092_v33  ;;  %vm2785_vm12 = vmand %vm902_vm15, %vm4077_vm14  ;;  %vm4090_vm14 = vcmp.ne.s32.totalorder %v2760_v44, %v2661_v6  ;;  %4267 = vst [vmem:[#allocation20_spill] sm:$0xff] %v2829_v20 }
  0xcb   : > { %v4258_v7 = vsel %vm2785_vm12, 4294967295, %v4257_v7  ;;  %vm903_vm13 = vcmp.eq.s32.totalorder %v2764_v46, %v2677_v19  ;;  %vm904_vm7 = vcmp.eq.s32.totalorder %v2764_v46, %v2681_v21  ;;  %v1393_v12 = vadd.f32 %v1909_v0, %v1908_v49 }
  0xcc   : > { %v1913_v14 = vsel %vm2785_vm12, 1.0, %v4092_v33  ;;  %vm2802_vm15 = vmand %vm903_vm13, %vm4084_vm4  ;;  %v2823_v0 = vadd.s32 %v2659_v5, %v781_v60  ;;  %v4268_v60 = vmov 0 }
  0xcd   : > { %v4260_v25 = vsel %vm2802_vm15, 4294967295, %v4259_v25  ;;  %vm2811_vm3 = vmand %vm904_vm7, %vm4083_vm11  ;;  %v1914_v34 = vsel %vm2802_vm15, 1.0, %v4092_v33  ;;  %1394 = vadd.xlane.f32.xlu0 %v1393_v12  ;;  %v1399_v38 = vadd.f32 %v1913_v14, %v1912_v11  ;;  %vm4089_vm7 = vcmp.ne.s32.totalorder %v2760_v44, %v2675_v17 }
  0xce   : > { %4261 = vst [vmem:[#allocation16_spill] sm:$0xff] %v4260_v25  ;;  %v4263_v31 = vsel %vm2811_vm3, 4294967295, %v4262_v31  ;;  %v1915_v49 = vsel %vm2811_vm3, 1.0, %v4092_v33  ;;  %4265 = vst [vmem:[#allocation18_spill] sm:$0xff] %v2823_v0  ;;  %v2825_v36 = vpop.permute.xlu1 %854  ;;  %v785_v12 = vadd.s32 72, %v2651_v63  ;;  %v4271_v11 = vmov 0 }
  0xcf   : > { %4264 = vst [vmem:[#allocation17_spill] sm:$0xff] %v4263_v31  ;;  %4266 = vst [vmem:[#allocation19_spill] sm:$0xff] %v2825_v36  ;;  %v1402_v22 = vadd.f32 %v1915_v49, %v1914_v34  ;;  %vm905_vm13 = vcmp.eq.s32.totalorder %v2825_v36, %v2677_v19  ;;  %vm906_vm11 = vcmp.eq.s32.totalorder %v2825_v36, %v2681_v21 }
  0xd0   : > { %vm2839_vm4 = vmand %vm905_vm13, %vm4090_vm14  ;;  %v2854_v34 = vadd.s32 %v2659_v5, %v782_v41  ;;  %vm4104_vm13 = vcmp.ne.s32.totalorder %v2823_v0, %v2661_v6  ;;  %v2867_v44 = vadd.s32 %v2659_v5, %v785_v12  ;;  %v787_v41 = vadd.s32 88, %v2651_v63  ;;  %v2882_v12 = vpop.permute.xlu0 %875 }
  0xd1   : > { %v4269_v60 = vsel %vm2839_vm4, 4294967295, %v4268_v60  ;;  %1403 = vadd.xlane.f32.xlu1 %v1402_v22  ;;  %1400 = vadd.xlane.f32.xlu0 %v1399_v38  ;;  %vm2846_vm2 = vmand %vm906_vm11, %vm4089_vm7  ;;  %v1916_v14 = vsel %vm2839_vm4, 1.0, %v4092_v33  ;;  %v783_v22 = vadd.s32 56, %v2651_v63  ;;  %4280 = vst [vmem:[#allocation27_spill] sm:$0xff] %v2882_v12 }
  0xd2   : > { %4270 = vst [vmem:[#allocation21_spill] sm:$0xff] %v4269_v60  ;;  %v4272_v11 = vsel %vm2846_vm2, 4294967295, %v4271_v11  ;;  %4274 = vst [vmem:[#allocation23_spill] sm:$0xff] %v2854_v34  ;;  %v2859_v38 = vpop.permute.xlu1 %857  ;;  %v1917_v49 = vsel %vm2846_vm2, 1.0, %v4092_v33  ;;  %v4277_v33 = vmov 0  ;;  %vm4113_vm9 = vcmp.ne.s32.totalorder %v2854_v34, %v2661_v6 }
  0xd3   : > { %4273 = vst [vmem:[#allocation22_spill] sm:$0xff] %v4272_v11  ;;  %4275 = vst [vmem:[#allocation24_spill] sm:$0xff] %v2859_v38  ;;  %v1405_v60 = vadd.f32 %v1917_v49, %v1916_v14  ;;  %vm907_vm7 = vcmp.eq.s32.totalorder %v2859_v38, %v2677_v19  ;;  %vm908_vm14 = vcmp.eq.s32.totalorder %v2859_v38, %v2681_v21  ;;  %v4282_v14 = vmov 0 }
  0xd4   : > { %4276 = vst [vmem:[#allocation25_spill] sm:$0xff] %v2867_v44  ;;  %vm2878_vm10 = vmand %vm907_vm7, %vm4104_vm13  ;;  %vm4281_vm2 = vcmp.ne.s32.totalorder %v2823_v0, %v2675_v17  ;;  %v4285_v49 = vmov 0.0   ;;  %v2899_v1 = vadd.s32 %v2659_v5, %v783_v22  ;;  %v2909_v0 = vadd.s32 %v2659_v5, %v787_v41 }
  0xd5   : > { %v4278_v33 = vsel %vm2878_vm10, 4294967295, %v4277_v33  ;;  %1406 = vadd.xlane.f32.xlu0 %v1405_v60  ;;  %vm2891_vm4 = vmand %vm908_vm14, %vm4281_vm2  ;;  %v1918_v11 = vsel %vm2878_vm10, 1.0, %v4285_v49  ;;  %v789_v38 = vadd.s32 104, %v2651_v63  ;;  %vm915_vm13 = vcmp.eq.s32.totalorder %v2829_v20, %v2677_v19 }
  0xd6   : > { %4279 = vst [vmem:[#allocation26_spill] sm:$0xff] %v4278_v33  ;;  %v4283_v14 = vsel %vm2891_vm4, 4294967295, %v4282_v14  ;;  %4286 = vst [vmem:[#allocation29_spill] sm:$0xff] %v2899_v1  ;;  %v2901_v60 = vpop.permute.xlu1 %860  ;;  %v1919_v15 = vsel %vm2891_vm4, 1.0, %v4285_v49  ;;  %v2926_v41 = vadd.s32 %v2659_v5, %v784_v57  ;;  %v786_v33 = vadd.s32 80, %v2651_v63 }
  0xd7   : > { %4284 = vst [vmem:[#allocation28_spill] sm:$0xff] %v4283_v14  ;;  %4287 = vst [vmem:[#allocation30_spill] sm:$0xff] %v2901_v60  ;;  %vm909_vm2 = vcmp.eq.s32.totalorder %v2901_v60, %v2677_v19  ;;  %vm910_vm14 = vcmp.eq.s32.totalorder %v2901_v60, %v2681_v21  ;;  %v1408_v22 = vadd.f32 %v1919_v15, %v1918_v11  ;;  %v4289_v14 = vmov 0 }
  0xd8   : > { %4288 = vst [vmem:[#allocation31_spill] sm:$0xff] %v2909_v0  ;;  %vm2921_vm11 = vmand %vm909_vm2, %vm4113_vm9  ;;  %vm4121_vm7 = vcmp.ne.s32.totalorder %v2867_v44, %v2675_v17  ;;  %vm4293_vm10 = vcmp.ne.s32.totalorder %v2854_v34, %v2675_v17  ;;  %v4294_v15 = vmov 0  ;;  %v791_v11 = vadd.s32 120, %v2651_v63 }
  0xd9   : > { %v4290_v14 = vsel %vm2921_vm11, 4294967295, %v4289_v14  ;;  %4292 = vst [vmem:[#allocation33_spill] sm:$0xff] %v2926_v41  ;;  %vm2936_vm3 = vmand %vm910_vm14, %vm4293_vm10  ;;  %v1920_v57 = vsel %vm2921_vm11, 1.0, %v4285_v49  ;;  %1409 = vadd.xlane.f32.xlu1 %v1408_v22  ;;  %vm4298_vm14 = vcmp.ne.s32.totalorder %v2867_v44, %v2661_v6  ;;  %v2960_v22 = vpop.permute.xlu0 %881  ;;  %v2965_v36 = vadd.s32 %v2659_v5, %v789_v38 }
  0xda   : > { %4291 = vst [vmem:[#allocation32_spill] sm:$0xff] %v4290_v14  ;;  %v4295_v15 = vsel %vm2936_vm3, 4294967295, %v4294_v15  ;;  %v2946_v60 = vpop.permute.xlu1 %863  ;;  %v1921_v34 = vsel %vm2936_vm3, 1.0, %v4285_v49  ;;  %vm2956_vm9 = vmand %vm915_vm13, %vm4298_vm14  ;;  %v4299_v14 = vmov 0  ;;  %vm4303_vm13 = vcmp.eq.s32.totalorder %v2829_v20, %v2681_v21 }
  0xdb   : > { %4296 = vst [vmem:[#allocation34_spill] sm:$0xff] %v4295_v15  ;;  %4297 = vst [vmem:[#allocation35_spill] sm:$0xff] %v2946_v60  ;;  %v4300_v14 = vsel %vm2956_vm9, 4294967295, %v4299_v14  ;;  %v1411_v15 = vadd.f32 %v1921_v34, %v1920_v57  ;;  %vm911_vm4 = vcmp.eq.s32.totalorder %v2946_v60, %v2677_v19  ;;  %vm912_vm10 = vcmp.eq.s32.totalorder %v2946_v60, %v2681_v21 }
  0xdc   : > { %4301 = vst [vmem:[#allocation36_spill] sm:$0xff] %v2960_v22  ;;  %4302 = vst [vmem:[#allocation37_spill] sm:$0xff] %v2965_v36  ;;  %v2986_v34 = vadd.s32 %v2659_v5, %v786_v33  ;;  %vm4307_vm11 = vcmp.ne.s32.totalorder %v2899_v1, %v2661_v6  ;;  %v4308_v38 = vmov 0  ;;  %vm4311_vm2 = vcmp.ne.s32.totalorder %v2899_v1, %v2675_v17 }
  0xdd   : > { %vm2977_vm14 = vmand %vm4303_vm13, %vm4121_vm7  ;;  %vm4137_vm13 = vcmp.ne.s32.totalorder %v2909_v0, %v2675_v17  ;;  %1412 = vadd.xlane.f32.xlu0 %v1411_v15  ;;  %v4312_v33 = vmov 0  ;;  %v788_v20 = vadd.s32 96, %v2651_v63  ;;  %v3013_v60 = vadd.s32 %v2659_v5, %v791_v11 }
  0xde   : > { %v4305_v2 = vsel %vm2977_vm14, 4294967295, %v4304_v2  ;;  %4306 = vst [vmem:[#allocation38_spill] sm:$0xff] %v2986_v34  ;;  %vm2991_vm15 = vmand %vm911_vm4, %vm4307_vm11  ;;  %v3015_v15 = vpop.permute.xlu1 %866  ;;  %v1926_v1 = vsel %vm2956_vm9, 1.0, %v4285_v49  ;;  %vm4317_vm4 = vcmp.ne.s32.totalorder %v2909_v0, %v2661_v6  ;;  %vm4318_vm11 = vcmp.eq.s32.totalorder %v2882_v12, %v2677_v19 }
  0xdf   : > { %v4309_v38 = vsel %vm2991_vm15, 4294967295, %v4308_v38  ;;  %vm3004_vm12 = vmand %vm912_vm10, %vm4311_vm2  ;;  %v1922_v57 = vsel %vm2991_vm15, 1.0, %v4285_v49  ;;  %4315 = vst [vmem:[#allocation41_spill] sm:$0xff] %v3013_v60  ;;  %v4319_v11 = vmov 0  ;;  %vm913_vm3 = vcmp.eq.s32.totalorder %v3015_v15, %v2677_v19 }
  0xe0   : > { %4310 = vst [vmem:[#allocation39_spill] sm:$0xff] %v4309_v38  ;;  %v4313_v33 = vsel %vm3004_vm12, 4294967295, %v4312_v33  ;;  %4316 = vst [vmem:[#allocation42_spill] sm:$0xff] %v3015_v15  ;;  %v1923_v44 = vsel %vm3004_vm12, 1.0, %v4285_v49  ;;  %v1927_v38 = vsel %vm2977_vm14, 1.0, %v4285_v49  ;;  %vm914_vm7 = vcmp.eq.s32.totalorder %v3015_v15, %v2681_v21 }
  0xe1   : > { %4314 = vst [vmem:[#allocation40_spill] sm:$0xff] %v4313_v33  ;;  %vm3032_vm2 = vmand %vm4318_vm11, %vm4317_vm4  ;;  %v1414_v33 = vadd.f32 %v1923_v44, %v1922_v57  ;;  %vm4322_vm12 = vcmp.eq.s32.totalorder %v2882_v12, %v2681_v21  ;;  %vm923_vm11 = vcmp.eq.s32.totalorder %v2960_v22, %v2677_v19  ;;  %vm4326_vm10 = vcmp.ne.s32.totalorder %v2926_v41, %v2661_v6  ;;  %v3065_v44 = vpop.permute.xlu0 %887 }
  0xe2   : > { %v4320_v11 = vsel %vm3032_vm2, 4294967295, %v4319_v11  ;;  %vm3048_vm4 = vmand %vm4322_vm12, %vm4137_vm13  ;;  %4329 = vst [vmem:[#allocation45_spill] sm:$0xff] %v3065_v44  ;;  %v4331_v57 = vmov 0  ;;  %v3082_v15 = vadd.s32 %v2659_v5, %v788_v20  ;;  %v790_v0 = vadd.s32 112, %v2651_v63  ;;  %v3085_v16 = vpop.permute.xlu1 %872 }
  0xe3   : > { %4321 = vst [vmem:[#allocation43_spill] sm:$0xff] %v4320_v11  ;;  %v4324_v54 = vsel %vm3048_vm4, 4294967295, %v4323_v54  ;;  %vm3057_vm15 = vmand %vm913_vm3, %vm4326_vm10  ;;  %vm4330_vm3 = vcmp.ne.s32.totalorder %v2926_v41, %v2675_v17  ;;  %1415 = vadd.xlane.f32.xlu1 %v1414_v33  ;;  %v1420_v55 = vadd.f32 %v1927_v38, %v1926_v1  ;;  %v1930_v31 = vsel %vm3032_vm2, 1.0, %v4285_v49 }
  0xe4   : > { %4325 = vst [vmem:[#allocation44_spill] sm:$0xff] %v4324_v54  ;;  %v4328_v27 = vsel %vm3057_vm15, 4294967295, %v4327_v27  ;;  %vm3074_vm10 = vmand %vm914_vm7, %vm4330_vm3  ;;  %v1924_v12 = vsel %vm3057_vm15, 1.0, %v4285_v49  ;;  %v1931_v33 = vsel %vm3048_vm4, 1.0, %v4285_v49  ;;  %vm4335_vm7 = vcmp.ne.s32.totalorder %v2965_v36, %v2661_v6 }
  0xe5   : > { %v4332_v57 = vsel %vm3074_vm10, 4294967295, %v4331_v57  ;;  %4333 = vst [vmem:[#allocation46_spill] sm:$0xff] %v3082_v15  ;;  %4334 = vst [vmem:[#allocation47_spill] sm:$0xff] %v3085_v16  ;;  %v1925_v41 = vsel %vm3074_vm10, 1.0, %v4285_v49  ;;  %v4336_v63 = vmov 0  ;;  %vm917_vm0 = vcmp.eq.s32.totalorder %v3085_v16, %v2677_v19 }
  0xe6   : > { %vm3102_vm3 = vmand %vm923_vm11, %vm4335_vm7  ;;  %v1417_v1 = vadd.f32 %v1925_v41, %v1924_v12  ;;  %vm918_vm13 = vcmp.eq.s32.totalorder %v3085_v16, %v2681_v21  ;;  %vm4339_vm4 = vcmp.ne.s32.totalorder %v2965_v36, %v2675_v17  ;;  %vm4340_vm11 = vcmp.eq.s32.totalorder %v2960_v22, %v2681_v21 }
  0xe7   : > { %v4337_v63 = vsel %vm3102_vm3, 4294967295, %v4336_v63  ;;  %vm3120_vm7 = vmand %vm4340_vm11, %vm4339_vm4  ;;  %v4341_v20 = vmov 0  ;;  %vm4344_vm14 = vcmp.ne.s32.totalorder %v2986_v34, %v2661_v6  ;;  %v4345_v12 = vmov 0  ;;  %1421 = vadd.xlane.f32.xlu1 %v1420_v55 }
  0xe8   : > { %4338 = vst [vmem:[#allocation48_spill] sm:$0xff] %v4337_v63  ;;  %v4342_v20 = vsel %vm3120_vm7, 4294967295, %v4341_v20  ;;  %vm3127_vm2 = vmand %vm917_vm0, %vm4344_vm14  ;;  %vm4164_vm9 = vcmp.ne.s32.totalorder %v3013_v60, %v2675_v17  ;;  %1418 = vadd.xlane.f32.xlu0 %v1417_v1  ;;  %vm4348_vm4 = vcmp.ne.s32.totalorder %v2986_v34, %v2675_v17  ;;  %v4349_v41 = vmov 0  ;;  %v3150_v1 = vpop.permute.xlu1 %878 }
  0xe9   : > { %4343 = vst [vmem:[#allocation49_spill] sm:$0xff] %v4342_v20  ;;  %v4346_v12 = vsel %vm3127_vm2, 4294967295, %v4345_v12  ;;  %vm3138_vm11 = vmand %vm918_vm13, %vm4348_vm4  ;;  %v1928_v38 = vsel %vm3127_vm2, 1.0, %v4285_v49  ;;  %v3148_v22 = vadd.s32 %v2659_v5, %v790_v0  ;;  %v1426_v16 = vadd.f32 %v1931_v33, %v1930_v31 }
  0xea   : > { %4347 = vst [vmem:[#allocation50_spill] sm:$0xff] %v4346_v12  ;;  %v4350_v41 = vsel %vm3138_vm11, 4294967295, %v4349_v41  ;;  %4353 = vst [vmem:[#allocation53_spill] sm:$0xff] %v3150_v1  ;;  %v1929_v36 = vsel %vm3138_vm11, 1.0, %v4285_v49  ;;  %v1934_v34 = vsel %vm3102_vm3, 1.0, %v4285_v49  ;;  %v1935_v5 = vsel %vm3120_vm7, 1.0, %v4285_v49 }
  0xeb   : > { %4351 = vst [vmem:[#allocation51_spill] sm:$0xff] %v4350_v41  ;;  %4352 = vst [vmem:[#allocation52_spill] sm:$0xff] %v3148_v22  ;;  %vm4354_vm13 = vcmp.ne.s32.totalorder %v3013_v60, %v2661_v6  ;;  %vm4355_vm4 = vcmp.eq.s32.totalorder %v3065_v44, %v2677_v19  ;;  %v4356_v55 = vmov 0  ;;  %v1423_v31 = vadd.f32 %v1929_v36, %v1928_v38  ;;  %1427 = vadd.xlane.f32.xlu1 %v1426_v16 }
  0xec   : > { %vm3169_vm0 = vmand %vm4355_vm4, %vm4354_vm13  ;;  %vm921_vm14 = vcmp.eq.s32.totalorder %v3150_v1, %v2677_v19  ;;  %vm922_vm12 = vcmp.eq.s32.totalorder %v3150_v1, %v2681_v21  ;;  %vm4359_vm7 = vcmp.eq.s32.totalorder %v3065_v44, %v2681_v21  ;;  %v4360_v0 = vmov 0  ;;  %v3206_v1 = vpop.permute.xlu1 %884 }
  0xed   : > { %v4357_v55 = vsel %vm3169_vm0, 4294967295, %v4356_v55  ;;  %vm3183_vm3 = vmand %vm4359_vm7, %vm4164_vm9  ;;  %vm4363_vm13 = vcmp.ne.s32.totalorder %v3082_v15, %v2661_v6  ;;  %v4364_v36 = vmov 0  ;;  %1424 = vadd.xlane.f32.xlu0 %v1423_v31  ;;  %vm4367_vm11 = vcmp.ne.s32.totalorder %v3082_v15, %v2675_v17  ;;  %4371 = vst [vmem:[#allocation58_spill] sm:$0xff] %v3206_v1 }
  0xee   : > { %4358 = vst [vmem:[#allocation54_spill] sm:$0xff] %v4357_v55  ;;  %v4361_v0 = vsel %vm3183_vm3, 4294967295, %v4360_v0  ;;  %vm3190_vm4 = vmand %vm921_vm14, %vm4363_vm13  ;;  %v4368_v33 = vmov 0  ;;  %vm4195_vm7 = vcmp.ne.s32.totalorder %v3148_v22, %v2661_v6  ;;  %v1432_v44 = vadd.f32 %v1935_v5, %v1934_v34 }
  0xef   : > { %4362 = vst [vmem:[#allocation55_spill] sm:$0xff] %v4361_v0  ;;  %v4365_v36 = vsel %vm3190_vm4, 4294967295, %v4364_v36  ;;  %vm3197_vm2 = vmand %vm922_vm12, %vm4367_vm11  ;;  %v1932_v38 = vsel %vm3190_vm4, 1.0, %v4285_v49  ;;  %vm4196_vm12 = vcmp.ne.s32.totalorder %v3148_v22, %v2675_v17  ;;  %v1938_v60 = vsel %vm3169_vm0, 1.0, %v4285_v49 }
  0xf0   : > { %4366 = vst [vmem:[#allocation56_spill] sm:$0xff] %v4365_v36  ;;  %v4369_v33 = vsel %vm3197_vm2, 4294967295, %v4368_v33  ;;  %v1933_v31 = vsel %vm3197_vm2, 1.0, %v4285_v49  ;;  %v1939_v15 = vsel %vm3183_vm3, 1.0, %v4285_v49  ;;  %vm925_vm11 = vcmp.eq.s32.totalorder %v3206_v1, %v2677_v19  ;;  %1433 = vadd.xlane.f32.xlu1 %v1432_v44 }
  0xf1   : > { %4370 = vst [vmem:[#allocation57_spill] sm:$0xff] %v4369_v33  ;;  %vm926_vm14 = vcmp.eq.s32.totalorder %v3206_v1, %v2681_v21  ;;  %v1429_v16 = vadd.f32 %v1933_v31, %v1932_v38  ;;  %vm3226_vm13 = vmand %vm925_vm11, %vm4195_vm7  ;;  %v4372_v34 = vmov 0  ;;  %v4375_v5 = vmov 0 }
  0xf2   : > { %v4373_v34 = vsel %vm3226_vm13, 4294967295, %v4372_v34  ;;  %vm3233_vm9 = vmand %vm926_vm14, %vm4196_vm12  ;;  %v1936_v19 = vsel %vm3226_vm13, 1.0, %v4285_v49  ;;  %v1438_v21 = vadd.f32 %v1939_v15, %v1938_v60  ;;  %vm1250_vm11 = vcmp.ge.s32.totalorder %v2507_v3, 0 }
  0xf3   : > { %4374 = vst [vmem:[#allocation59_spill] sm:$0xff] %v4373_v34  ;;  %1430 = vadd.xlane.f32.xlu0 %v1429_v16  ;;  %v4376_v5 = vsel %vm3233_vm9, 4294967295, %v4375_v5  ;;  %v1937_v38 = vsel %vm3233_vm9, 1.0, %v4285_v49  ;;  %vm1266_vm14 = vcmp.lt.s32.totalorder %v2507_v3, 128  ;;  %vm1249_vm12 = vcmp.ge.s32.totalorder %v2524_v9, 0 }
  0xf4   : > { %4377 = vst [vmem:[#allocation60_spill] sm:$0xff] %v4376_v5  ;;  %v1435_v31 = vadd.f32 %v1937_v38, %v1936_v19  ;;  %1439 = vadd.xlane.f32.xlu1 %v1438_v21  ;;  %vm1282_vm7 = vmand %vm1250_vm11, %vm1266_vm14  ;;  %vm1265_vm3 = vcmp.lt.s32.totalorder %v2524_v9, 128  ;;  %vm1252_vm0 = vcmp.ge.s32.totalorder %v2532_v10, 0  ;;  %vm1268_vm9 = vcmp.lt.s32.totalorder %v2532_v10, 128 }
  0xf5   : > { %vm1281_vm13 = vmand %vm1249_vm12, %vm1265_vm3  ;;  %vm1251_vm2 = vcmp.ge.s32.totalorder %v2521_v8, 0  ;;  %vm1267_vm4 = vcmp.lt.s32.totalorder %v2521_v8, 128  ;;  %vm1253_vm14 = vcmp.ge.s32.totalorder %v2545_v4, 0  ;;  %vm1269_vm10 = vcmp.lt.s32.totalorder %v2545_v4, 128 }
  0xf6   : > { %vm1283_vm11 = vmand %vm1251_vm2, %vm1267_vm4  ;;  %vm1254_vm2 = vcmp.ge.s32.totalorder %v2561_v23, 0  ;;  %vm1270_vm3 = vcmp.lt.s32.totalorder %v2561_v23, 128  ;;  %vm1255_vm4 = vcmp.ge.s32.totalorder %v2575_v29, 0 }
  0xf7   : > { %1436 = vadd.xlane.f32.xlu0 %v1435_v31 }
 0x123   : > { %v3243_v16 = vpop.f32.mrb[0].mxu0  ;;  %v3245_v1 = vpop.f32.mrb[0].mxu1 }
 0x124   : > { %v3247_v22 = vpop.f32.mrb[1].mxu0  ;;  %v3249_v0 = vpop.f32.mrb[1].mxu1 }
 0x125   : > { %v660_v55 = vmax.f32 %v3243_v16, %v3247_v22  ;;  %v684_v60 = vmax.f32 %v3245_v1, %v3249_v0 }
 0x127   : > { %v3255_v15 = vpop.f32.mrb[2].mxu0  ;;  %661 = vmax.xlane.f32.xlu0 %v660_v55  ;;  %v3257_v44 = vpop.f32.mrb[2].mxu1 }
 0x128   : > { %v3259_v19 = vpop.f32.mrb[3].mxu0  ;;  %v3261_v21 = vpop.f32.mrb[3].mxu1 }
 0x129   : > { %v663_v38 = vmax.f32 %v3255_v15, %v3259_v19  ;;  %v687_v31 = vmax.f32 %v3257_v44, %v3261_v21 }
 0x12b   : > { %v3267_v5 = vpop.f32.mrb[4].mxu0  ;;  %685 = vmax.xlane.f32.xlu0 %v684_v60  ;;  %664 = vmax.xlane.f32.xlu1 %v663_v38  ;;  %v3269_v34 = vpop.f32.mrb[4].mxu1 }
 0x12c   : > { %v3271_v20 = vpop.f32.mrb[5].mxu0  ;;  %v3273_v55 = vpop.f32.mrb[5].mxu1 }
 0x12d   : > { %v666_v63 = vmax.f32 %v3267_v5, %v3271_v20  ;;  %v690_v33 = vmax.f32 %v3269_v34, %v3273_v55 }
 0x12f   : > { %v3279_v36 = vpop.f32.mrb[6].mxu0  ;;  %667 = vmax.xlane.f32.xlu0 %v666_v63  ;;  %688 = vmax.xlane.f32.xlu1 %v687_v31  ;;  %v3281_v17 = vpop.f32.mrb[6].mxu1 }
 0x130   : > { %4378 = vst [vmem:[#allocation61_spill] sm:$0xff] %v3279_v36  ;;  %4379 = vst [vmem:[#allocation62_spill] sm:$0xff] %v3281_v17  ;;  %v3283_v60 = vpop.f32.mrb[7].mxu0  ;;  %v3285_v38 = vpop.f32.mrb[7].mxu1 }
 0x131   : > { %4380 = vst [vmem:[#allocation63_spill] sm:$0xff] %v3283_v60  ;;  %4381 = vst [vmem:[#allocation64_spill] sm:$0xff] %v3285_v38  ;;  %v669_v54 = vmax.f32 %v3279_v36, %v3283_v60  ;;  %v693_v11 = vmax.f32 %v3281_v17, %v3285_v38 }
 0x133   : > { %v3291_v25 = vpop.f32.mrb[8].mxu0  ;;  %691 = vmax.xlane.f32.xlu0 %v690_v33  ;;  %670 = vmax.xlane.f32.xlu1 %v669_v54  ;;  %v3293_v56 = vpop.f32.mrb[8].mxu1 }
 0x134   : > { %4382 = vst [vmem:[#allocation65_spill] sm:$0xff] %v3291_v25  ;;  %4383 = vst [vmem:[#allocation66_spill] sm:$0xff] %v3293_v56  ;;  %v3295_v63 = vpop.f32.mrb[9].mxu0  ;;  %v3297_v31 = vpop.f32.mrb[9].mxu1 }
 0x135   : > { %4384 = vst [vmem:[#allocation67_spill] sm:$0xff] %v3295_v63  ;;  %4385 = vst [vmem:[#allocation68_spill] sm:$0xff] %v3297_v31  ;;  %v672_v41 = vmax.f32 %v3291_v25, %v3295_v63  ;;  %v696_v12 = vmax.f32 %v3293_v56, %v3297_v31 }
 0x137   : > { %v3303_v60 = vpop.f32.mrb[10].mxu0  ;;  %673 = vmax.xlane.f32.xlu0 %v672_v41  ;;  %694 = vmax.xlane.f32.xlu1 %v693_v11  ;;  %v3305_v38 = vpop.f32.mrb[10].mxu1 }
 0x138   : > { %4386 = vst [vmem:[#allocation69_spill] sm:$0xff] %v3303_v60  ;;  %4387 = vst [vmem:[#allocation70_spill] sm:$0xff] %v3305_v38  ;;  %v3307_v33 = vpop.f32.mrb[11].mxu0  ;;  %v3309_v54 = vpop.f32.mrb[11].mxu1 }
 0x139   : > { %4388 = vst [vmem:[#allocation71_spill] sm:$0xff] %v3307_v33  ;;  %4389 = vst [vmem:[#allocation72_spill] sm:$0xff] %v3309_v54  ;;  %v675_v17 = vmax.f32 %v3303_v60, %v3307_v33  ;;  %v699_v36 = vmax.f32 %v3305_v38, %v3309_v54 }
 0x13b   : > { %v3315_v63 = vpop.f32.mrb[12].mxu0  ;;  %697 = vmax.xlane.f32.xlu0 %v696_v12  ;;  %676 = vmax.xlane.f32.xlu1 %v675_v17  ;;  %v3317_v31 = vpop.f32.mrb[12].mxu1 }
 0x13c   : > { %v3319_v41 = vpop.f32.mrb[13].mxu0  ;;  %v3321_v11 = vpop.f32.mrb[13].mxu1 }
 0x13d   : > { %4390 = vst [vmem:[#allocation73_spill] sm:$0xff] %v3321_v11  ;;  %v678_v56 = vmax.f32 %v3315_v63, %v3319_v41  ;;  %v702_v25 = vmax.f32 %v3317_v31, %v3321_v11 }
 0x13f   : > { %v3327_v33 = vpop.f32.mrb[14].mxu0  ;;  %679 = vmax.xlane.f32.xlu0 %v678_v56  ;;  %700 = vmax.xlane.f32.xlu1 %v699_v36  ;;  %v3329_v54 = vpop.f32.mrb[14].mxu1  ;;  %v3344_v56 = vsel %vm1282_vm7, 1.0, %v4285_v49  ;;  %vm1284_vm7 = vmand %vm1252_vm0, %vm1268_vm9 }
 0x140   : > { %v3331_v12 = vpop.f32.mrb[15].mxu0  ;;  %v3333_v17 = vpop.f32.mrb[15].mxu1  ;;  %4391 = vst [vmem:[#allocation74_spill] sm:$0xff] %v3344_v56  ;;  %vm1285_vm9 = vmand %vm1253_vm14, %vm1269_vm10  ;;  %vm1271_vm10 = vcmp.lt.s32.totalorder %v2575_v29, 128  ;;  %vm1273_vm14 = vcmp.lt.s32.totalorder %v2599_v40, 128 }
 0x141   : > { %v681_v38 = vmax.f32 %v3327_v33, %v3331_v12  ;;  %v705_v60 = vmax.f32 %v3329_v54, %v3333_v17  ;;  %vm1286_vm0 = vmand %vm1254_vm2, %vm1270_vm3  ;;  %vm1258_vm2 = vcmp.ge.s32.totalorder %v2538_v13, 0  ;;  %vm1274_vm3 = vcmp.lt.s32.totalorder %v2538_v13, 128 }
 0x142   : > { %v3384_v23 = vsel %vm1286_vm0, 1.0, %v4285_v49  ;;  %vm1287_vm12 = vmand %vm1255_vm4, %vm1271_vm10  ;;  %vm1259_vm10 = vcmp.ge.s32.totalorder %v2609_v45, 0 }
 0x143   : > { %703 = vmax.xlane.f32.xlu0 %v702_v25  ;;  %682 = vmax.xlane.f32.xlu1 %v681_v38  ;;  %v3354_v25 = vsel %vm1281_vm13, 1.0, %v4285_v49  ;;  %v3362_v38 = vsel %vm1284_vm7, 1.0, %v4285_v49  ;;  %4397 = vst [vmem:[#allocation80_spill] sm:$0xff] %v3384_v23  ;;  %vm1256_vm13 = vcmp.ge.s32.totalorder %v2589_v35, 0  ;;  %vm1272_vm7 = vcmp.lt.s32.totalorder %v2589_v35, 128  ;;  %vm1290_vm4 = vmand %vm1258_vm2, %vm1274_vm3 }
 0x144   : > { %4393 = vst [vmem:[#allocation76_spill] sm:$0xff] %v3354_v25  ;;  %4395 = vst [vmem:[#allocation78_spill] sm:$0xff] %v3362_v38  ;;  %vm1262_vm2 = vcmp.ge.s32.totalorder %v2564_v24, 0  ;;  %vm1278_vm3 = vcmp.lt.s32.totalorder %v2564_v24, 128 }
 0x147   : > { %706 = vmax.xlane.f32.xlu1 %v705_v60 }
 0x156   : > { %v1398_v36 = vpop.xlane.xlu1 %1397 }
 0x157   : > { %v1570_v11 = vmul.f32 0.05, %v1398_v36 }
 0x159   : > { %v3351_v3 = vadd.f32 %v3344_v56, %v1570_v11  ;;  %v3365_v11 = vsel %vm1283_vm11, 1.0, %v4285_v49  ;;  %vm1257_vm11 = vcmp.ge.s32.totalorder %v2599_v40, 0 }
 0x15a   : > { %v1395_v9 = vpop.xlane.xlu0 %1394  ;;  %vm1289_vm0 = vmand %vm1257_vm11, %vm1273_vm14  ;;  %vm1261_vm11 = vcmp.ge.s32.totalorder %v2617_v48, 0  ;;  %vm1277_vm14 = vcmp.lt.s32.totalorder %v2617_v48, 128 }
 0x15b   : > { %4392 = vst [vmem:[#allocation75_spill] sm:$0xff] %v3351_v3  ;;  %v1569_v60 = vmul.f32 0.05, %v1395_v9  ;;  %v3412_v40 = vsel %vm1289_vm0, 1.0, %v4285_v49  ;;  %vm1293_vm0 = vmand %vm1261_vm11, %vm1277_vm14  ;;  %vm4419_vm11 = vnez %v4305_v2  ;;  %vm4420_vm14 = vnez %v4251_v42 }
 0x15c   : > { %4403 = vst [vmem:[#allocation86_spill] sm:$0xff] %v3412_v40 }
 0x15d   : > { %v3359_v10 = vadd.f32 %v3354_v25, %v1569_v60  ;;  %v3376_v60 = vsel %vm1285_vm9, 1.0, %v4285_v49  ;;  %vm1288_vm9 = vmand %vm1256_vm13, %vm1272_vm7  ;;  %vm1260_vm13 = vcmp.ge.s32.totalorder %v2548_v18, 0  ;;  %vm1276_vm7 = vcmp.lt.s32.totalorder %v2548_v18, 128 }
 0x15e   : > { %v1404_v8 = vpop.xlane.xlu1 %1403  ;;  %v1401_v36 = vpop.xlane.xlu0 %1400  ;;  %4396 = vst [vmem:[#allocation79_spill] sm:$0xff] %v3376_v60  ;;  %v3402_v35 = vsel %vm1288_vm9, 1.0, %v4285_v49  ;;  %vm1292_vm15 = vmand %vm1260_vm13, %vm1276_vm7  ;;  %vm961_vm13 = vcmp.eq.s32.totalorder %v2661_v6, %v2731_v39  ;;  %vm962_vm7 = vcmp.eq.s32.totalorder %v2661_v6, %v2689_v26 }
 0x15f   : > { %4394 = vst [vmem:[#allocation77_spill] sm:$0xff] %v3359_v10  ;;  %v1572_v56 = vmul.f32 0.05, %v1404_v8  ;;  %v1571_v3 = vmul.f32 0.05, %v1401_v36  ;;  %v3392_v36 = vsel %vm1287_vm12, 1.0, %v4285_v49 }
 0x160   : > { %4399 = vst [vmem:[#allocation82_spill] sm:$0xff] %v3392_v36  ;;  %4401 = vst [vmem:[#allocation84_spill] sm:$0xff] %v3402_v35  ;;  %vm1275_vm12 = vcmp.lt.s32.totalorder %v2609_v45, 128 }
 0x161   : > { %v3370_v4 = vadd.f32 %v3362_v38, %v1572_v56  ;;  %v3373_v9 = vadd.f32 %v3365_v11, %v1571_v3  ;;  %vm1291_vm9 = vmand %vm1259_vm10, %vm1275_vm12  ;;  %vm1264_vm10 = vcmp.ge.s32.totalorder %v2578_v30, 0  ;;  %vm1280_vm12 = vcmp.lt.s32.totalorder %v2578_v30, 128 }
 0x162   : > { %v1407_v25 = vpop.xlane.xlu0 %1406 }
 0x163   : > { %v1573_v10 = vmul.f32 0.05, %v1407_v25 }
 0x165   : > { %v3381_v8 = vadd.f32 %v3376_v60, %v1573_v10 }
 0x166   : > { %v1410_v56 = vpop.xlane.xlu1 %1409 }
 0x167   : > { %v1574_v3 = vmul.f32 0.05, %v1410_v56 }
 0x169   : > { %v3389_v25 = vadd.f32 %v3384_v23, %v1574_v3 }
 0x16a   : > { %v1413_v29 = vpop.xlane.xlu0 %1412 }
 0x16b   : > { %4398 = vst [vmem:[#allocation81_spill] sm:$0xff] %v3389_v25  ;;  %v1575_v10 = vmul.f32 0.05, %v1413_v29 }
 0x16d   : > { %v3399_v56 = vadd.f32 %v3392_v36, %v1575_v10  ;;  %v3415_v10 = vsel %vm1290_vm4, 1.0, %v4285_v49  ;;  %vm1294_vm4 = vmand %vm1262_vm2, %vm1278_vm3  ;;  %vm964_vm2 = vcmp.eq.s32.totalorder %v2661_v6, %v2764_v46 }
 0x16e   : > { %4404 = vst [vmem:[#allocation87_spill] sm:$0xff] %v3415_v10 }
 0x16f   : > { %4400 = vst [vmem:[#allocation83_spill] sm:$0xff] %v3399_v56 }
 0x170   : > { %v1416_v3 = vpop.xlane.xlu1 %1415 }
 0x171   : > { %v1576_v23 = vmul.f32 0.05, %v1416_v3 }
 0x173   : > { %v3409_v13 = vadd.f32 %v3402_v35, %v1576_v23  ;;  %v3428_v35 = vsel %vm1291_vm9, 1.0, %v4285_v49  ;;  %vm4421_vm9 = vnez %v4258_v7 }
 0x174   : > { %v1422_v3 = vpop.xlane.xlu1 %1421  ;;  %4405 = vst [vmem:[#allocation88_spill] sm:$0xff] %v3428_v35 }
 0x175   : > { %4402 = vst [vmem:[#allocation85_spill] sm:$0xff] %v3409_v13  ;;  %v1419_v29 = vpop.xlane.xlu0 %1418  ;;  %v1578_v36 = vmul.f32 0.05, %v1422_v3  ;;  %v3431_v3 = vsel %vm1292_vm15, 1.0, %v4285_v49  ;;  %vm1296_vm15 = vmand %vm1264_vm10, %vm1280_vm12 }
 0x176   : > { %v1577_v45 = vmul.f32 0.05, %v1419_v29  ;;  %4406 = vst [vmem:[#allocation89_spill] sm:$0xff] %v3431_v3 }
 0x177   : > { %v3425_v23 = vadd.f32 %v3415_v10, %v1578_v36  ;;  %v3439_v36 = vsel %vm1293_vm0, 1.0, %v4285_v49 }
 0x178   : > { %v3422_v18 = vadd.f32 %v3412_v40, %v1577_v45  ;;  %v1428_v48 = vpop.xlane.xlu1 %1427  ;;  %4408 = vst [vmem:[#allocation91_spill] sm:$0xff] %v3439_v36 }
 0x179   : > { %v1580_v13 = vmul.f32 0.05, %v1428_v48 }
 0x17a   : > { %v1425_v60 = vpop.xlane.xlu0 %1424 }
 0x17b   : > { %v1579_v29 = vmul.f32 0.05, %v1425_v60  ;;  %v3442_v10 = vadd.f32 %v3431_v3, %v1580_v13  ;;  %v3445_v60 = vsel %vm1294_vm4, 1.0, %v4285_v49 }
 0x17c   : > { %4410 = vst [vmem:[#allocation93_spill] sm:$0xff] %v3445_v60 }
 0x17d   : > { %v3436_v24 = vadd.f32 %v3428_v35, %v1579_v29  ;;  %4409 = vst [vmem:[#allocation92_spill] sm:$0xff] %v3442_v10  ;;  %v1434_v40 = vpop.xlane.xlu1 %1433  ;;  %v2242_v10 = vld [vmem:[%s2358_s17] sm:$0xff] }
 0x17e   : > { %v1582_v56 = vmul.f32 0.05, %v1434_v40 }
 0x17f   : > { %4407 = vst [vmem:[#allocation90_spill] sm:$0xff] %v3436_v24  ;;  %v3454_v24 = vsel %vm1296_vm15, 1.0, %v4285_v49 }
 0x180   : > { %v1431_v45 = vpop.xlane.xlu0 %1430  ;;  %v3451_v29 = vadd.f32 %v3445_v60, %v1582_v56  ;;  %4413 = vst [vmem:[#allocation96_spill] sm:$0xff] %v3454_v24 }
 0x181   : > { %v1581_v48 = vmul.f32 0.05, %v1431_v45  ;;  %v1440_v35 = vpop.xlane.xlu1 %1439 }
 0x182   : > { %4412 = vst [vmem:[#allocation95_spill] sm:$0xff] %v3451_v29  ;;  %v1584_v38 = vmul.f32 0.05, %v1440_v35 }
 0x183   : > { %v3448_v30 = vadd.f32 %v3439_v36, %v1581_v48 }
 0x184   : > { %v3457_v13 = vadd.f32 %v3454_v24, %v1584_v38  ;;  %v3459_v3 = vpop.xlane.xlu0 %1436 }
 0x185   : > { %4411 = vst [vmem:[#allocation94_spill] sm:$0xff] %v3448_v30  ;;  %4415 = vst [vmem:[#allocation98_spill] sm:$0xff] %v3459_v3 }
 0x186   : > { %4414 = vst [vmem:[#allocation97_spill] sm:$0xff] %v3457_v13 }
 0x1b4   : > { %v662_v45 = vpop.xlane.xlu0 %661 }
 0x1b5   : > { %v708_v40 = vmax.f32 %v2629_v51, %v662_v45 }
 0x1b7   : > { %v724_v48 = vsub.f32 %v2242_v10, %v708_v40  ;;  %v740_v56 = vsub.f32 %v3243_v16, %v708_v40  ;;  %v741_v60 = vsub.f32 %v3247_v22, %v708_v40  ;;  %v2243_v16 = vld [vmem:[%s2358_s17 + $0x40] sm:$0xff]  ;;  %v2244_v40 = vld [vmem:[%s2358_s17 + $0x8] sm:$0xff] }
 0x1b8   : > { %v665_v36 = vpop.xlane.xlu1 %664  ;;  %v686_v29 = vpop.xlane.xlu0 %685 }
 0x1b9   : > { %v709_v38 = vmax.f32 %v2633_v53, %v665_v36  ;;  %v716_v35 = vmax.f32 %v2645_v59, %v686_v29  ;;  %v1441_v24 = vsel %vm961_vm13, %v724_v48, 0.0  ;;  %v1489_v51 = vsel %vm2755_vm1, %v740_v56, 0.0 }
 0x1ba   : > { %1457 = vadd.xlane.f32.xlu0 %v1441_v24  ;;  %v1490_v10 = vsel %vm2769_vm5, %v741_v60, 0.0  ;;  %v977_v22 = vmul.f32 1.442695, %v724_v48  ;;  %v1009_v36 = vmul.f32 1.442695, %v740_v56  ;;  %vm4416_vm1 = vnez %v4328_v27  ;;  %v2246_v27 = vld [vmem:[%s2358_s17 + $0x50] sm:$0xff] }
 0x1bb   : > { %v3474_v45 = vsub.f32 %v2243_v16, %v716_v35  ;;  %v725_v13 = vsub.f32 %v2244_v40, %v709_v38  ;;  %v1521_v30 = vadd.f32 %v1490_v10, %v1489_v51  ;;  %v742_v53 = vsub.f32 %v3255_v15, %v709_v38  ;;  %v2247_v40 = vld [vmem:[%s2358_s17 + $0x10] sm:$0xff] }
 0x1bc   : > { %v689_v39 = vpop.xlane.xlu1 %688  ;;  %v668_v49 = vpop.xlane.xlu0 %667  ;;  %v743_v59 = vsub.f32 %v3259_v19, %v709_v38  ;;  %v756_v43 = vsub.f32 %v3245_v1, %v716_v35  ;;  %v1011_v29 = vmul.f32 1.442695, %v741_v60  ;;  %2082 = vpow2.f32 %v977_v22 }
 0x1bd   : > { %v717_v47 = vmax.f32 %v2643_v58, %v689_v39  ;;  %v1442_v24 = vsel %vm962_vm7, %v725_v13, 0.0  ;;  %v993_v48 = vmul.f32 1.442695, %v3474_v45  ;;  %v1491_v26 = vsel %vm2704_vm6, %v742_v53, 0.0 }
 0x1be   : > { %1459 = vadd.xlane.f32.xlu1 %v1442_v24  ;;  %1522 = vadd.xlane.f32.xlu0 %v1521_v30  ;;  %v1492_v15 = vsel %vm2714_vm8, %v743_v59, 0.0  ;;  %v710_v19 = vmax.f32 %v2627_v50, %v668_v49  ;;  %v757_v56 = vsub.f32 %v3249_v0, %v716_v35  ;;  %v1505_v60 = vsel %vm4416_vm1, %v756_v43, 0.0  ;;  %v2245_v30 = vld [vmem:[%s2358_s17 + $0x48] sm:$0xff] }
 0x1bf   : > { %v1524_v58 = vadd.f32 %v1492_v15, %v1491_v26  ;;  %v3493_v51 = vsub.f32 %v2245_v30, %v717_v47  ;;  %v979_v28 = vmul.f32 1.442695, %v725_v13  ;;  %2084 = vpow2.f32 %v1009_v36  ;;  %v2248_v26 = vld [vmem:[%s2358_s17 + $0x58] sm:$0xff] }
 0x1c0   : > { %v671_v1 = vpop.xlane.xlu1 %670  ;;  %v692_v38 = vpop.xlane.xlu0 %691  ;;  %2086 = vpow2.f32 %v1011_v29  ;;  %vm4417_vm6 = vnez %v4332_v57  ;;  %v1013_v49 = vmul.f32 1.442695, %v742_v53  ;;  %v1015_v10 = vmul.f32 1.442695, %v743_v59 }
 0x1c1   : > { %v718_v32 = vmax.f32 %v2649_v62, %v692_v38  ;;  %v1506_v50 = vsel %vm4417_vm6, %v757_v56, 0.0  ;;  %v758_v0 = vsub.f32 %v3257_v44, %v717_v47  ;;  %2088 = vpow2.f32 %v993_v48 }
 0x1c2   : > { %1525 = vadd.xlane.f32.xlu1 %v1524_v58  ;;  %v1545_v16 = vadd.f32 %v1506_v50, %v1505_v60  ;;  %v759_v13 = vsub.f32 %v3261_v21, %v717_v47  ;;  %v726_v39 = vsub.f32 %v2247_v40, %v710_v19  ;;  %v995_v62 = vmul.f32 1.442695, %v3493_v51  ;;  %v2249_v60 = vld [vmem:[%s2358_s17 + $0x18] sm:$0xff] }
 0x1c3   : > { %v3500_v35 = vsub.f32 %v2246_v27, %v718_v32  ;;  %2090 = vpow2.f32 %v979_v28  ;;  %vm963_vm8 = vcmp.eq.s32.totalorder %v2661_v6, %v2724_v37  ;;  %v1043_v44 = vmul.f32 1.442695, %v757_v56  ;;  %v4424_v27 = vld [vmem:[#allocation51_spill] sm:$0xff] }
 0x1c4   : > { %v695_v22 = vpop.xlane.xlu1 %694  ;;  %1546 = vadd.xlane.f32.xlu0 %v1545_v16  ;;  %vm4418_vm5 = vnez %v4300_v14  ;;  %v1508_v21 = vsel %vm4419_vm11, %v759_v13, 0.0  ;;  %v744_v59 = vsub.f32 %v3267_v5, %v710_v19  ;;  %v711_v47 = vmax.f32 %v2631_v52, %v671_v1  ;;  %v674_v58 = vpop.xlane.xlu0 %673 }
 0x1c5   : > { %v3506_v57 = vmax.f32 %v2647_v61, %v695_v22  ;;  %v1507_v53 = vsel %vm4418_vm5, %v758_v0, 0.0  ;;  %2092 = vpow2.f32 %v1013_v49  ;;  %v1041_v24 = vmul.f32 1.442695, %v756_v43 }
 0x1c6   : > { %v1548_v36 = vadd.f32 %v1508_v21, %v1507_v53  ;;  %v997_v61 = vmul.f32 1.442695, %v3500_v35  ;;  %2094 = vpow2.f32 %v1015_v10  ;;  %v1443_v29 = vsel %vm963_vm8, %v726_v39, 0.0  ;;  %v2083_v14 = vpop.eup %2082  ;;  %v4422_v10 = vld [vmem:[#allocation50_spill] sm:$0xff] }
 0x1c7   : > { %v745_v48 = vsub.f32 %v3271_v20, %v710_v19  ;;  %2096 = vpow2.f32 %v995_v62  ;;  %v3522_v2 = vsub.f32 %v2248_v26, %v3506_v57  ;;  %v1047_v5 = vmul.f32 1.442695, %v759_v13 }
 0x1c8   : > { %v3517_v37 = vpop.xlane.xlu1 %676  ;;  %1549 = vadd.xlane.f32.xlu1 %v1548_v36  ;;  %1461 = vadd.xlane.f32.xlu0 %v1443_v29  ;;  %2098 = vpow2.f32 %v1043_v44  ;;  %v1045_v52 = vmul.f32 1.442695, %v758_v0  ;;  %v1493_v43 = vsel %vm4420_vm14, %v744_v59, 0.0  ;;  %v981_v20 = vmul.f32 1.442695, %v726_v39  ;;  %v4427_v44 = vld [vmem:[#allocation63_spill] sm:$0xff] }
 0x1c9   : > { %v1494_v15 = vsel %vm4421_vm9, %v745_v48, 0.0  ;;  %v3528_v1 = vpop.eup %2084  ;;  %2100 = vpow2.f32 %v1041_v24  ;;  %v727_v30 = vsub.f32 %v2249_v60, %v711_v47  ;;  %v760_v28 = vsub.f32 %v3269_v34, %v718_v32 }
 0x1ca   : > { %v1527_v19 = vadd.f32 %v1494_v15, %v1493_v43  ;;  %v3530_v38 = vpop.eup %2086  ;;  %2102 = vpow2.f32 %v997_v61  ;;  %v761_v42 = vsub.f32 %v3273_v55, %v718_v32  ;;  %v999_v7 = vmul.f32 1.442695, %v3522_v2  ;;  %v4426_v32 = vld [vmem:[#allocation61_spill] sm:$0xff]  ;;  %v698_v61 = vpop.xlane.xlu0 %697  ;;  %v4429_v43 = vld [vmem:[#allocation16_spill] sm:$0xff] }
 0x1cb   : > { %2104 = vpow2.f32 %v1047_v5  ;;  %v2089_v50 = vpop.eup %2088  ;;  %v1017_v49 = vmul.f32 1.442695, %v744_v59  ;;  %vm4423_vm3 = vnez %v4422_v10  ;;  %v1019_v34 = vmul.f32 1.442695, %v745_v48  ;;  %v4428_v59 = vld [vmem:[#allocation4_spill] sm:$0xff] }
 0x1cc   : > { %v3532_v56 = vpop.xlane.xlu1 %700  ;;  %1073 = vadd.xlane.f32.xlu1 %v2083_v14  ;;  %1528 = vadd.xlane.f32.xlu0 %v1527_v19  ;;  %2106 = vpow2.f32 %v1045_v52  ;;  %v1509_v16 = vsel %vm4423_vm3, %v760_v28, 0.0  ;;  %vm4425_vm0 = vnez %v4424_v27  ;;  %v746_v22 = vsub.f32 %v4426_v32, %v711_v47  ;;  %v4435_v27 = vld [vmem:[#allocation64_spill] sm:$0xff] }
 0x1cd   : > { %v3542_v0 = vpop.eup %2090  ;;  %2108 = vpow2.f32 %v981_v20  ;;  %v1510_v55 = vsel %vm4425_vm0, %v761_v42, 0.0  ;;  %v983_v13 = vmul.f32 1.442695, %v727_v30  ;;  %v1444_v40 = vsel %vm964_vm2, %v727_v30, 0.0  ;;  %v4431_v20 = vld [vmem:[#allocation17_spill] sm:$0xff] }
 0x1ce   : > { %v1551_v39 = vadd.f32 %v1510_v55, %v1509_v16  ;;  %v747_v53 = vsub.f32 %v4427_v44, %v711_v47  ;;  %2110 = vpow2.f32 %v999_v7  ;;  %v1051_v46 = vmul.f32 1.442695, %v761_v42  ;;  %v4433_v7 = vld [vmem:[#allocation9_spill] sm:$0xff]  ;;  %v4434_v16 = vld [vmem:[#allocation62_spill] sm:$0xff] }
 0x1cf   : > { %v3548_v21 = vpop.eup %2092  ;;  %2112 = vpow2.f32 %v1017_v49  ;;  %v1049_v29 = vmul.f32 1.442695, %v760_v28  ;;  %v1021_v26 = vmul.f32 1.442695, %v746_v22  ;;  %vm4430_vm4 = vnez %v4429_v43  ;;  %v4444_v43 = vld [vmem:[#allocation24_spill] sm:$0xff] }
 0x1d0   : > { %v683_v62 = vpop.xlane.xlu1 %682  ;;  %1463 = vadd.xlane.f32.xlu1 %v1444_v40  ;;  %v2095_v36 = vpop.eup %2094  ;;  %1552 = vadd.xlane.f32.xlu0 %v1551_v39  ;;  %2114 = vpow2.f32 %v1019_v34  ;;  %v1023_v52 = vmul.f32 1.442695, %v747_v53  ;;  %v1495_v15 = vsel %vm4430_vm4, %v746_v22, 0.0  ;;  %vm4432_vm10 = vnez %v4431_v20  ;;  %v4436_v22 = vld [vmem:[#allocation3_spill] sm:$0xff] }
 0x1d1   : > { %v3551_v24 = vmax.f32 %v4428_v59, %v683_v62  ;;  %v3553_v48 = vpop.eup %2096  ;;  %2116 = vpow2.f32 %v983_v13  ;;  %v1496_v19 = vsel %vm4432_vm10, %v747_v53, 0.0  ;;  %v762_v34 = vsub.f32 %v4434_v16, %v3506_v57  ;;  %v680_v40 = vpop.xlane.xlu0 %679  ;;  %v4437_v53 = vld [vmem:[#allocation43_spill] sm:$0xff]  ;;  %v4441_v59 = vld [vmem:[#allocation2_spill] sm:$0xff] }
 0x1d2   : > { %v2099_v5 = vpop.eup %2098  ;;  %2118 = vpow2.f32 %v1051_v46  ;;  %v1530_v42 = vadd.f32 %v1496_v19, %v1495_v15  ;;  %v763_v55 = vsub.f32 %v4435_v27, %v3506_v57  ;;  %v712_v13 = vmax.f32 %v4436_v22, %v674_v58  ;;  %v4439_v58 = vld [vmem:[#allocation13_spill] sm:$0xff]  ;;  %v4445_v19 = vld [vmem:[#allocation44_spill] sm:$0xff] }
 0x1d3   : > { %v3557_v14 = vsub.f32 %v3327_v33, %v3551_v24  ;;  %v3561_v47 = vsub.f32 %v3331_v12, %v3551_v24  ;;  %v2101_v30 = vpop.eup %2100  ;;  %2120 = vpow2.f32 %v1049_v29  ;;  %v1053_v44 = vmul.f32 1.442695, %v762_v34  ;;  %v4442_v29 = vld [vmem:[#allocation7_spill] sm:$0xff] }
 0x1d4   : > { %v707_v60 = vpop.xlane.xlu1 %706  ;;  %v3568_v28 = vpop.eup %2102  ;;  %1089 = vadd.xlane.f32.xlu0 %v2089_v50  ;;  %2122 = vpow2.f32 %v1021_v26  ;;  %1531 = vadd.xlane.f32.xlu1 %v1530_v42  ;;  %vm4438_vm12 = vnez %v4437_v53  ;;  %vm4440_vm15 = vcmp.ne.s32.totalorder %v4439_v58, %v2661_v6  ;;  %v3598_v26 = vmax.f32 %v4442_v29, %v698_v61 }
 0x1d5   : > { %v1037_v33 = vmul.f32 1.442695, %v3557_v14  ;;  %v1039_v12 = vmul.f32 1.442695, %v3561_v47  ;;  %v3572_v49 = vmax.f32 %v4433_v7, %v707_v60  ;;  %v2105_v10 = vpop.eup %2104  ;;  %2124 = vpow2.f32 %v1023_v52  ;;  %v4443_v52 = vld [vmem:[#allocation19_spill] sm:$0xff]  ;;  %v4449_v60 = vld [vmem:[#allocation33_spill] sm:$0xff] }
 0x1d6   : > { %v2107_v32 = vpop.eup %2106  ;;  %v1511_v57 = vsel %vm4438_vm12, %v762_v34, 0.0  ;;  %v1105_v46 = vsel %vm4440_vm15, %v3528_v1, 0.0  ;;  %vm965_vm13 = vcmp.eq.s32.totalorder %v2661_v6, %v4443_v52  ;;  %vm966_vm7 = vcmp.eq.s32.totalorder %v2661_v6, %v4444_v43  ;;  %v4474_v43 = vld [vmem:[#allocation68_spill] sm:$0xff] }
 0x1d7   : > { %v3581_v50 = vsub.f32 %v3329_v54, %v3572_v49  ;;  %v3585_v39 = vsub.f32 %v3333_v17, %v3572_v49  ;;  %v3587_v62 = vpop.eup %2108  ;;  %2126 = vpow2.f32 %v1037_v33  ;;  %v713_v54 = vmax.f32 %v4441_v59, %v3517_v37  ;;  %v4447_v37 = vld [vmem:[#allocation10_spill] sm:$0xff] }
 0x1d8   : > { %2128 = vpow2.f32 %v1039_v12  ;;  %v3605_v15 = vpop.eup %2110  ;;  %v1055_v20 = vmul.f32 1.442695, %v763_v55  ;;  %vm4446_vm1 = vnez %v4445_v19  ;;  %vm4448_vm6 = vcmp.ne.s32.totalorder %v4439_v58, %v4447_v37  ;;  %v4455_v58 = vld [vmem:[#allocation25_spill] sm:$0xff]  ;;  %v2251_v19 = vld [vmem:[%s2358_s17 + $0x28] sm:$0xff] }
 0x1d9   : > { %v1069_v17 = vmul.f32 1.442695, %v3581_v50  ;;  %v1512_v1 = vsel %vm4446_vm1, %v763_v55, 0.0  ;;  %v1106_v61 = vsel %vm4448_vm6, %v3530_v38, 0.0  ;;  %vm4450_vm8 = vcmp.ne.s32.totalorder %v4449_v60, %v2661_v6  ;;  %v3616_v12 = vpop.eup %2112  ;;  %v4452_v38 = vld [vmem:[#allocation8_spill] sm:$0xff] }
 0x1da   : > { %v1121_v33 = vsel %vm4450_vm8, %v2101_v30, 0.0  ;;  %v1071_v42 = vmul.f32 1.442695, %v3585_v39  ;;  %v1554_v7 = vadd.f32 %v1512_v1, %v1511_v57  ;;  %v1137_v16 = vadd.f32 %v1106_v61, %v1105_v46  ;;  %v3622_v27 = vpop.eup %2114  ;;  %v704_v57 = vpop.xlane.xlu0 %703  ;;  %v4458_v61 = vld [vmem:[#allocation65_spill] sm:$0xff] }
 0x1db   : > { %vm4451_vm5 = vcmp.ne.s32.totalorder %v4449_v60, %v4447_v37  ;;  %2130 = vpow2.f32 %v1053_v44  ;;  %vm4453_vm11 = vcmp.ne.s32.totalorder %v4452_v38, %v2661_v6  ;;  %vm4454_vm14 = vcmp.ne.s32.totalorder %v4452_v38, %v4447_v37  ;;  %v3631_v53 = vpop.eup %2116 }
 0x1dc   : > { %v1122_v34 = vsel %vm4451_vm5, %v2099_v5, 0.0  ;;  %v1107_v30 = vsel %vm4453_vm11, %v3548_v21, 0.0  ;;  %v1108_v22 = vsel %vm4454_vm14, %v2095_v36, 0.0  ;;  %2132 = vpow2.f32 %v1069_v17  ;;  %1555 = vadd.xlane.f32.xlu1 %v1554_v7  ;;  %1138 = vadd.xlane.f32.xlu0 %v1137_v16  ;;  %v3639_v21 = vpop.eup %2118  ;;  %v2250_v36 = vld [vmem:[%s2358_s17 + $0x20] sm:$0xff] }
 0x1dd   : > { %v1161_v55 = vadd.f32 %v1122_v34, %v1121_v33  ;;  %v1140_v5 = vadd.f32 %v1108_v22, %v1107_v30  ;;  %vm4456_vm9 = vcmp.ne.s32.totalorder %v4455_v58, %v2661_v6  ;;  %vm4457_vm2 = vcmp.ne.s32.totalorder %v4455_v58, %v4447_v37  ;;  %v2121_v1 = vpop.eup %2120  ;;  %v4459_v33 = vld [vmem:[#allocation67_spill] sm:$0xff]  ;;  %v4462_v30 = vld [vmem:[#allocation6_spill] sm:$0xff]  ;;  %v4463_v22 = vld [vmem:[#allocation5_spill] sm:$0xff] }
 0x1de   : > { %v1123_v44 = vsel %vm4456_vm9, %v2107_v32, 0.0  ;;  %v1124_v46 = vsel %vm4457_vm2, %v2105_v10, 0.0  ;;  %2134 = vpow2.f32 %v1055_v20  ;;  %v3642_v29 = vsub.f32 %v2250_v36, %v712_v13  ;;  %v4460_v32 = vld [vmem:[#allocation69_spill] sm:$0xff]  ;;  %v4461_v34 = vld [vmem:[#allocation71_spill] sm:$0xff]  ;;  %v2123_v10 = vpop.eup %2122 }
 0x1df   : > { %v1164_v59 = vadd.f32 %v1124_v46, %v1123_v44  ;;  %v3645_v17 = vsub.f32 %v2251_v19, %v713_v54  ;;  %v748_v60 = vsub.f32 %v4458_v61, %v712_v13  ;;  %v749_v7 = vsub.f32 %v4459_v33, %v712_v13  ;;  %v4464_v44 = vld [vmem:[#allocation11_spill] sm:$0xff]  ;;  %v2125_v36 = vpop.eup %2124  ;;  %v4465_v61 = vld [vmem:[#allocation21_spill] sm:$0xff]  ;;  %v4467_v33 = vld [vmem:[#allocation22_spill] sm:$0xff] }
 0x1e0   : > { %v750_v16 = vsub.f32 %v4460_v32, %v713_v54  ;;  %v751_v38 = vsub.f32 %v4461_v34, %v713_v54  ;;  %v3653_v20 = vmax.f32 %v4462_v30, %v3532_v56  ;;  %v3656_v58 = vmax.f32 %v4463_v22, %v680_v40  ;;  %1091 = vadd.xlane.f32.xlu1 %v3553_v48  ;;  %v4469_v34 = vld [vmem:[#allocation26_spill] sm:$0xff]  ;;  %v4471_v30 = vld [vmem:[#allocation28_spill] sm:$0xff] }
 0x1e1   : > { %v3659_v46 = vmax.f32 %v4464_v44, %v704_v57  ;;  %2136 = vpow2.f32 %v1071_v42  ;;  %1162 = vadd.xlane.f32.xlu0 %v1161_v55  ;;  %v1025_v13 = vmul.f32 1.442695, %v748_v60  ;;  %v1027_v19 = vmul.f32 1.442695, %v749_v7  ;;  %v3666_v32 = vpop.eup %2126  ;;  %v4473_v44 = vld [vmem:[#allocation66_spill] sm:$0xff] }
 0x1e2   : > { %vm4466_vm3 = vnez %v4465_v61  ;;  %vm4468_vm0 = vnez %v4467_v33  ;;  %v1445_v40 = vsel %vm965_vm13, %v3642_v29, 0.0  ;;  %v1446_v48 = vsel %vm966_vm7, %v3645_v17, 0.0  ;;  %v3676_v57 = vpop.eup %2128 }
 0x1e3   : > { %v1497_v54 = vsel %vm4466_vm3, %v748_v60, 0.0  ;;  %v1498_v56 = vsel %vm4468_vm0, %v749_v7, 0.0  ;;  %v1029_v55 = vmul.f32 1.442695, %v750_v16  ;;  %v1031_v60 = vmul.f32 1.442695, %v751_v38 }
 0x1e4   : > { %v1533_v42 = vadd.f32 %v1498_v56, %v1497_v54  ;;  %vm4470_vm4 = vnez %v4469_v34  ;;  %vm4472_vm10 = vnez %v4471_v30  ;;  %v764_v52 = vsub.f32 %v4473_v44, %v3598_v26  ;;  %v4475_v54 = vld [vmem:[#allocation70_spill] sm:$0xff]  ;;  %1141 = vadd.xlane.f32.xlu1 %v1140_v5  ;;  %v4478_v30 = vld [vmem:[#allocation72_spill] sm:$0xff] }
 0x1e5   : > { %v1499_v7 = vsel %vm4470_vm4, %v750_v16, 0.0  ;;  %v1500_v22 = vsel %vm4472_vm10, %v751_v38, 0.0  ;;  %2138 = vpow2.f32 %v1025_v13  ;;  %v765_v33 = vsub.f32 %v4474_v43, %v3598_v26  ;;  %1075 = vadd.xlane.f32.xlu0 %v3542_v0  ;;  %v4476_v16 = vld [vmem:[#allocation56_spill] sm:$0xff]  ;;  %v2131_v13 = vpop.eup %2130 }
 0x1e6   : > { %v3684_v61 = vadd.f32 %v1500_v22, %v1499_v7  ;;  %v766_v56 = vsub.f32 %v4475_v54, %v3653_v20  ;;  %2140 = vpow2.f32 %v1027_v19  ;;  %vm4477_vm12 = vnez %v4476_v16  ;;  %v4479_v22 = vld [vmem:[#allocation57_spill] sm:$0xff]  ;;  %v3697_v25 = vpop.eup %2132  ;;  %v4481_v19 = vld [vmem:[#allocation48_spill] sm:$0xff] }
 0x1e7   : > { %v1513_v34 = vsel %vm4477_vm12, %v764_v52, 0.0  ;;  %v1057_v38 = vmul.f32 1.442695, %v764_v52  ;;  %v767_v44 = vsub.f32 %v4478_v30, %v3653_v20  ;;  %2142 = vpow2.f32 %v1029_v55  ;;  %v4483_v52 = vld [vmem:[#allocation49_spill] sm:$0xff]  ;;  %v4485_v55 = vld [vmem:[#allocation12_spill] sm:$0xff] }
 0x1e8   : > { %v1059_v7 = vmul.f32 1.442695, %v765_v33  ;;  %vm4480_vm15 = vnez %v4479_v22  ;;  %v1061_v3 = vmul.f32 1.442695, %v766_v56  ;;  %2144 = vpow2.f32 %v1031_v60  ;;  %v2135_v16 = vpop.eup %2134  ;;  %1165 = vadd.xlane.f32.xlu1 %v1164_v59 }
 0x1e9   : > { %v1514_v43 = vsel %vm4480_vm15, %v765_v33, 0.0  ;;  %v1063_v0 = vmul.f32 1.442695, %v767_v44  ;;  %vm4482_vm13 = vnez %v4481_v19  ;;  %vm4484_vm7 = vnez %v4483_v52  ;;  %1465 = vadd.xlane.f32.xlu0 %v1445_v40 }
 0x1ea   : > { %v1557_v5 = vadd.f32 %v1514_v43, %v1513_v34  ;;  %v1515_v54 = vsel %vm4482_vm13, %v766_v56, 0.0  ;;  %2146 = vpow2.f32 %v1059_v7  ;;  %v1516_v30 = vsel %vm4484_vm7, %v767_v44, 0.0  ;;  %v4488_v34 = vld [vmem:[#allocation14_spill] sm:$0xff] }
 0x1eb   : > { %vm4486_vm1 = vcmp.ne.s32.totalorder %v4485_v55, %v2661_v6  ;;  %vm4487_vm6 = vcmp.ne.s32.totalorder %v4485_v55, %v4447_v37  ;;  %2148 = vpow2.f32 %v1057_v38  ;;  %v1560_v33 = vadd.f32 %v1516_v30, %v1515_v54  ;;  %v3716_v7 = vpop.eup %2136  ;;  %v4491_v43 = vld [vmem:[#allocation38_spill] sm:$0xff]  ;;  %v4494_v38 = vld [vmem:[#allocation31_spill] sm:$0xff] }
 0x1ec   : > { %v1109_v22 = vsel %vm4486_vm1, %v3616_v12, 0.0  ;;  %v1110_v60 = vsel %vm4487_vm6, %v3622_v27, 0.0  ;;  %vm4489_vm8 = vcmp.ne.s32.totalorder %v4488_v34, %v2661_v6  ;;  %2150 = vpow2.f32 %v1061_v3  ;;  %1467 = vadd.xlane.f32.xlu1 %v1446_v48 }
 0x1ed   : > { %v3711_v56 = vadd.f32 %v1110_v60, %v1109_v22  ;;  %v1111_v44 = vsel %vm4489_vm8, %v2123_v10, 0.0  ;;  %vm4490_vm5 = vcmp.ne.s32.totalorder %v4488_v34, %v4447_v37  ;;  %vm4492_vm11 = vcmp.ne.s32.totalorder %v4491_v43, %v2661_v6  ;;  %1534 = vadd.xlane.f32.xlu0 %v1533_v42  ;;  %v4502_v22 = vld [vmem:[#allocation32_spill] sm:$0xff] }
 0x1ee   : > { %v1112_v12 = vsel %vm4490_vm5, %v2125_v36, 0.0  ;;  %v1125_v27 = vsel %vm4492_vm11, %v2121_v1, 0.0  ;;  %vm4493_vm14 = vcmp.ne.s32.totalorder %v4491_v43, %v4447_v37  ;;  %2152 = vpow2.f32 %v1063_v0  ;;  %v4506_v43 = vld [vmem:[#allocation59_spill] sm:$0xff] }
 0x1ef   : > { %v1126_v59 = vsel %vm4493_vm14, %v3639_v21, 0.0  ;;  %v3728_v40 = vadd.f32 %v1112_v12, %v1111_v44  ;;  %vm4495_vm9 = vcmp.ne.s32.totalorder %v4494_v38, %v2661_v6  ;;  %vm4496_vm2 = vcmp.ne.s32.totalorder %v4494_v38, %v4447_v37  ;;  %v4497_v21 = vld [vmem:[#allocation39_spill] sm:$0xff]  ;;  %v2139_v55 = vpop.eup %2138 }
 0x1f0   : > { %v3730_v10 = vadd.f32 %v1126_v59, %v1125_v27  ;;  %v1127_v3 = vsel %vm4495_vm9, %v2131_v13, 0.0  ;;  %v1128_v36 = vsel %vm4496_vm2, %v2135_v16, 0.0  ;;  %v752_v1 = vsub.f32 %v3315_v63, %v3656_v58  ;;  %v4499_v13 = vld [vmem:[#allocation40_spill] sm:$0xff]  ;;  %v4501_v63 = vld [vmem:[#allocation73_spill] sm:$0xff]  ;;  %v2141_v34 = vpop.eup %2140  ;;  %1537 = vadd.xlane.f32.xlu1 %v3684_v61 }
 0x1f1   : > { %v753_v19 = vsub.f32 %v3319_v41, %v3656_v58  ;;  %vm4498_vm3 = vnez %v4497_v21  ;;  %v3745_v54 = vadd.f32 %v1128_v36, %v1127_v3  ;;  %vm4500_vm0 = vnez %v4499_v13  ;;  %v2143_v27 = vpop.eup %2142  ;;  %v4508_v59 = vld [vmem:[#allocation60_spill] sm:$0xff]  ;;  %v4510_v36 = vld [vmem:[#allocation54_spill] sm:$0xff]  ;;  %1558 = vadd.xlane.f32.xlu0 %v1557_v5 }
 0x1f2   : > { %v1503_v0 = vsel %vm4498_vm3, %v3557_v14, 0.0  ;;  %v1504_v52 = vsel %vm4500_vm0, %v3561_v47, 0.0  ;;  %v768_v16 = vsub.f32 %v3317_v31, %v3659_v46  ;;  %v769_v30 = vsub.f32 %v4501_v63, %v3659_v46  ;;  %v4504_v14 = vld [vmem:[#allocation34_spill] sm:$0xff] }
 0x1f3   : > { %v1035_v41 = vmul.f32 1.442695, %v753_v19  ;;  %vm4503_vm4 = vnez %v4502_v22  ;;  %vm4505_vm10 = vnez %v4504_v14  ;;  %v1033_v42 = vmul.f32 1.442695, %v752_v1 }
 0x1f4   : > { %v1501_v60 = vsel %vm4503_vm4, %v752_v1, 0.0  ;;  %v1502_v48 = vsel %vm4505_vm10, %v753_v19, 0.0  ;;  %v3760_v12 = vadd.f32 %v1504_v52, %v1503_v0  ;;  %v1067_v47 = vmul.f32 1.442695, %v769_v30  ;;  %v2145_v1 = vpop.eup %2144  ;;  %v4512_v0 = vld [vmem:[#allocation55_spill] sm:$0xff]  ;;  %1561 = vadd.xlane.f32.xlu1 %v1560_v33 }
 0x1f5   : > { %v3758_v44 = vadd.f32 %v1502_v48, %v1501_v60  ;;  %vm4507_vm12 = vnez %v4506_v43  ;;  %2154 = vpow2.f32 %v1035_v41  ;;  %vm4509_vm15 = vnez %v4508_v59  ;;  %v4514_v52 = vld [vmem:[#allocation15_spill] sm:$0xff]  ;;  %v4517_v41 = vld [vmem:[#allocation18_spill] sm:$0xff]  ;;  %1077 = vadd.xlane.f32.xlu0 %v3587_v62  ;;  %v4526_v59 = vld [vmem:[#allocation37_spill] sm:$0xff] }
 0x1f6   : > { %v1517_v31 = vsel %vm4507_vm12, %v768_v16, 0.0  ;;  %v1518_v38 = vsel %vm4509_vm15, %v769_v30, 0.0  ;;  %v1065_v3 = vmul.f32 1.442695, %v768_v16  ;;  %vm4511_vm13 = vnez %v4510_v36  ;;  %v2147_v30 = vpop.eup %2146 }
 0x1f7   : > { %v1519_v19 = vsel %vm4511_vm13, %v3581_v50, 0.0  ;;  %2156 = vpow2.f32 %v1033_v42  ;;  %v1563_v21 = vadd.f32 %v1518_v38, %v1517_v31  ;;  %vm4513_vm7 = vnez %v4512_v0  ;;  %v2149_v5 = vpop.eup %2148 }
 0x1f8   : > { %v1520_v13 = vsel %vm4513_vm7, %v3585_v39, 0.0  ;;  %vm4515_vm1 = vcmp.ne.s32.totalorder %v4514_v52, %v2661_v6  ;;  %2158 = vpow2.f32 %v1067_v47  ;;  %vm4516_vm6 = vcmp.ne.s32.totalorder %v4514_v52, %v4447_v37  ;;  %v2151_v14 = vpop.eup %2150  ;;  %1079 = vadd.xlane.f32.xlu1 %v3631_v53  ;;  %v4535_v53 = vld [vmem:[#allocation52_spill] sm:$0xff] }
 0x1f9   : > { %v1113_v63 = vsel %vm4515_vm1, %v2139_v55, 0.0  ;;  %v1566_v16 = vadd.f32 %v1520_v13, %v1519_v19  ;;  %v1114_v50 = vsel %vm4516_vm6, %v2141_v34, 0.0  ;;  %vm4518_vm8 = vcmp.ne.s32.totalorder %v4517_v41, %v2661_v6  ;;  %v4520_v55 = vld [vmem:[#allocation46_spill] sm:$0xff]  ;;  %v4523_v34 = vld [vmem:[#allocation29_spill] sm:$0xff]  ;;  %v2153_v31 = vpop.eup %2152  ;;  %1093 = vadd.xlane.f32.xlu0 %v3568_v28  ;;  %v4532_v13 = vld [vmem:[#allocation23_spill] sm:$0xff] }
 0x1fa   : > { %v1115_v61 = vsel %vm4518_vm8, %v2143_v27, 0.0  ;;  %2160 = vpow2.f32 %v1065_v3  ;;  %v3782_v22 = vadd.f32 %v1114_v50, %v1113_v63  ;;  %vm4519_vm5 = vcmp.ne.s32.totalorder %v4517_v41, %v4447_v37 }
 0x1fb   : > { %v1116_v39 = vsel %vm4519_vm5, %v2145_v1, 0.0  ;;  %vm4521_vm11 = vcmp.ne.s32.totalorder %v4520_v55, %v4447_v37  ;;  %vm4522_vm14 = vcmp.ne.s32.totalorder %v4520_v55, %v2661_v6  ;;  %vm4524_vm9 = vcmp.ne.s32.totalorder %v4523_v34, %v2661_v6  ;;  %v2255_v55 = vld [vmem:[%s2358_s17 + $0x38] sm:$0xff] }
 0x1fc   : > { %v1130_v60 = vsel %vm4521_vm11, %v2147_v30, 0.0  ;;  %v3790_v48 = vadd.f32 %v1116_v39, %v1115_v61  ;;  %v1129_v42 = vsel %vm4522_vm14, %v2149_v5, 0.0  ;;  %v1119_v47 = vsel %vm4524_vm9, %v3666_v32, 0.0  ;;  %v4528_v32 = vld [vmem:[#allocation41_spill] sm:$0xff]  ;;  %v2252_v30 = vld [vmem:[%s2358_s17 + $0x60] sm:$0xff]  ;;  %1095 = vadd.xlane.f32.xlu1 %v3605_v15  ;;  %v2253_v15 = vld [vmem:[%s2358_s17 + $0x68] sm:$0xff] }
 0x1fd   : > { %vm4525_vm2 = vcmp.ne.s32.totalorder %v4523_v34, %v4447_v37  ;;  %v3804_v27 = vadd.f32 %v1130_v60, %v1129_v42  ;;  %vm4527_vm3 = vcmp.ne.s32.totalorder %v4526_v59, %v2661_v6  ;;  %vm4529_vm0 = vcmp.ne.s32.totalorder %v4528_v32, %v2661_v6  ;;  %1144 = vadd.xlane.f32.xlu0 %v3711_v56  ;;  %v2256_v60 = vld [vmem:[%s2358_s17 + $0x70] sm:$0xff] }
 0x1fe   : > { %v1120_v43 = vsel %vm4525_vm2, %v3676_v57, 0.0  ;;  %v1131_v38 = vsel %vm4527_vm3, %v2151_v14, 0.0  ;;  %v1135_v36 = vsel %vm4529_vm0, %v3697_v25, 0.0  ;;  %vm4530_vm4 = vcmp.ne.s32.totalorder %v4526_v59, %v4447_v37 }
 0x1ff   : > { %v3809_v3 = vadd.f32 %v1120_v43, %v1119_v47  ;;  %v1132_v57 = vsel %vm4530_vm4, %v2153_v31, 0.0  ;;  %vm4531_vm10 = vcmp.ne.s32.totalorder %v4528_v32, %v4447_v37  ;;  %v2155_v1 = vpop.eup %2154  ;;  %vm4533_vm12 = vcmp.ne.s32.totalorder %v4532_v13, %v4447_v37  ;;  %v4539_v31 = vld [vmem:[#allocation35_spill] sm:$0xff] }
 0x200   : > { %v1136_v62 = vsel %vm4531_vm10, %v3716_v7, 0.0  ;;  %v1176_v33 = vadd.f32 %v1132_v57, %v1131_v38  ;;  %v1118_v25 = vsel %vm4533_vm12, %v2155_v1, 0.0  ;;  %vm4534_vm15 = vcmp.ne.s32.totalorder %v4532_v13, %v2661_v6  ;;  %1147 = vadd.xlane.f32.xlu1 %v3728_v40  ;;  %v2254_v40 = vld [vmem:[%s2358_s17 + $0x30] sm:$0xff]  ;;  %v4542_v32 = vld [vmem:[#allocation47_spill] sm:$0xff]  ;;  %v4547_v13 = vld [vmem:[#allocation45_spill] sm:$0xff] }
 0x201   : > { %v3822_v19 = vadd.f32 %v1136_v62, %v1135_v36  ;;  %v2157_v0 = vpop.eup %2156  ;;  %v3834_v50 = vsub.f32 %v2252_v30, %v3598_v26  ;;  %vm4536_vm13 = vcmp.ne.s32.totalorder %v4535_v53, %v4447_v37  ;;  %v985_v61 = vmul.f32 1.442695, %v3642_v29  ;;  %1168 = vadd.xlane.f32.xlu0 %v3730_v10  ;;  %v4543_v62 = vld [vmem:[#allocation27_spill] sm:$0xff]  ;;  %v4545_v1 = vld [vmem:[#allocation36_spill] sm:$0xff] }
 0x202   : > { %v2159_v52 = vpop.eup %2158  ;;  %v1117_v63 = vsel %vm4534_vm15, %v2157_v0, 0.0  ;;  %vm4537_vm7 = vcmp.ne.s32.totalorder %v4535_v53, %v2661_v6  ;;  %v3850_v56 = vsub.f32 %v2253_v15, %v3653_v20  ;;  %v987_v37 = vmul.f32 1.442695, %v3645_v17 }
 0x203   : > { %v1155_v28 = vadd.f32 %v1118_v25, %v1117_v63  ;;  %v1134_v41 = vsel %vm4536_vm13, %v2159_v52, 0.0  ;;  %v1001_v26 = vmul.f32 1.442695, %v3834_v50  ;;  %2162 = vpow2.f32 %v985_v61 }
 0x204   : > { %v2161_v7 = vpop.eup %2160  ;;  %1171 = vadd.xlane.f32.xlu1 %v3745_v54  ;;  %v1003_v29 = vmul.f32 1.442695, %v3850_v56  ;;  %v730_v20 = vsub.f32 %v2254_v40, %v3656_v58  ;;  %v731_v17 = vsub.f32 %v2255_v55, %v3551_v24  ;;  %vm968_vm6 = vcmp.eq.s32.totalorder %v2661_v6, %v4539_v31 }
 0x205   : > { %v1133_v5 = vsel %vm4537_vm7, %v2161_v7, 0.0  ;;  %2164 = vpow2.f32 %v1001_v26  ;;  %1540 = vadd.xlane.f32.xlu0 %v3758_v44  ;;  %v738_v44 = vsub.f32 %v2256_v60, %v3659_v46  ;;  %vm971_vm11 = vcmp.eq.s32.totalorder %v2661_v6, %v4542_v32 }
 0x206   : > { %v1179_v39 = vadd.f32 %v1134_v41, %v1133_v5  ;;  %2166 = vpow2.f32 %v987_v37  ;;  %v989_v54 = vmul.f32 1.442695, %v730_v20  ;;  %v991_v34 = vmul.f32 1.442695, %v731_v17 }
 0x207   : > { %2168 = vpow2.f32 %v1003_v29  ;;  %v1448_v59 = vsel %vm968_vm6, %v731_v17, 0.0  ;;  %v1451_v57 = vsel %vm971_vm11, %v3500_v35, 0.0  ;;  %vm972_vm14 = vcmp.eq.s32.totalorder %v2661_v6, %v4543_v62 }
 0x208   : > { %1543 = vadd.xlane.f32.xlu1 %v3760_v12  ;;  %2170 = vpow2.f32 %v989_v54  ;;  %v1005_v12 = vmul.f32 1.442695, %v738_v44  ;;  %vm974_vm2 = vcmp.eq.s32.totalorder %v2661_v6, %v4545_v1  ;;  %vm976_vm0 = vcmp.eq.s32.totalorder %v2661_v6, %v4547_v13 }
 0x209   : > { %1564 = vadd.xlane.f32.xlu0 %v1563_v21  ;;  %v2257_v21 = vld [vmem:[%s2358_s17 + $0x78] sm:$0xff]  ;;  %2172 = vpow2.f32 %v991_v34  ;;  %v1454_v35 = vsel %vm974_vm2, %v3850_v56, 0.0  ;;  %vm1745_vm4 = vcmask 7168  }
 0x20a   : > { %v739_v58 = vsub.f32 %v2257_v21, %v3572_v49  ;;  %2174 = vpow2.f32 %v1005_v12 }
 0x20c   : > { %1567 = vadd.xlane.f32.xlu1 %v1566_v16  ;;  %v1007_v24 = vmul.f32 1.442695, %v739_v58  ;;  %v1456_v25 = vsel %vm976_vm0, %v739_v58, 0.0 }
 0x20d   : > { %v2163_v10 = vpop.eup %2162 }
 0x20e   : > { %1081 = vadd.xlane.f32.xlu0 %v2163_v10  ;;  %2176 = vpow2.f32 %v1007_v24  ;;  %v4548_v10 = vld [vmem:[#allocation77_spill] sm:$0xff] }
 0x20f   : > { %v2165_v14 = vpop.eup %2164  ;;  %v1665_v55 = vadd.f32 1e-12, %v4548_v10 }
 0x210   : > { %v2167_v42 = vpop.eup %2166 }
 0x211   : > { %1083 = vadd.xlane.f32.xlu1 %v2167_v42  ;;  %v2169_v47 = vpop.eup %2168 }
 0x212   : > { %1097 = vadd.xlane.f32.xlu0 %v2165_v14  ;;  %v2171_v46 = vpop.eup %2170 }
 0x213   : > { %v2173_v16 = vpop.eup %2172 }
 0x214   : > { %v2175_v43 = vpop.eup %2174 }
 0x215   : > { %1099 = vadd.xlane.f32.xlu1 %v2169_v47  ;;  %v4549_v47 = vld [vmem:[#allocation75_spill] sm:$0xff] }
 0x216   : > { %1150 = vadd.xlane.f32.xlu0 %v3782_v22  ;;  %v4538_v22 = vld [vmem:[#allocation30_spill] sm:$0xff]  ;;  %v1666_v24 = vadd.f32 1e-12, %v4549_v47 }
 0x217   : > { %vm967_vm1 = vcmp.eq.s32.totalorder %v2661_v6, %v4538_v22 }
 0x218   : > { %v2177_v49 = vpop.eup %2176 }
 0x219   : > { %1153 = vadd.xlane.f32.xlu1 %v3790_v48  ;;  %v1447_v48 = vsel %vm967_vm1, %v730_v20, 0.0 }
 0x21a   : > { %1174 = vadd.xlane.f32.xlu0 %v3804_v27  ;;  %v4540_v27 = vld [vmem:[#allocation42_spill] sm:$0xff] }
 0x21b   : > { %vm969_vm8 = vcmp.eq.s32.totalorder %v2661_v6, %v4540_v27 }
 0x21c   : > { %v1449_v38 = vsel %vm969_vm8, %v3474_v45, 0.0  ;;  %v1452_v45 = vsel %vm972_vm14, %v3522_v2, 0.0 }
 0x21d   : > { %1177 = vadd.xlane.f32.xlu1 %v1176_v33  ;;  %v4544_v33 = vld [vmem:[#allocation53_spill] sm:$0xff] }
 0x21e   : > { %1085 = vadd.xlane.f32.xlu0 %v2171_v46  ;;  %vm973_vm9 = vcmp.eq.s32.totalorder %v2661_v6, %v4544_v33 }
 0x221   : > { %1087 = vadd.xlane.f32.xlu1 %v2173_v16 }
 0x222   : > { %1101 = vadd.xlane.f32.xlu0 %v2175_v43 }
 0x225   : > { %1103 = vadd.xlane.f32.xlu1 %v2177_v49 }
 0x226   : > { %1156 = vadd.xlane.f32.xlu0 %v1155_v28 }
 0x229   : > { %1159 = vadd.xlane.f32.xlu1 %v3809_v3  ;;  %v4541_v3 = vld [vmem:[#allocation20_spill] sm:$0xff] }
 0x22a   : > { %1180 = vadd.xlane.f32.xlu0 %v1179_v39  ;;  %vm970_vm5 = vcmp.eq.s32.totalorder %v2661_v6, %v4541_v3 }
 0x22b   : > { %v1450_v36 = vsel %vm970_vm5, %v3493_v51, 0.0  ;;  %v4546_v51 = vld [vmem:[#allocation58_spill] sm:$0xff] }
 0x22c   : > { %vm975_vm3 = vcmp.eq.s32.totalorder %v2661_v6, %v4546_v51 }
 0x22d   : > { %1183 = vadd.xlane.f32.xlu1 %v3822_v19  ;;  %v1453_v19 = vsel %vm973_vm9, %v3834_v50, 0.0  ;;  %v1455_v0 = vsel %vm975_vm3, %v738_v44, 0.0 }
 0x22e   : > { %1469 = vadd.xlane.f32.xlu0 %v1447_v48 }
 0x231   : > { %1471 = vadd.xlane.f32.xlu1 %v1448_v59 }
 0x232   : > { %1473 = vadd.xlane.f32.xlu0 %v1449_v38 }
 0x235   : > { %1475 = vadd.xlane.f32.xlu1 %v1450_v36 }
 0x236   : > { %1477 = vadd.xlane.f32.xlu0 %v1451_v57 }
 0x239   : > { %1479 = vadd.xlane.f32.xlu1 %v1452_v45 }
 0x23a   : > { %1481 = vadd.xlane.f32.xlu0 %v1453_v19 }
 0x23d   : > { %1483 = vadd.xlane.f32.xlu1 %v1454_v35 }
 0x23e   : > { %1485 = vadd.xlane.f32.xlu0 %v1455_v0  ;;  %v4550_v0 = vld [vmem:[#allocation76_spill] sm:$0xff] }
 0x241   : > { %1487 = vadd.xlane.f32.xlu1 %v1456_v25 }
 0x247   : > { %v1458_v2 = vpop.xlane.xlu0 %1457 }
 0x24b   : > { %v1460_v52 = vpop.xlane.xlu1 %1459  ;;  %v1523_v63 = vpop.xlane.xlu0 %1522 }
 0x24c   : > { %v1601_v21 = vmul.f32 0.05, %v1523_v63 }
 0x24e   : > { %v1617_v22 = vadd.f32 %v1601_v21, %v1458_v2 }
 0x24f   : > { %v1526_v7 = vpop.xlane.xlu1 %1525 }
 0x250   : > { %v1602_v36 = vmul.f32 0.05, %v1526_v7 }
 0x251   : > { %v3896_v30 = vpop.xlane.xlu0 %1546 }
 0x252   : > { %v1618_v35 = vadd.f32 %v1602_v36, %v1460_v52 }
 0x255   : > { %v3898_v50 = vpop.xlane.xlu1 %1549  ;;  %v3900_v28 = vpop.xlane.xlu0 %1461 }
 0x259   : > { %v1074_v53 = vpop.xlane.xlu1 %1073  ;;  %v3902_v41 = vpop.xlane.xlu0 %1528 }
 0x25d   : > { %v3904_v61 = vpop.xlane.xlu1 %1463  ;;  %v3906_v5 = vpop.xlane.xlu0 %1552 }
 0x261   : > { %v3908_v6 = vpop.xlane.xlu1 %1531  ;;  %v1090_v39 = vpop.xlane.xlu0 %1089 }
 0x269   : > { %v3910_v26 = vpop.xlane.xlu1 %1555  ;;  %v1139_v15 = vpop.xlane.xlu0 %1138 }
 0x26a   : > { %v1185_v56 = vadd.f32 %v1139_v15, %v1074_v53 }
 0x26c   : > { %v1201_v37 = vadd.f32 1e-12, %v1185_v56 }
 0x26d   : > { %v1092_v29 = vpop.xlane.xlu1 %1091 }
 0x26e   : > { %v1163_v40 = vpop.xlane.xlu0 %1162  ;;  %2178 = vlog2.f32 %v1201_v37 }
 0x26f   : > { %v1193_v20 = vadd.f32 %v1163_v40, %v1090_v39 }
 0x271   : > { %v1209_v17 = vadd.f32 1e-12, %v1193_v20  ;;  %v1142_v54 = vpop.xlane.xlu1 %1141 }
 0x272   : > { %v1076_v60 = vpop.xlane.xlu0 %1075 }
 0x273   : > { %2180 = vlog2.f32 %v1209_v17  ;;  %v1186_v44 = vadd.f32 %v1142_v54, %v1076_v60 }
 0x274   : > { %2182 = vrcp.f32 %v1665_v55 }
 0x275   : > { %v1202_v14 = vadd.f32 1e-12, %v1186_v44  ;;  %v1166_v42 = vpop.xlane.xlu1 %1165 }
 0x276   : > { %v3913_v34 = vpop.xlane.xlu0 %1465  ;;  %v1194_v12 = vadd.f32 %v1166_v42, %v1092_v29 }
 0x277   : > { %2184 = vlog2.f32 %v1202_v14  ;;  %v1667_v14 = vadd.f32 1e-12, %v3373_v9 }
 0x278   : > { %v2179_v58 = vpop.eup %2178  ;;  %v1210_v46 = vadd.f32 1e-12, %v1194_v12 }
 0x279   : > { %v1218_v16 = vmul.f32 0.6931472, %v2179_v58  ;;  %v3916_v43 = vpop.xlane.xlu1 %1467  ;;  %v1668_v58 = vadd.f32 1e-12, %v3370_v4 }
 0x27a   : > { %v3918_v49 = vpop.xlane.xlu0 %1534  ;;  %2186 = vlog2.f32 %v1210_v46  ;;  %v1603_v46 = vmul.f32 0.05, %v3902_v41 }
 0x27b   : > { %v1633_v48 = vmul.f32 %v4548_v10, %v1218_v16  ;;  %2188 = vrcp.f32 %v1666_v24  ;;  %v4551_v10 = vld [vmem:[#allocation74_spill] sm:$0xff] }
 0x27d   : > { %v2181_v31 = vpop.eup %2180  ;;  %v1649_v27 = vsub.f32 %v1617_v22, %v1633_v48  ;;  %v3921_v38 = vpop.xlane.xlu1 %1537 }
 0x27e   : > { %v1234_v59 = vmul.f32 0.6931472, %v2181_v31  ;;  %v3923_v3 = vpop.xlane.xlu0 %1558  ;;  %v2183_v32 = vpop.eup %2182 }
 0x27f   : > { %v1682_v57 = vmul.f32 %v2183_v32, %v1649_v27  ;;  %v1619_v27 = vadd.f32 %v1603_v46, %v3900_v28 }
 0x280   : > { %v3926_v62 = vmul.f32 %v3422_v18, %v1234_v59  ;;  %v1604_v59 = vmul.f32 0.05, %v3908_v6 }
 0x281   : > { %v2185_v33 = vpop.eup %2184  ;;  %v1713_v45 = vmul.f32 -1.0, %v1682_v57  ;;  %v3928_v1 = vpop.xlane.xlu1 %1561 }
 0x282   : > { %v1220_v19 = vmul.f32 0.6931472, %v2185_v33  ;;  %v1078_v51 = vpop.xlane.xlu0 %1077  ;;  %v1620_v41 = vadd.f32 %v1604_v59, %v3904_v61  ;;  %v4556_v59 = vld [vmem:[#allocation90_spill] sm:$0xff] }
 0x283   : > { %v1729_v13 = vmul.f32 %v4550_v0, %v1713_v45 }
 0x284   : > { %v1634_v25 = vmul.f32 %v4549_v47, %v1220_v19  ;;  %v2187_v2 = vpop.eup %2186 }
 0x285   : > { %1746 = vst.msk [vmem:[%s3934_s27] sm:$0xff] %vm1745_vm4, %v1729_v13  ;;  %v1236_v7 = vmul.f32 0.6931472, %v2187_v2  ;;  %v1080_v53 = vpop.xlane.xlu1 %1079  ;;  %v2189_v15 = vpop.eup %2188 }
 0x286   : > { %v1650_v63 = vsub.f32 %v1618_v35, %v1634_v25  ;;  %v3940_v39 = vpop.xlane.xlu0 %1093 }
 0x287   : > { %v3943_v37 = vmul.f32 %v3425_v23, %v1236_v7 }
 0x288   : > { %v1684_v56 = vmul.f32 %v2189_v15, %v1650_v63  ;;  %v1669_v15 = vadd.f32 1e-12, %v3381_v8 }
 0x289   : > { %v3945_v52 = vpop.xlane.xlu1 %1095 }
 0x28a   : > { %v1714_v29 = vmul.f32 -1.0, %v1684_v56  ;;  %v1145_v40 = vpop.xlane.xlu0 %1144 }
 0x28b   : > { %v1187_v20 = vadd.f32 %v1145_v40, %v1078_v51  ;;  %v4552_v40 = vld [vmem:[#allocation81_spill] sm:$0xff] }
 0x28c   : > { %v1730_v55 = vmul.f32 %v4551_v10, %v1714_v29  ;;  %v4553_v10 = vld [vmem:[#allocation78_spill] sm:$0xff] }
 0x28d   : > { %v1203_v17 = vadd.f32 1e-12, %v1187_v20  ;;  %v1148_v54 = vpop.xlane.xlu1 %1147  ;;  %v1670_v20 = vadd.f32 1e-12, %v4552_v40 }
 0x28e   : > { %1747 = vst.msk [vmem:[%s3934_s27 + $0x8] sm:$0xff] %vm1745_vm4, %v1730_v55  ;;  %v1169_v60 = vpop.xlane.xlu0 %1168  ;;  %v1188_v44 = vadd.f32 %v1148_v54, %v1080_v53 }
 0x28f   : > { %2190 = vlog2.f32 %v1203_v17  ;;  %v4554_v17 = vld [vmem:[#allocation83_spill] sm:$0xff] }
 0x290   : > { %v1204_v42 = vadd.f32 1e-12, %v1188_v44  ;;  %v1671_v54 = vadd.f32 1e-12, %v4554_v17  ;;  %v4555_v44 = vld [vmem:[#allocation85_spill] sm:$0xff] }
 0x291   : > { %v1172_v12 = vpop.xlane.xlu1 %1171 }
 0x292   : > { %v3951_v21 = vpop.xlane.xlu0 %1540  ;;  %2192 = vlog2.f32 %v1204_v42  ;;  %v1195_v42 = vadd.f32 %v1169_v60, %v3940_v39 }
 0x293   : > { %2194 = vrcp.f32 %v1667_v14  ;;  %v1672_v14 = vadd.f32 1e-12, %v4555_v44 }
 0x294   : > { %2196 = vrcp.f32 %v1668_v58 }
 0x295   : > { %v3954_v47 = vpop.xlane.xlu1 %1543 }
 0x296   : > { %v3956_v24 = vpop.xlane.xlu0 %1564 }
 0x299   : > { %v2191_v16 = vpop.eup %2190  ;;  %v3959_v48 = vpop.xlane.xlu1 %1567 }
 0x29a   : > { %v1222_v22 = vmul.f32 0.6931472, %v2191_v16  ;;  %v1673_v16 = vadd.f32 1e-12, %v3422_v18  ;;  %v1605_v18 = vmul.f32 0.05, %v3918_v49 }
 0x29b   : > { %v1082_v31 = vpop.xlane.xlu0 %1081  ;;  %v1606_v49 = vmul.f32 0.05, %v3921_v38 }
 0x29c   : > { %v1635_v32 = vmul.f32 %v3373_v9, %v1222_v22  ;;  %v2193_v36 = vpop.eup %2192  ;;  %v1196_v22 = vadd.f32 %v1172_v12, %v3945_v52 }
 0x29d   : > { %v1224_v33 = vmul.f32 0.6931472, %v2193_v36  ;;  %v2195_v51 = vpop.eup %2194 }
 0x29e   : > { %v1651_v57 = vsub.f32 %v1619_v27, %v1635_v32  ;;  %v1084_v45 = vpop.xlane.xlu1 %1083  ;;  %v2197_v63 = vpop.eup %2196  ;;  %v1674_v27 = vadd.f32 1e-12, %v3425_v23  ;;  %v1675_v32 = vadd.f32 1e-12, %v4556_v59  ;;  %v4557_v23 = vld [vmem:[#allocation98_spill] sm:$0xff] }
 0x29f   : > { %v1098_v19 = vpop.xlane.xlu0 %1097  ;;  %v1636_v0 = vmul.f32 %v3370_v4, %v1224_v33  ;;  %v1212_v33 = vadd.f32 1e-12, %v1196_v22 }
 0x2a0   : > { %v1686_v35 = vmul.f32 %v2195_v51, %v1651_v57  ;;  %v1211_v57 = vadd.f32 1e-12, %v1195_v42  ;;  %v1583_v51 = vmul.f32 0.05, %v4557_v23 }
 0x2a1   : > { %v1652_v25 = vsub.f32 %v1620_v41, %v1636_v0  ;;  %v4558_v0 = vmov 0.0  }
 0x2a2   : > { %v1715_v13 = vmul.f32 -1.0, %v1686_v35  ;;  %v1100_v2 = vpop.xlane.xlu1 %1099 }
 0x2a3   : > { %v1151_v28 = vpop.xlane.xlu0 %1150  ;;  %v1688_v7 = vmul.f32 %v2197_v63, %v1652_v25  ;;  %v1621_v63 = vadd.f32 %v1605_v18, %v3913_v34 }
 0x2a4   : > { %v1189_v6 = vadd.f32 %v1151_v28, %v1082_v31  ;;  %v1731_v9 = vmul.f32 %v3365_v11, %v1715_v13  ;;  %v2258_v31 = vld [vmem:[%s2500_s21 + $0x70] sm:$0xff] }
 0x2a5   : > { %v1716_v56 = vmul.f32 -1.0, %v1688_v7  ;;  %vm1263_vm10 = vcmp.ge.s32.totalorder %v2258_v31, 0  ;;  %vm1279_vm12 = vcmp.lt.s32.totalorder %v2258_v31, 128  ;;  %v4559_v7 = vld [vmem:[#allocation92_spill] sm:$0xff] }
 0x2a6   : > { %v1205_v53 = vadd.f32 1e-12, %v1189_v6  ;;  %1748 = vst.msk [vmem:[%s3934_s27 + $0x10] sm:$0xff] %vm1745_vm4, %v1731_v9  ;;  %v1154_v61 = vpop.xlane.xlu1 %1153  ;;  %vm1295_vm15 = vmand %vm1263_vm10, %vm1279_vm12 }
 0x2a7   : > { %v1175_v29 = vpop.xlane.xlu0 %1174  ;;  %v1190_v4 = vadd.f32 %v1154_v61, %v1084_v45  ;;  %v1732_v55 = vmul.f32 %v4553_v10, %v1716_v56  ;;  %v3985_v13 = vsel %vm1295_vm15, 1.0, %v4558_v0  ;;  %v4560_v61 = vld [vmem:[#allocation94_spill] sm:$0xff] }
 0x2a8   : > { %2198 = vlog2.f32 %v1205_v53  ;;  %v1197_v36 = vadd.f32 %v1175_v29, %v1098_v19  ;;  %v1676_v53 = vadd.f32 1e-12, %v4559_v7  ;;  %v1677_v29 = vadd.f32 1e-12, %v4560_v61 }
 0x2a9   : > { %v1206_v11 = vadd.f32 1e-12, %v1190_v4  ;;  %2200 = vrcp.f32 %v1669_v15  ;;  %1749 = vst.msk [vmem:[%s3934_s27 + $0x18] sm:$0xff] %vm1745_vm4, %v1732_v55  ;;  %v3993_v4 = vadd.f32 %v3985_v13, %v1583_v51  ;;  %v1609_v51 = vmul.f32 0.05, %v3896_v30 }
 0x2aa   : > { %v1178_v58 = vpop.xlane.xlu1 %1177  ;;  %v1213_v45 = vadd.f32 1e-12, %v1197_v36  ;;  %v1612_v30 = vmul.f32 0.05, %v3910_v26 }
 0x2ab   : > { %v1086_v46 = vpop.xlane.xlu0 %1085  ;;  %2202 = vlog2.f32 %v1206_v11  ;;  %v1198_v52 = vadd.f32 %v1178_v58, %v1100_v2  ;;  %v1679_v36 = vadd.f32 1e-12, %v3993_v4 }
 0x2ac   : > { %2204 = vrcp.f32 %v1670_v20 }
 0x2ad   : > { %2206 = vrcp.f32 %v1671_v54  ;;  %v1214_v6 = vadd.f32 1e-12, %v1198_v52  ;;  %v4562_v52 = vld [vmem:[#allocation79_spill] sm:$0xff] }
 0x2ae   : > { %2208 = vrcp.f32 %v1672_v14  ;;  %v1088_v39 = vpop.xlane.xlu1 %1087  ;;  %v1622_v14 = vadd.f32 %v1606_v49, %v3916_v43 }
 0x2af   : > { %v1102_v60 = vpop.xlane.xlu0 %1101  ;;  %2210 = vrcp.f32 %v1673_v16  ;;  %v4561_v16 = vld [vmem:[#allocation95_spill] sm:$0xff] }
 0x2b0   : > { %2212 = vrcp.f32 %v1674_v27  ;;  %v1678_v22 = vadd.f32 1e-12, %v4561_v16 }
 0x2b1   : > { %2214 = vrcp.f32 %v1675_v32 }
 0x2b2   : > { %v2199_v12 = vpop.eup %2198  ;;  %2216 = vlog2.f32 %v1211_v57  ;;  %v1104_v35 = vpop.xlane.xlu1 %1103 }
 0x2b3   : > { %v1226_v41 = vmul.f32 0.6931472, %v2199_v12  ;;  %v1157_v19 = vpop.xlane.xlu0 %1156  ;;  %2218 = vlog2.f32 %v1212_v33  ;;  %v2201_v28 = vpop.eup %2200 }
 0x2b4   : > { %v1191_v25 = vadd.f32 %v1157_v19, %v1086_v46  ;;  %2220 = vlog2.f32 %v1213_v45  ;;  %v4563_v19 = vld [vmem:[#allocation97_spill] sm:$0xff] }
 0x2b5   : > { %v1637_v2 = vmul.f32 %v3381_v8, %v1226_v41  ;;  %v2203_v9 = vpop.eup %2202  ;;  %v1680_v0 = vadd.f32 1e-12, %v4563_v19 }
 0x2b6   : > { %v1207_v15 = vadd.f32 1e-12, %v1191_v25  ;;  %v2205_v56 = vpop.eup %2204  ;;  %v1228_v10 = vmul.f32 0.6931472, %v2203_v9  ;;  %v1160_v55 = vpop.xlane.xlu1 %1159  ;;  %v1611_v9 = vmul.f32 0.05, %v3906_v5 }
 0x2b7   : > { %v1653_v20 = vsub.f32 %v1621_v63, %v1637_v2  ;;  %v1181_v34 = vpop.xlane.xlu0 %1180  ;;  %v3995_v54 = vpop.eup %2206  ;;  %v1192_v8 = vadd.f32 %v1160_v55, %v1088_v39  ;;  %v1607_v55 = vmul.f32 0.05, %v3951_v21  ;;  %v1615_v21 = vmul.f32 0.05, %v3956_v24 }
 0x2b8   : > { %2222 = vlog2.f32 %v1207_v15  ;;  %v1199_v38 = vadd.f32 %v1181_v34, %v1102_v60  ;;  %v3997_v11 = vpop.eup %2208  ;;  %v1638_v58 = vmul.f32 %v4552_v40, %v1228_v10  ;;  %v4564_v15 = vld [vmem:[#allocation80_spill] sm:$0xff]  ;;  %v1614_v10 = vmul.f32 0.05, %v3928_v1 }
 0x2b9   : > { %v1690_v42 = vmul.f32 %v2201_v28, %v1653_v20  ;;  %2224 = vlog2.f32 %v1214_v6  ;;  %v2211_v46 = vpop.eup %2210  ;;  %v1208_v31 = vadd.f32 1e-12, %v1192_v8  ;;  %v1613_v20 = vmul.f32 0.05, %v3923_v3 }
 0x2ba   : > { %2226 = vrcp.f32 %v1676_v53  ;;  %v1215_v27 = vadd.f32 1e-12, %v1199_v38  ;;  %v4002_v32 = vpop.eup %2212  ;;  %v1654_v39 = vsub.f32 %v1622_v14, %v1638_v58  ;;  %v1184_v60 = vpop.xlane.xlu1 %1183  ;;  %v1608_v8 = vmul.f32 0.05, %v3954_v47 }
 0x2bb   : > { %2228 = vrcp.f32 %v1677_v29  ;;  %v1717_v57 = vmul.f32 -1.0, %v1690_v42  ;;  %v1470_v43 = vpop.xlane.xlu0 %1469  ;;  %v4005_v33 = vpop.eup %2214  ;;  %v1200_v40 = vadd.f32 %v1184_v60, %v1104_v35  ;;  %v1610_v35 = vmul.f32 0.05, %v3898_v50 }
 0x2bc   : > { %2230 = vlog2.f32 %v1208_v31  ;;  %v2217_v18 = vpop.eup %2216  ;;  %v1692_v45 = vmul.f32 %v2205_v56, %v1654_v39 }
 0x2bd   : > { %v1733_v12 = vmul.f32 %v4562_v52, %v1717_v57  ;;  %2232 = vlog2.f32 %v1215_v27  ;;  %v2219_v23 = vpop.eup %2218  ;;  %v1216_v41 = vadd.f32 1e-12, %v1200_v40  ;;  %v1238_v2 = vmul.f32 0.6931472, %v2217_v18 }
 0x2be   : > { %2234 = vrcp.f32 %v1678_v22  ;;  %v1718_v25 = vmul.f32 -1.0, %v1692_v45  ;;  %v1472_v28 = vpop.xlane.xlu1 %1471  ;;  %v2221_v49 = vpop.eup %2220  ;;  %v1240_v53 = vmul.f32 0.6931472, %v2219_v23  ;;  %v1623_v27 = vadd.f32 %v1607_v55, %v1470_v43  ;;  %v4565_v43 = vld [vmem:[#allocation86_spill] sm:$0xff] }
 0x2bf   : > { %2236 = vrcp.f32 %v1679_v36  ;;  %1750 = vst.msk [vmem:[%s3934_s27 + $0x20] sm:$0xff] %vm1745_vm4, %v1733_v12  ;;  %v1474_v63 = vpop.xlane.xlu0 %1473  ;;  %v1242_v5 = vmul.f32 0.6931472, %v2221_v49  ;;  %v1643_v3 = vmul.f32 %v4556_v59, %v1238_v2  ;;  %v1624_v59 = vadd.f32 %v1608_v8, %v1472_v28 }
 0x2c0   : > { %2238 = vlog2.f32 %v1216_v41  ;;  %v1625_v6 = vadd.f32 %v1609_v51, %v1474_v63  ;;  %v1734_v56 = vmul.f32 %v4564_v15, %v1718_v25  ;;  %v1644_v47 = vmul.f32 %v4559_v7, %v1240_v53 }
 0x2c1   : > { %2240 = vrcp.f32 %v1680_v0  ;;  %v1645_v45 = vmul.f32 %v4560_v61, %v1242_v5 }
 0x2c2   : > { %v2223_v29 = vpop.eup %2222  ;;  %v1657_v50 = vsub.f32 %v1625_v6, %v3926_v62  ;;  %1751 = vst.msk [vmem:[%s3934_s27 + $0x28] sm:$0xff] %vm1745_vm4, %v1734_v56  ;;  %v1476_v38 = vpop.xlane.xlu1 %1475  ;;  %v4567_v56 = vld [vmem:[#allocation88_spill] sm:$0xff] }
 0x2c3   : > { %v2225_v34 = vpop.eup %2224  ;;  %v1230_v26 = vmul.f32 0.6931472, %v2223_v29  ;;  %v1478_v14 = vpop.xlane.xlu0 %1477  ;;  %v1626_v22 = vadd.f32 %v1610_v35, %v1476_v38 }
 0x2c4   : > { %v2227_v42 = vpop.eup %2226  ;;  %v1698_v58 = vmul.f32 %v2211_v46, %v1657_v50  ;;  %v1627_v1 = vadd.f32 %v1611_v9, %v1478_v14  ;;  %v1244_v57 = vmul.f32 0.6931472, %v2225_v34  ;;  %v4568_v34 = vld [vmem:[#allocation82_spill] sm:$0xff] }
 0x2c5   : > { %v2229_v31 = vpop.eup %2228  ;;  %v1639_v62 = vmul.f32 %v4554_v17, %v1230_v26  ;;  %v1658_v60 = vsub.f32 %v1626_v22, %v3943_v37  ;;  %v1616_v26 = vmul.f32 0.05, %v3959_v48 }
 0x2c6   : > { %v2231_v36 = vpop.eup %2230  ;;  %v1721_v39 = vmul.f32 -1.0, %v1698_v58  ;;  %v1659_v40 = vsub.f32 %v1627_v1, %v1643_v3  ;;  %v1480_v12 = vpop.xlane.xlu1 %1479  ;;  %v1646_v2 = vmul.f32 %v4561_v16, %v1244_v57 }
 0x2c7   : > { %v2233_v18 = vpop.eup %2232  ;;  %v1232_v46 = vmul.f32 0.6931472, %v2231_v36  ;;  %v1655_v52 = vsub.f32 %v1623_v27, %v1639_v62  ;;  %v1482_v24 = vpop.xlane.xlu0 %1481  ;;  %v1700_v7 = vmul.f32 %v4002_v32, %v1658_v60  ;;  %v1628_v63 = vadd.f32 %v1612_v30, %v1480_v12  ;;  %v4566_v30 = vld [vmem:[#allocation87_spill] sm:$0xff]  ;;  %v4573_v12 = vld [vmem:[#allocation96_spill] sm:$0xff] }
 0x2c8   : > { %v2235_v23 = vpop.eup %2234  ;;  %v1246_v17 = vmul.f32 0.6931472, %v2233_v18  ;;  %v1737_v51 = vmul.f32 %v4565_v43, %v1721_v39  ;;  %v1702_v41 = vmul.f32 %v4005_v33, %v1659_v40  ;;  %v1629_v49 = vadd.f32 %v1613_v20, %v1482_v24  ;;  %v4571_v36 = vld [vmem:[#allocation91_spill] sm:$0xff] }
 0x2c9   : > { %v2237_v0 = vpop.eup %2236  ;;  %v1694_v37 = vmul.f32 %v3995_v54, %v1655_v52  ;;  %v1640_v25 = vmul.f32 %v4555_v44, %v1232_v46  ;;  %v1722_v61 = vmul.f32 -1.0, %v1700_v7  ;;  %v1660_v53 = vsub.f32 %v1628_v63, %v1644_v47 }
 0x2ca   : > { %v2239_v28 = vpop.eup %2238  ;;  %1754 = vst.msk [vmem:[%s3934_s27 + $0x40] sm:$0xff] %vm1745_vm4, %v1737_v51  ;;  %v1723_v35 = vmul.f32 -1.0, %v1702_v41  ;;  %v1647_v6 = vmul.f32 %v3993_v4, %v1246_v17  ;;  %v1484_v54 = vpop.xlane.xlu1 %1483  ;;  %v1661_v20 = vsub.f32 %v1629_v49, %v1645_v45 }
 0x2cb   : > { %v1248_v9 = vmul.f32 0.6931472, %v2239_v28  ;;  %v1719_v32 = vmul.f32 -1.0, %v1694_v37  ;;  %v1656_v33 = vsub.f32 %v1624_v59, %v1640_v25  ;;  %v1486_v44 = vpop.xlane.xlu0 %1485  ;;  %v1738_v15 = vmul.f32 %v4566_v30, %v1722_v61  ;;  %v2241_v50 = vpop.eup %2240 }
 0x2cc   : > { %v1739_v29 = vmul.f32 %v4567_v56, %v1723_v35  ;;  %v1630_v55 = vadd.f32 %v1614_v10, %v1484_v54  ;;  %v1704_v8 = vmul.f32 %v2227_v42, %v1660_v53  ;;  %v1631_v5 = vadd.f32 %v1615_v21, %v1486_v44  ;;  %v4569_v21 = vld [vmem:[#allocation84_spill] sm:$0xff] }
 0x2cd   : > { %v1735_v16 = vmul.f32 %v4568_v34, %v1719_v32  ;;  %v1696_v4 = vmul.f32 %v3997_v11, %v1656_v33  ;;  %1755 = vst.msk [vmem:[%s3934_s27 + $0x48] sm:$0xff] %vm1745_vm4, %v1738_v15  ;;  %v1706_v38 = vmul.f32 %v2229_v31, %v1661_v20  ;;  %v1648_v48 = vmul.f32 %v4563_v19, %v1248_v9  ;;  %v4570_v31 = vld [vmem:[#allocation89_spill] sm:$0xff] }
 0x2ce   : > { %1756 = vst.msk [vmem:[%s3934_s27 + $0x50] sm:$0xff] %vm1745_vm4, %v1739_v29  ;;  %v1662_v14 = vsub.f32 %v1630_v55, %v1646_v2  ;;  %v1724_v58 = vmul.f32 -1.0, %v1704_v8  ;;  %v1663_v22 = vsub.f32 %v1631_v5, %v1647_v6  ;;  %v1488_v3 = vpop.xlane.xlu1 %1487  ;;  %v4572_v19 = vld [vmem:[#allocation93_spill] sm:$0xff] }
 0x2cf   : > { %1752 = vst.msk [vmem:[%s3934_s27 + $0x30] sm:$0xff] %vm1745_vm4, %v1735_v16  ;;  %v1720_v10 = vmul.f32 -1.0, %v1696_v4  ;;  %v1725_v11 = vmul.f32 -1.0, %v1706_v38  ;;  %v1632_v1 = vadd.f32 %v1616_v26, %v1488_v3 }
 0x2d0   : > { %v1708_v42 = vmul.f32 %v2235_v23, %v1662_v14  ;;  %v1740_v27 = vmul.f32 %v4570_v31, %v1724_v58  ;;  %v1710_v47 = vmul.f32 %v2237_v0, %v1663_v22 }
 0x2d1   : > { %v1736_v62 = vmul.f32 %v4569_v21, %v1720_v10  ;;  %v1741_v57 = vmul.f32 %v4571_v36, %v1725_v11  ;;  %v1664_v60 = vsub.f32 %v1632_v1, %v1648_v48 }
 0x2d2   : > { %v1726_v39 = vmul.f32 -1.0, %v1708_v42  ;;  %1757 = vst.msk [vmem:[%s3934_s27 + $0x58] sm:$0xff] %vm1745_vm4, %v1740_v27  ;;  %v1727_v40 = vmul.f32 -1.0, %v1710_v47 }
 0x2d3   : > { %1753 = vst.msk [vmem:[%s3934_s27 + $0x38] sm:$0xff] %vm1745_vm4, %v1736_v62  ;;  %1758 = vst.msk [vmem:[%s3934_s27 + $0x60] sm:$0xff] %vm1745_vm4, %v1741_v57  ;;  %v1712_v46 = vmul.f32 %v2241_v50, %v1664_v60 }
 0x2d4   : > { %v1742_v18 = vmul.f32 %v4572_v19, %v1726_v39  ;;  %v1743_v52 = vmul.f32 %v3985_v13, %v1727_v40 }
 0x2d5   : > { %v1728_v59 = vmul.f32 -1.0, %v1712_v46 }
 0x2d6   : > { %1759 = vst.msk [vmem:[%s3934_s27 + $0x68] sm:$0xff] %vm1745_vm4, %v1742_v18  ;;  %1760 = vst.msk [vmem:[%s3934_s27 + $0x70] sm:$0xff] %vm1745_vm4, %v1743_v52 }
 0x2d7   : > { %v1744_v45 = vmul.f32 %v4573_v12, %v1728_v59 }
 0x2d9   : > { %1761 = vst.msk [vmem:[%s3934_s27 + $0x78] sm:$0xff] %vm1745_vm4, %v1744_v45 }
 0x2da PF: > { %s14_s15 = sadd.s32 1, %s2265_s15  }
 0x2db   : > { %p11_p4 = scmp.ge.s32.totalorder %s14_s15, 4  }
 0x2dd   :  { %13 = sbr.rel (!%p11_p4) target bundleno = 1 (0x1), region = 70 }

</bundles_post_ra>
